<compile_context>
chip_gen: v5e
topology: v5e:2x2
jax: 0.10.0
libtpu: 0.0.40
codegen_flags: <defaults>
</compile_context>

<pallas_src>
import math

import jax
import jax.numpy as jnp
from jax.experimental import pallas as pl
from jax.experimental.pallas import tpu as pltpu

# -------------------- config (stand-in for bert-base-uncased) --------------------
HIDDEN = 128                       # stands in for 768 (multiple of 128 -> lane dense)
N_HEADS = 4                        # stands in for 12
HEAD_DIM = HIDDEN // N_HEADS       # 32 (logical head width)
HEAD_PAD = 128                     # per-head lane-aligned storage slot
QKV_W = N_HEADS * 3 * HEAD_PAD     # fused, head-padded QKV projection width
N_LAYERS = 2                       # stands in for 12
INTERMEDIATE = 4 * HIDDEN          # 512 (multiple of 128)
VOCAB = 64
TYPE_VOCAB = 2
MAX_POS = 16
LN_EPS = 1e-12
NEG_INF = -1e9


def _layernorm(h, g, b):
    """LayerNorm over the last (lane) dim; h:[R,H] f32, g/b:[1,H] f32."""
    mu = jnp.mean(h, axis=-1, keepdims=True)
    var = jnp.mean((h - mu) ** 2, axis=-1, keepdims=True)
    return (h - mu) * jax.lax.rsqrt(var + LN_EPS) * g + b


# ============================== fused Pallas kernel ==============================

def _bert_fused_kernel(
        emb_ref, bias_ref, emb_g_ref, emb_b_ref,
        wqkv_ref, bqkv_ref, wo_ref, bo_ref, ln1_g_ref, ln1_b_ref,
        w1_ref, b1_ref, w2_ref, b2_ref, ln2_g_ref, ln2_b_ref,
        pool_w_ref, pool_b_ref, cls_w_ref, cls_b_ref,
        out_ref, x_scratch):
    """One grid step == one transformer layer; activations stay resident in VMEM scratch."""
    layer = pl.program_id(0)

    # --- embedding LayerNorm (first grid step only) ---
    @pl.when(layer == 0)
    def _():
        x_scratch[...] = _layernorm(emb_ref[...], emb_g_ref[...], emb_b_ref[...])

    x = x_scratch[...]                                   # [R, H] f32, R = B*S
    rows = x.shape[0]

    # --- attention sub-block: fused QKV -> per-head softmax attn -> out-proj -> add+LN ---
    qkv = (jnp.dot(x.astype(jnp.bfloat16), wqkv_ref[0],
                   preferred_element_type=jnp.float32)
           + bqkv_ref[0]).astype(jnp.bfloat16)           # [R, QKV_W] bf16, cast once
    bias = bias_ref[...]                                 # [R, R] f32 (precomputed outside)
    scale = jnp.float32(1.0 / math.sqrt(HEAD_DIM))
    wo = wo_ref[0]                                       # [N_HEADS*HEAD_PAD, H] bf16

    attn = jnp.zeros_like(x)                             # f32 accumulator
    for h in range(N_HEADS):                             # static unroll
        base = 3 * HEAD_PAD * h                          # 128-lane-aligned slots
        q = qkv[:, base:base + HEAD_PAD]
        k = qkv[:, base + HEAD_PAD:base + 2 * HEAD_PAD]
        v = qkv[:, base + 2 * HEAD_PAD:base + 3 * HEAD_PAD]
        s = jax.lax.dot_general(q, k, (((1,), (1,)), ((), ())),
                                preferred_element_type=jnp.float32) * scale + bias
        m = jnp.max(s, axis=-1, keepdims=True)
        p = jnp.exp(s - m)
        p = p * pl.reciprocal(jnp.sum(p, axis=-1, keepdims=True), approx=True)  # EUP
        ctx = jnp.dot(p.astype(jnp.bfloat16), v, preferred_element_type=jnp.float32)
        # out-projection folded into the head loop (no ctx concat / relayout)
        attn += jnp.dot(ctx.astype(jnp.bfloat16),
                        wo[h * HEAD_PAD:(h + 1) * HEAD_PAD, :],
                        preferred_element_type=jnp.float32)

    x = _layernorm(attn + bo_ref[0] + x, ln1_g_ref[0], ln1_b_ref[0])

    # --- FFN sub-block: GELU(x @ W1 + b1) @ W2 + b2, residual add, LayerNorm ---
    h1 = jnp.dot(x.astype(jnp.bfloat16), w1_ref[0],
                 preferred_element_type=jnp.float32) + b1_ref[0]
    # TODO(synk): BERT uses erf-GELU; tanh approximation used for robust Mosaic lowering.
    h1 = jax.nn.gelu(h1, approximate=True)
    h2 = jnp.dot(h1.astype(jnp.bfloat16), w2_ref[0],
                 preferred_element_type=jnp.float32) + b2_ref[0]
    x = _layernorm(h2 + x, ln2_g_ref[0], ln2_b_ref[0])
    x_scratch[...] = x

    # --- pooler + classifier on the last layer: sigmoid(tanh(cls @ Wp + bp) . wc + bc) ---
    @pl.when(layer == pl.num_programs(0) - 1)
    def _():
        n_cls = out_ref.shape[0]                         # batch size
        seq = rows // n_cls
        cls = jnp.concatenate([x[b * seq:b * seq + 1, :] for b in range(n_cls)], axis=0)
        pooled = jnp.tanh(jnp.dot(cls.astype(jnp.bfloat16), pool_w_ref[...],
                                  preferred_element_type=jnp.float32) + pool_b_ref[...])
        # TODO(synk): nn.Dropout(0.1) is the identity in eval/inference mode.
        logit = jnp.sum(pooled * cls_w_ref[...], axis=-1, keepdims=True) + cls_b_ref[...]
        out_ref[...] = jax.nn.sigmoid(logit)


# ============================== wrapper ==============================

def _cost_estimate(rows, n_cls):
    per_layer = (2 * rows * HIDDEN * QKV_W
                 + N_HEADS * (4 * rows * rows * HEAD_PAD + 2 * rows * HEAD_PAD * HIDDEN)
                 + 4 * rows * HIDDEN * INTERMEDIATE)
    flops = N_LAYERS * per_layer + 2 * n_cls * HIDDEN * HIDDEN + 2 * n_cls * HIDDEN
    transcendentals = (N_LAYERS * (N_HEADS * rows * rows + rows * INTERMEDIATE
                                   + N_HEADS * rows)
                       + n_cls * HIDDEN + n_cls)
    weight_bytes = (N_LAYERS * 2 * (HIDDEN * QKV_W + N_HEADS * HEAD_PAD * HIDDEN
                                    + 2 * HIDDEN * INTERMEDIATE)
                    + 2 * HIDDEN * HIDDEN)
    io_bytes = 4 * (rows * HIDDEN + rows * rows + n_cls
                    + N_LAYERS * (QKV_W + 6 * HIDDEN + INTERMEDIATE) + 3 * HIDDEN + 1)
    return pl.CostEstimate(flops=flops, transcendentals=transcendentals,
                           bytes_accessed=weight_bytes + io_bytes)


def bert_binary_classifier_forward(params, tokens, masks=None):
    """params must come from prepare_params(init_params(...))."""
    B, S = tokens.shape
    rows = B * S
    if masks is None:
        masks = jnp.ones((B, S), jnp.float32)

    # ---- embeddings (data-dependent gathers are glue; done in plain JAX) ----
    pos_ids = jnp.arange(S)
    emb = (params["tok_emb"][tokens]
           + params["pos_emb"][pos_ids][None, :, :]
           + params["typ_emb"][jnp.zeros_like(tokens)])
    emb = emb.reshape(rows, HIDDEN).astype(jnp.float32)

    # Additive attention bias for the flattened (B*S) layout, precomputed once:
    # cross-batch pairs and masked keys get -1e9; everything else 0.
    key_mask = masks.astype(jnp.float32).reshape(1, rows)
    row_batch = jnp.arange(rows) // S
    same_batch = row_batch[:, None] == row_batch[None, :]
    bias = jnp.where(same_batch, (1.0 - key_mask) * jnp.float32(NEG_INF),
                     jnp.float32(NEG_INF))

    lspec = lambda shape: pl.BlockSpec(shape, lambda l: (l, 0, 0))   # per-layer (double-buffered)
    cspec = lambda shape: pl.BlockSpec(shape, lambda l: (0, 0))      # layer-invariant

    return pl.pallas_call(
        _bert_fused_kernel,
        grid=(N_LAYERS,),
        in_specs=[
            cspec((rows, HIDDEN)),                   # embeddings
            cspec((rows, rows)),                     # attention bias
            cspec((1, HIDDEN)),                      # emb LN gamma
            cspec((1, HIDDEN)),                      # emb LN beta
            lspec((1, HIDDEN, QKV_W)),               # fused head-padded QKV weight (bf16)
            lspec((1, 1, QKV_W)),                    # fused QKV bias
            lspec((1, N_HEADS * HEAD_PAD, HIDDEN)),  # head-padded out-proj weight (bf16)
            lspec((1, 1, HIDDEN)),                   # out-proj bias
            lspec((1, 1, HIDDEN)),                   # LN1 gamma
            lspec((1, 1, HIDDEN)),                   # LN1 beta
            lspec((1, HIDDEN, INTERMEDIATE)),        # FFN W1 (bf16)
            lspec((1, 1, INTERMEDIATE)),             # FFN b1
            lspec((1, INTERMEDIATE, HIDDEN)),        # FFN W2 (bf16)
            lspec((1, 1, HIDDEN)),                   # FFN b2
            lspec((1, 1, HIDDEN)),                   # LN2 gamma
            lspec((1, 1, HIDDEN)),                   # LN2 beta
            cspec((HIDDEN, HIDDEN)),                 # pooler W (bf16)
            cspec((1, HIDDEN)),                      # pooler b
            cspec((1, HIDDEN)),                      # classifier w^T (f32 lane reduce)
            cspec((1, 1)),                           # classifier b
        ],
        out_specs=pl.BlockSpec((B, 1), lambda l: (0, 0)),
        out_shape=jax.ShapeDtypeStruct((B, 1), jnp.float32),
        scratch_shapes=[pltpu.VMEM((rows, HIDDEN), jnp.float32)],   # resident activations
        compiler_params=pltpu.CompilerParams(
            dimension_semantics=("arbitrary",)),     # layers are sequential (carry in scratch)
        cost_estimate=_cost_estimate(rows, B),
    )(emb, bias, params["emb_ln_g"], params["emb_ln_b"],
      params["wqkv"], params["bqkv"], params["wo"], params["bo"],
      params["ln1_g"], params["ln1_b"],
      params["w1"], params["b1"], params["w2"], params["b2"],
      params["ln2_g"], params["ln2_b"],
      params["pool_w"], params["pool_b"], params["cls_w_t"], params["cls_b"])


# ============================== parameters ==============================

def init_params(seed=0):
    """PyTorch-module-shaped parameters (separate wq/wk/wv etc.), all f32.
    TODO(synk): stands in for BertModel.from_pretrained('bert-base-uncased') weights."""
    base = jax.random.PRNGKey(seed)
    counter = [0]

    def nxt():
        counter[0] += 1
        return jax.random.fold_in(base, counter[0])

    def normal(shape):
        return 0.02 * jax.random.normal(nxt(), shape, dtype=jnp.float32)

    zeros = lambda shape: jnp.zeros(shape, jnp.float32)
    ones = lambda shape: jnp.ones(shape, jnp.float32)

    params = {
        "tok_emb": normal((VOCAB, HIDDEN)),
        "pos_emb": normal((MAX_POS, HIDDEN)),
        "typ_emb": normal((TYPE_VOCAB, HIDDEN)),
        "emb_ln_g": ones((1, HIDDEN)), "emb_ln_b": zeros((1, HIDDEN)),
        "layers": [],
        "pool_w": normal((HIDDEN, HIDDEN)), "pool_b": zeros((1, HIDDEN)),
        "cls_w": normal((HIDDEN, 1)),        # nn.Linear(768, 1) -> Linear(HIDDEN, 1)
        "cls_b": zeros((1, 1)),
    }
    for _ in range(N_LAYERS):
        params["layers"].append({
            "wq": normal((HIDDEN, HIDDEN)), "bq": zeros((1, HIDDEN)),
            "wk": normal((HIDDEN, HIDDEN)), "bk": zeros((1, HIDDEN)),
            "wv": normal((HIDDEN, HIDDEN)), "bv": zeros((1, HIDDEN)),
            "wo": normal((HIDDEN, HIDDEN)), "bo": zeros((1, HIDDEN)),
            "ln1_g": ones((1, HIDDEN)), "ln1_b": zeros((1, HIDDEN)),
            "w1": normal((HIDDEN, INTERMEDIATE)), "b1": zeros((1, INTERMEDIATE)),
            "w2": normal((INTERMEDIATE, HIDDEN)), "b2": zeros((1, HIDDEN)),
            "ln2_g": ones((1, HIDDEN)), "ln2_b": zeros((1, HIDDEN)),
        })
    return params


def prepare_params(raw):
    """Fuse QKV into a head-padded (128-lane aligned per head) weight, pad the out-proj
    rows to match, stack per-layer weights along a leading L axis, and cast matmul weights
    to bf16. Biases / LayerNorm params stay f32."""
    bf16 = lambda w: w.astype(jnp.bfloat16)

    def pad_qkv(lyr):
        w = jnp.zeros((HIDDEN, QKV_W), jnp.float32)
        b = jnp.zeros((1, QKV_W), jnp.float32)
        for h in range(N_HEADS):
            base = 3 * HEAD_PAD * h
            sl = slice(h * HEAD_DIM, (h + 1) * HEAD_DIM)
            w = w.at[:, base:base + HEAD_DIM].set(lyr["wq"][:, sl])
            w = w.at[:, base + HEAD_PAD:base + HEAD_PAD + HEAD_DIM].set(lyr["wk"][:, sl])
            w = w.at[:, base + 2 * HEAD_PAD:base + 2 * HEAD_PAD + HEAD_DIM].set(lyr["wv"][:, sl])
            b = b.at[:, base:base + HEAD_DIM].set(lyr["bq"][:, sl])
            b = b.at[:, base + HEAD_PAD:base + HEAD_PAD + HEAD_DIM].set(lyr["bk"][:, sl])
            b = b.at[:, base + 2 * HEAD_PAD:base + 2 * HEAD_PAD + HEAD_DIM].set(lyr["bv"][:, sl])
        return w, b

    def pad_wo(lyr):
        w = jnp.zeros((N_HEADS * HEAD_PAD, HIDDEN), jnp.float32)
        for h in range(N_HEADS):
            w = w.at[h * HEAD_PAD:h * HEAD_PAD + HEAD_DIM, :].set(
                lyr["wo"][h * HEAD_DIM:(h + 1) * HEAD_DIM, :])
        return w

    wqkv_l, bqkv_l, wo_l = [], [], []
    for lyr in raw["layers"]:
        w, b = pad_qkv(lyr)
        wqkv_l.append(w); bqkv_l.append(b); wo_l.append(pad_wo(lyr))

    stack = lambda key: jnp.stack([l[key] for l in raw["layers"]], axis=0)
    return {
        "tok_emb": raw["tok_emb"], "pos_emb": raw["pos_emb"], "typ_emb": raw["typ_emb"],
        "emb_ln_g": raw["emb_ln_g"], "emb_ln_b": raw["emb_ln_b"],
        "wqkv": bf16(jnp.stack(wqkv_l)), "bqkv": jnp.stack(bqkv_l),
        "wo": bf16(jnp.stack(wo_l)), "bo": stack("bo"),
        "ln1_g": stack("ln1_g"), "ln1_b": stack("ln1_b"),
        "w1": bf16(stack("w1")), "b1": stack("b1"),
        "w2": bf16(stack("w2")), "b2": stack("b2"),
        "ln2_g": stack("ln2_g"), "ln2_b": stack("ln2_b"),
        "pool_w": bf16(raw["pool_w"]), "pool_b": raw["pool_b"],
        "cls_w_t": raw["cls_w"].T,           # [1, HIDDEN] f32, used as a lane reduce
        "cls_b": raw["cls_b"],
    }


# ============================== pure-JAX reference ==============================

def reference_forward(raw, tokens, masks):
    """Standard (unpadded, per-head) BERT math in f32, with matmul weights rounded
    through bf16 to mirror the kernel's weight storage."""
    rnd = lambda w: w.astype(jnp.bfloat16).astype(jnp.float32)
    B, S = tokens.shape
    pos = jnp.arange(S)
    x = (raw["tok_emb"][tokens] + raw["pos_emb"][pos][None, :, :]
         + raw["typ_emb"][jnp.zeros_like(tokens)]).astype(jnp.float32)

    def ln(h, g, b):
        mu = jnp.mean(h, -1, keepdims=True)
        var = jnp.mean((h - mu) ** 2, -1, keepdims=True)
        return (h - mu) / jnp.sqrt(var + LN_EPS) * g + b

    x = ln(x, raw["emb_ln_g"], raw["emb_ln_b"])
    bias = (1.0 - masks.astype(jnp.float32))[:, None, None, :] * NEG_INF

    def heads(t):
        return t.reshape(B, S, N_HEADS, HEAD_DIM).transpose(0, 2, 1, 3)

    for lyr in raw["layers"]:
        q = x @ rnd(lyr["wq"]) + lyr["bq"]
        k = x @ rnd(lyr["wk"]) + lyr["bk"]
        v = x @ rnd(lyr["wv"]) + lyr["bv"]
        s = jnp.einsum("bhqd,bhkd->bhqk", heads(q), heads(k)) / math.sqrt(HEAD_DIM) + bias
        p = jax.nn.softmax(s, axis=-1)
        ctx = jnp.einsum("bhqk,bhkd->bhqd", p, heads(v)).transpose(0, 2, 1, 3)
        ctx = ctx.reshape(B, S, HIDDEN)
        x = ln(ctx @ rnd(lyr["wo"]) + lyr["bo"] + x, lyr["ln1_g"], lyr["ln1_b"])
        ff = jax.nn.gelu(x @ rnd(lyr["w1"]) + lyr["b1"], approximate=True)
        ff = ff @ rnd(lyr["w2"]) + lyr["b2"]
        x = ln(ff + x, lyr["ln2_g"], lyr["ln2_b"])

    cls = x[:, 0, :]
    pooled = jnp.tanh(cls @ rnd(raw["pool_w"]) + raw["pool_b"])
    logit = pooled @ raw["cls_w"] + raw["cls_b"]
    return jax.nn.sigmoid(logit)


# ============================== main ==============================

if __name__ == "__main__":
    B, S = 2, 8
    key = jax.random.PRNGKey(0)
    tok_key, _ = jax.random.split(key)
    tokens = jax.random.randint(tok_key, (B, S), 0, VOCAB, dtype=jnp.int32)
    masks = jnp.ones((B, S), jnp.float32)
    masks = masks.at[1, -2:].set(0.0)     # exercise the attention-mask path

    raw = init_params(0)
    params = prepare_params(raw)

    fwd = jax.jit(bert_binary_classifier_forward)
    proba = jax.block_until_ready(fwd(params, tokens, masks))

    assert proba.shape == (B, 1), proba.shape
    assert bool(jnp.all(jnp.isfinite(proba)))
    assert bool(jnp.all((proba >= 0.0) & (proba <= 1.0)))

    ref = reference_forward(raw, tokens, masks)
    assert bool(jnp.all(jnp.abs(proba - ref) < 2e-2)), (proba, ref)

    print("KERNEL_OK")
</pallas_src>

<mosaic_0001>
module attributes {stable_mosaic.version = 11 : i64} {
  func.func @_bert_fused_kernel(%arg0: i32, %arg1: memref<16x128xf32, #tpu.memory_space<vmem>>, %arg2: memref<16x16xf32, #tpu.memory_space<vmem>>, %arg3: memref<1x128xf32, #tpu.memory_space<vmem>>, %arg4: memref<1x128xf32, #tpu.memory_space<vmem>>, %arg5: memref<1x128x1536xbf16, #tpu.memory_space<vmem>>, %arg6: memref<1x1x1536xf32, #tpu.memory_space<vmem>>, %arg7: memref<1x512x128xbf16, #tpu.memory_space<vmem>>, %arg8: memref<1x1x128xf32, #tpu.memory_space<vmem>>, %arg9: memref<1x1x128xf32, #tpu.memory_space<vmem>>, %arg10: memref<1x1x128xf32, #tpu.memory_space<vmem>>, %arg11: memref<1x128x512xbf16, #tpu.memory_space<vmem>>, %arg12: memref<1x1x512xf32, #tpu.memory_space<vmem>>, %arg13: memref<1x512x128xbf16, #tpu.memory_space<vmem>>, %arg14: memref<1x1x128xf32, #tpu.memory_space<vmem>>, %arg15: memref<1x1x128xf32, #tpu.memory_space<vmem>>, %arg16: memref<1x1x128xf32, #tpu.memory_space<vmem>>, %arg17: memref<128x128xbf16, #tpu.memory_space<vmem>>, %arg18: memref<1x128xf32, #tpu.memory_space<vmem>>, %arg19: memref<1x128xf32, #tpu.memory_space<vmem>>, %arg20: memref<1x1xf32, #tpu.memory_space<vmem>>, %arg21: memref<2x1xf32, #tpu.memory_space<vmem>>, %arg22: memref<16x128xf32, #tpu.memory_space<vmem>>) attributes {dimension_semantics = [#tpu.dimension_semantics<arbitrary>], iteration_bounds = array<i64: 2>, scalar_prefetch = 0 : i64, scratch_operands = 1 : i64, tpu.core_type = #tpu.core_type<tc>, window_params = [{pipeline_mode = #tpu.pipeline_mode<synchronous>, transform_indices = @transform_0, window_bounds = array<i64: 16, 128>}, {pipeline_mode = #tpu.pipeline_mode<synchronous>, transform_indices = @transform_1, window_bounds = array<i64: 16, 16>}, {pipeline_mode = #tpu.pipeline_mode<synchronous>, transform_indices = @transform_2, window_bounds = array<i64: 1, 128>}, {pipeline_mode = #tpu.pipeline_mode<synchronous>, transform_indices = @transform_3, window_bounds = array<i64: 1, 128>}, {transform_indices = @transform_4, window_bounds = array<i64: 1, 128, 1536>}, {transform_indices = @transform_5, window_bounds = array<i64: 1, 1, 1536>}, {transform_indices = @transform_6, window_bounds = array<i64: 1, 512, 128>}, {transform_indices = @transform_7, window_bounds = array<i64: 1, 1, 128>}, {transform_indices = @transform_8, window_bounds = array<i64: 1, 1, 128>}, {transform_indices = @transform_9, window_bounds = array<i64: 1, 1, 128>}, {transform_indices = @transform_10, window_bounds = array<i64: 1, 128, 512>}, {transform_indices = @transform_11, window_bounds = array<i64: 1, 1, 512>}, {transform_indices = @transform_12, window_bounds = array<i64: 1, 512, 128>}, {transform_indices = @transform_13, window_bounds = array<i64: 1, 1, 128>}, {transform_indices = @transform_14, window_bounds = array<i64: 1, 1, 128>}, {transform_indices = @transform_15, window_bounds = array<i64: 1, 1, 128>}, {pipeline_mode = #tpu.pipeline_mode<synchronous>, transform_indices = @transform_16, window_bounds = array<i64: 128, 128>}, {pipeline_mode = #tpu.pipeline_mode<synchronous>, transform_indices = @transform_17, window_bounds = array<i64: 1, 128>}, {pipeline_mode = #tpu.pipeline_mode<synchronous>, transform_indices = @transform_18, window_bounds = array<i64: 1, 128>}, {pipeline_mode = #tpu.pipeline_mode<synchronous>, transform_indices = @transform_19, window_bounds = array<i64: 1, 1>}, {pipeline_mode = #tpu.pipeline_mode<synchronous>, transform_indices = @transform_20, window_bounds = array<i64: 2, 1>}]} {
    %c0_i32 = arith.constant 0 : i32
    %0 = arith.cmpi eq, %arg0, %c0_i32 : i32
    %1 = arith.extui %0 : i1 to i32
    %c0_i32_0 = arith.constant 0 : i32
    %2 = arith.cmpi ne, %1, %c0_i32_0 : i32
    scf.if %2 {
      %c0_84 = arith.constant 0 : index
      %c0_85 = arith.constant 0 : index
      %200 = vector.load %arg1[%c0_84, %c0_85] : memref<16x128xf32, #tpu.memory_space<vmem>>, vector<16x128xf32>
      %c0_86 = arith.constant 0 : index
      %c0_87 = arith.constant 0 : index
      %201 = vector.load %arg3[%c0_86, %c0_87] : memref<1x128xf32, #tpu.memory_space<vmem>>, vector<1x128xf32>
      %c0_88 = arith.constant 0 : index
      %c0_89 = arith.constant 0 : index
      %202 = vector.load %arg4[%c0_88, %c0_89] : memref<1x128xf32, #tpu.memory_space<vmem>>, vector<1x128xf32>
      %cst_90 = arith.constant dense<0.000000e+00> : vector<16xf32>
      %203 = vector.multi_reduction <add>, %200, %cst_90 [1] : vector<16x128xf32> to vector<16xf32>
      %204 = vector.shape_cast %203 : vector<16xf32> to vector<16x1xf32>
      %cst_91 = arith.constant 1.280000e+02 : f32
      %205 = vector.broadcast %cst_91 : f32 to vector<16x1xf32>
      %206 = arith.divf %204, %205 : vector<16x1xf32>
      %207 = vector.broadcast %206 : vector<16x1xf32> to vector<16x128xf32>
      %208 = arith.subf %200, %207 : vector<16x128xf32>
      %209 = arith.mulf %208, %208 : vector<16x128xf32>
      %cst_92 = arith.constant dense<0.000000e+00> : vector<16xf32>
      %210 = vector.multi_reduction <add>, %209, %cst_92 [1] : vector<16x128xf32> to vector<16xf32>
      %211 = vector.shape_cast %210 : vector<16xf32> to vector<16x1xf32>
      %cst_93 = arith.constant 1.280000e+02 : f32
      %212 = vector.broadcast %cst_93 : f32 to vector<16x1xf32>
      %213 = arith.divf %211, %212 : vector<16x1xf32>
      %214 = vector.broadcast %206 : vector<16x1xf32> to vector<16x128xf32>
      %215 = arith.subf %200, %214 : vector<16x128xf32>
      %cst_94 = arith.constant 9.99999996E-13 : f32
      %216 = vector.broadcast %cst_94 : f32 to vector<16x1xf32>
      %217 = arith.addf %213, %216 : vector<16x1xf32>
      %218 = math.rsqrt %217 : vector<16x1xf32>
      %219 = vector.broadcast %218 : vector<16x1xf32> to vector<16x128xf32>
      %220 = arith.mulf %215, %219 : vector<16x128xf32>
      %221 = vector.broadcast %201 : vector<1x128xf32> to vector<16x128xf32>
      %222 = arith.mulf %220, %221 : vector<16x128xf32>
      %223 = vector.broadcast %202 : vector<1x128xf32> to vector<16x128xf32>
      %224 = arith.addf %222, %223 : vector<16x128xf32>
      %c0_95 = arith.constant 0 : index
      %c0_96 = arith.constant 0 : index
      %225 = vector.load %arg22[%c0_95, %c0_96] : memref<16x128xf32, #tpu.memory_space<vmem>>, vector<16x128xf32>
      tpu.vector_store %arg22[%c0_95, %c0_96], %224 {strides = array<i32>} : memref<16x128xf32, #tpu.memory_space<vmem>>, vector<16x128xf32>,
    } else {
    }
    %c0 = arith.constant 0 : index
    %c0_1 = arith.constant 0 : index
    %3 = vector.load %arg22[%c0, %c0_1] : memref<16x128xf32, #tpu.memory_space<vmem>>, vector<16x128xf32>
    %4 = arith.truncf %3 : vector<16x128xf32> to vector<16x128xbf16>
    %c0_2 = arith.constant 0 : index
    %c0_3 = arith.constant 0 : index
    %c0_4 = arith.constant 0 : index
    %5 = vector.load %arg5[%c0_2, %c0_3, %c0_4] : memref<1x128x1536xbf16, #tpu.memory_space<vmem>>, vector<1x128x1536xbf16>
    %6 = vector.shape_cast %5 : vector<1x128x1536xbf16> to vector<128x1536xbf16>
    %cst = arith.constant dense<0.000000e+00> : vector<16x1536xf32>
    %7 = tpu.matmul %4, %6, %cst {dimension_numbers = #tpu.dot_dimension_numbers<[1], [0], [0], [1], [0, 0, 1, 1], [], []>} : vector<16x128xbf16>, vector<128x1536xbf16>, vector<16x1536xf32> -> vector<16x1536xf32>
    %c0_5 = arith.constant 0 : index
    %c0_6 = arith.constant 0 : index
    %c0_7 = arith.constant 0 : index
    %8 = vector.load %arg6[%c0_5, %c0_6, %c0_7] : memref<1x1x1536xf32, #tpu.memory_space<vmem>>, vector<1x1x1536xf32>
    %9 = vector.shape_cast %8 : vector<1x1x1536xf32> to vector<1x1536xf32>
    %10 = vector.broadcast %9 : vector<1x1536xf32> to vector<16x1536xf32>
    %11 = arith.addf %7, %10 : vector<16x1536xf32>
    %12 = arith.truncf %11 : vector<16x1536xf32> to vector<16x1536xbf16>
    %c0_8 = arith.constant 0 : index
    %c0_9 = arith.constant 0 : index
    %13 = vector.load %arg2[%c0_8, %c0_9] : memref<16x16xf32, #tpu.memory_space<vmem>>, vector<16x16xf32>
    %c0_10 = arith.constant 0 : index
    %c0_11 = arith.constant 0 : index
    %c0_12 = arith.constant 0 : index
    %14 = vector.load %arg7[%c0_10, %c0_11, %c0_12] : memref<1x512x128xbf16, #tpu.memory_space<vmem>>, vector<1x512x128xbf16>
    %15 = vector.shape_cast %14 : vector<1x512x128xbf16> to vector<512x128xbf16>
    %cst_13 = arith.constant 0.000000e+00 : f32
    %16 = vector.broadcast %cst_13 : f32 to vector<16x128xf32>
    %17 = vector.extract_strided_slice %12 {offsets = [0, 0], sizes = [16, 128], strides = [1, 1]} : vector<16x1536xbf16> to vector<16x128xbf16>
    %18 = vector.extract_strided_slice %12 {offsets = [0, 128], sizes = [16, 128], strides = [1, 1]} : vector<16x1536xbf16> to vector<16x128xbf16>
    %19 = vector.extract_strided_slice %12 {offsets = [0, 256], sizes = [16, 128], strides = [1, 1]} : vector<16x1536xbf16> to vector<16x128xbf16>
    %cst_14 = arith.constant dense<0.000000e+00> : vector<16x16xf32>
    %20 = tpu.matmul %17, %18, %cst_14 {dimension_numbers = #tpu.dot_dimension_numbers<[1], [1], [0], [0], [0, 0, 1, 0], [], []>} : vector<16x128xbf16>, vector<16x128xbf16>, vector<16x16xf32> -> vector<16x16xf32>
    %cst_15 = arith.constant 0.176776692 : f32
    %21 = vector.broadcast %cst_15 : f32 to vector<16x16xf32>
    %22 = arith.mulf %20, %21 : vector<16x16xf32>
    %23 = arith.addf %22, %13 : vector<16x16xf32>
    %cst_16 = arith.constant dense<0xFF800000> : vector<16xf32>
    %24 = vector.multi_reduction <maximumf>, %23, %cst_16 [1] : vector<16x16xf32> to vector<16xf32>
    %25 = vector.shape_cast %24 : vector<16xf32> to vector<16x1xf32>
    %26 = vector.broadcast %25 : vector<16x1xf32> to vector<16x16xf32>
    %27 = arith.subf %23, %26 : vector<16x16xf32>
    %28 = math.exp %27 : vector<16x16xf32>
    %cst_17 = arith.constant dense<0.000000e+00> : vector<16xf32>
    %29 = vector.multi_reduction <add>, %28, %cst_17 [1] : vector<16x16xf32> to vector<16xf32>
    %30 = vector.shape_cast %29 : vector<16xf32> to vector<16x1xf32>
    %31 = tpu.reciprocal %30 {approx = true} : vector<16x1xf32> -> vector<16x1xf32>
    %32 = vector.broadcast %31 : vector<16x1xf32> to vector<16x16xf32>
    %33 = arith.mulf %28, %32 : vector<16x16xf32>
    %34 = arith.truncf %33 : vector<16x16xf32> to vector<16x16xbf16>
    %cst_18 = arith.constant dense<0.000000e+00> : vector<16x128xf32>
    %35 = tpu.matmul %34, %19, %cst_18 {dimension_numbers = #tpu.dot_dimension_numbers<[1], [0], [0], [1], [0, 0, 1, 1], [], []>} : vector<16x16xbf16>, vector<16x128xbf16>, vector<16x128xf32> -> vector<16x128xf32>
    %36 = arith.truncf %35 : vector<16x128xf32> to vector<16x128xbf16>
    %37 = vector.extract_strided_slice %15 {offsets = [0, 0], sizes = [128, 128], strides = [1, 1]} : vector<512x128xbf16> to vector<128x128xbf16>
    %cst_19 = arith.constant dense<0.000000e+00> : vector<16x128xf32>
    %38 = tpu.matmul %36, %37, %cst_19 {dimension_numbers = #tpu.dot_dimension_numbers<[1], [0], [0], [1], [0, 0, 1, 1], [], []>} : vector<16x128xbf16>, vector<128x128xbf16>, vector<16x128xf32> -> vector<16x128xf32>
    %39 = arith.addf %16, %38 : vector<16x128xf32>
    %40 = vector.extract_strided_slice %12 {offsets = [0, 384], sizes = [16, 128], strides = [1, 1]} : vector<16x1536xbf16> to vector<16x128xbf16>
    %41 = vector.extract_strided_slice %12 {offsets = [0, 512], sizes = [16, 128], strides = [1, 1]} : vector<16x1536xbf16> to vector<16x128xbf16>
    %42 = vector.extract_strided_slice %12 {offsets = [0, 640], sizes = [16, 128], strides = [1, 1]} : vector<16x1536xbf16> to vector<16x128xbf16>
    %cst_20 = arith.constant dense<0.000000e+00> : vector<16x16xf32>
    %43 = tpu.matmul %40, %41, %cst_20 {dimension_numbers = #tpu.dot_dimension_numbers<[1], [1], [0], [0], [0, 0, 1, 0], [], []>} : vector<16x128xbf16>, vector<16x128xbf16>, vector<16x16xf32> -> vector<16x16xf32>
    %cst_21 = arith.constant 0.176776692 : f32
    %44 = vector.broadcast %cst_21 : f32 to vector<16x16xf32>
    %45 = arith.mulf %43, %44 : vector<16x16xf32>
    %46 = arith.addf %45, %13 : vector<16x16xf32>
    %cst_22 = arith.constant dense<0xFF800000> : vector<16xf32>
    %47 = vector.multi_reduction <maximumf>, %46, %cst_22 [1] : vector<16x16xf32> to vector<16xf32>
    %48 = vector.shape_cast %47 : vector<16xf32> to vector<16x1xf32>
    %49 = vector.broadcast %48 : vector<16x1xf32> to vector<16x16xf32>
    %50 = arith.subf %46, %49 : vector<16x16xf32>
    %51 = math.exp %50 : vector<16x16xf32>
    %cst_23 = arith.constant dense<0.000000e+00> : vector<16xf32>
    %52 = vector.multi_reduction <add>, %51, %cst_23 [1] : vector<16x16xf32> to vector<16xf32>
    %53 = vector.shape_cast %52 : vector<16xf32> to vector<16x1xf32>
    %54 = tpu.reciprocal %53 {approx = true} : vector<16x1xf32> -> vector<16x1xf32>
    %55 = vector.broadcast %54 : vector<16x1xf32> to vector<16x16xf32>
    %56 = arith.mulf %51, %55 : vector<16x16xf32>
    %57 = arith.truncf %56 : vector<16x16xf32> to vector<16x16xbf16>
    %cst_24 = arith.constant dense<0.000000e+00> : vector<16x128xf32>
    %58 = tpu.matmul %57, %42, %cst_24 {dimension_numbers = #tpu.dot_dimension_numbers<[1], [0], [0], [1], [0, 0, 1, 1], [], []>} : vector<16x16xbf16>, vector<16x128xbf16>, vector<16x128xf32> -> vector<16x128xf32>
    %59 = arith.truncf %58 : vector<16x128xf32> to vector<16x128xbf16>
    %60 = vector.extract_strided_slice %15 {offsets = [128, 0], sizes = [128, 128], strides = [1, 1]} : vector<512x128xbf16> to vector<128x128xbf16>
    %cst_25 = arith.constant dense<0.000000e+00> : vector<16x128xf32>
    %61 = tpu.matmul %59, %60, %cst_25 {dimension_numbers = #tpu.dot_dimension_numbers<[1], [0], [0], [1], [0, 0, 1, 1], [], []>} : vector<16x128xbf16>, vector<128x128xbf16>, vector<16x128xf32> -> vector<16x128xf32>
    %62 = arith.addf %39, %61 : vector<16x128xf32>
    %63 = vector.extract_strided_slice %12 {offsets = [0, 768], sizes = [16, 128], strides = [1, 1]} : vector<16x1536xbf16> to vector<16x128xbf16>
    %64 = vector.extract_strided_slice %12 {offsets = [0, 896], sizes = [16, 128], strides = [1, 1]} : vector<16x1536xbf16> to vector<16x128xbf16>
    %65 = vector.extract_strided_slice %12 {offsets = [0, 1024], sizes = [16, 128], strides = [1, 1]} : vector<16x1536xbf16> to vector<16x128xbf16>
    %cst_26 = arith.constant dense<0.000000e+00> : vector<16x16xf32>
    %66 = tpu.matmul %63, %64, %cst_26 {dimension_numbers = #tpu.dot_dimension_numbers<[1], [1], [0], [0], [0, 0, 1, 0], [], []>} : vector<16x128xbf16>, vector<16x128xbf16>, vector<16x16xf32> -> vector<16x16xf32>
    %cst_27 = arith.constant 0.176776692 : f32
    %67 = vector.broadcast %cst_27 : f32 to vector<16x16xf32>
    %68 = arith.mulf %66, %67 : vector<16x16xf32>
    %69 = arith.addf %68, %13 : vector<16x16xf32>
    %cst_28 = arith.constant dense<0xFF800000> : vector<16xf32>
    %70 = vector.multi_reduction <maximumf>, %69, %cst_28 [1] : vector<16x16xf32> to vector<16xf32>
    %71 = vector.shape_cast %70 : vector<16xf32> to vector<16x1xf32>
    %72 = vector.broadcast %71 : vector<16x1xf32> to vector<16x16xf32>
    %73 = arith.subf %69, %72 : vector<16x16xf32>
    %74 = math.exp %73 : vector<16x16xf32>
    %cst_29 = arith.constant dense<0.000000e+00> : vector<16xf32>
    %75 = vector.multi_reduction <add>, %74, %cst_29 [1] : vector<16x16xf32> to vector<16xf32>
    %76 = vector.shape_cast %75 : vector<16xf32> to vector<16x1xf32>
    %77 = tpu.reciprocal %76 {approx = true} : vector<16x1xf32> -> vector<16x1xf32>
    %78 = vector.broadcast %77 : vector<16x1xf32> to vector<16x16xf32>
    %79 = arith.mulf %74, %78 : vector<16x16xf32>
    %80 = arith.truncf %79 : vector<16x16xf32> to vector<16x16xbf16>
    %cst_30 = arith.constant dense<0.000000e+00> : vector<16x128xf32>
    %81 = tpu.matmul %80, %65, %cst_30 {dimension_numbers = #tpu.dot_dimension_numbers<[1], [0], [0], [1], [0, 0, 1, 1], [], []>} : vector<16x16xbf16>, vector<16x128xbf16>, vector<16x128xf32> -> vector<16x128xf32>
    %82 = arith.truncf %81 : vector<16x128xf32> to vector<16x128xbf16>
    %83 = vector.extract_strided_slice %15 {offsets = [256, 0], sizes = [128, 128], strides = [1, 1]} : vector<512x128xbf16> to vector<128x128xbf16>
    %cst_31 = arith.constant dense<0.000000e+00> : vector<16x128xf32>
    %84 = tpu.matmul %82, %83, %cst_31 {dimension_numbers = #tpu.dot_dimension_numbers<[1], [0], [0], [1], [0, 0, 1, 1], [], []>} : vector<16x128xbf16>, vector<128x128xbf16>, vector<16x128xf32> -> vector<16x128xf32>
    %85 = arith.addf %62, %84 : vector<16x128xf32>
    %86 = vector.extract_strided_slice %12 {offsets = [0, 1152], sizes = [16, 128], strides = [1, 1]} : vector<16x1536xbf16> to vector<16x128xbf16>
    %87 = vector.extract_strided_slice %12 {offsets = [0, 1280], sizes = [16, 128], strides = [1, 1]} : vector<16x1536xbf16> to vector<16x128xbf16>
    %88 = vector.extract_strided_slice %12 {offsets = [0, 1408], sizes = [16, 128], strides = [1, 1]} : vector<16x1536xbf16> to vector<16x128xbf16>
    %cst_32 = arith.constant dense<0.000000e+00> : vector<16x16xf32>
    %89 = tpu.matmul %86, %87, %cst_32 {dimension_numbers = #tpu.dot_dimension_numbers<[1], [1], [0], [0], [0, 0, 1, 0], [], []>} : vector<16x128xbf16>, vector<16x128xbf16>, vector<16x16xf32> -> vector<16x16xf32>
    %cst_33 = arith.constant 0.176776692 : f32
    %90 = vector.broadcast %cst_33 : f32 to vector<16x16xf32>
    %91 = arith.mulf %89, %90 : vector<16x16xf32>
    %92 = arith.addf %91, %13 : vector<16x16xf32>
    %cst_34 = arith.constant dense<0xFF800000> : vector<16xf32>
    %93 = vector.multi_reduction <maximumf>, %92, %cst_34 [1] : vector<16x16xf32> to vector<16xf32>
    %94 = vector.shape_cast %93 : vector<16xf32> to vector<16x1xf32>
    %95 = vector.broadcast %94 : vector<16x1xf32> to vector<16x16xf32>
    %96 = arith.subf %92, %95 : vector<16x16xf32>
    %97 = math.exp %96 : vector<16x16xf32>
    %cst_35 = arith.constant dense<0.000000e+00> : vector<16xf32>
    %98 = vector.multi_reduction <add>, %97, %cst_35 [1] : vector<16x16xf32> to vector<16xf32>
    %99 = vector.shape_cast %98 : vector<16xf32> to vector<16x1xf32>
    %100 = tpu.reciprocal %99 {approx = true} : vector<16x1xf32> -> vector<16x1xf32>
    %101 = vector.broadcast %100 : vector<16x1xf32> to vector<16x16xf32>
    %102 = arith.mulf %97, %101 : vector<16x16xf32>
    %103 = arith.truncf %102 : vector<16x16xf32> to vector<16x16xbf16>
    %cst_36 = arith.constant dense<0.000000e+00> : vector<16x128xf32>
    %104 = tpu.matmul %103, %88, %cst_36 {dimension_numbers = #tpu.dot_dimension_numbers<[1], [0], [0], [1], [0, 0, 1, 1], [], []>} : vector<16x16xbf16>, vector<16x128xbf16>, vector<16x128xf32> -> vector<16x128xf32>
    %105 = arith.truncf %104 : vector<16x128xf32> to vector<16x128xbf16>
    %106 = vector.extract_strided_slice %15 {offsets = [384, 0], sizes = [128, 128], strides = [1, 1]} : vector<512x128xbf16> to vector<128x128xbf16>
    %cst_37 = arith.constant dense<0.000000e+00> : vector<16x128xf32>
    %107 = tpu.matmul %105, %106, %cst_37 {dimension_numbers = #tpu.dot_dimension_numbers<[1], [0], [0], [1], [0, 0, 1, 1], [], []>} : vector<16x128xbf16>, vector<128x128xbf16>, vector<16x128xf32> -> vector<16x128xf32>
    %108 = arith.addf %85, %107 : vector<16x128xf32>
    %c0_38 = arith.constant 0 : index
    %c0_39 = arith.constant 0 : index
    %c0_40 = arith.constant 0 : index
    %109 = vector.load %arg8[%c0_38, %c0_39, %c0_40] : memref<1x1x128xf32, #tpu.memory_space<vmem>>, vector<1x1x128xf32>
    %110 = vector.shape_cast %109 : vector<1x1x128xf32> to vector<1x128xf32>
    %111 = vector.broadcast %110 : vector<1x128xf32> to vector<16x128xf32>
    %112 = arith.addf %108, %111 : vector<16x128xf32>
    %113 = arith.addf %112, %3 : vector<16x128xf32>
    %c0_41 = arith.constant 0 : index
    %c0_42 = arith.constant 0 : index
    %c0_43 = arith.constant 0 : index
    %114 = vector.load %arg9[%c0_41, %c0_42, %c0_43] : memref<1x1x128xf32, #tpu.memory_space<vmem>>, vector<1x1x128xf32>
    %115 = vector.shape_cast %114 : vector<1x1x128xf32> to vector<1x128xf32>
    %c0_44 = arith.constant 0 : index
    %c0_45 = arith.constant 0 : index
    %c0_46 = arith.constant 0 : index
    %116 = vector.load %arg10[%c0_44, %c0_45, %c0_46] : memref<1x1x128xf32, #tpu.memory_space<vmem>>, vector<1x1x128xf32>
    %117 = vector.shape_cast %116 : vector<1x1x128xf32> to vector<1x128xf32>
    %cst_47 = arith.constant dense<0.000000e+00> : vector<16xf32>
    %118 = vector.multi_reduction <add>, %113, %cst_47 [1] : vector<16x128xf32> to vector<16xf32>
    %119 = vector.shape_cast %118 : vector<16xf32> to vector<16x1xf32>
    %cst_48 = arith.constant 1.280000e+02 : f32
    %120 = vector.broadcast %cst_48 : f32 to vector<16x1xf32>
    %121 = arith.divf %119, %120 : vector<16x1xf32>
    %122 = vector.broadcast %121 : vector<16x1xf32> to vector<16x128xf32>
    %123 = arith.subf %113, %122 : vector<16x128xf32>
    %124 = arith.mulf %123, %123 : vector<16x128xf32>
    %cst_49 = arith.constant dense<0.000000e+00> : vector<16xf32>
    %125 = vector.multi_reduction <add>, %124, %cst_49 [1] : vector<16x128xf32> to vector<16xf32>
    %126 = vector.shape_cast %125 : vector<16xf32> to vector<16x1xf32>
    %cst_50 = arith.constant 1.280000e+02 : f32
    %127 = vector.broadcast %cst_50 : f32 to vector<16x1xf32>
    %128 = arith.divf %126, %127 : vector<16x1xf32>
    %129 = vector.broadcast %121 : vector<16x1xf32> to vector<16x128xf32>
    %130 = arith.subf %113, %129 : vector<16x128xf32>
    %cst_51 = arith.constant 9.99999996E-13 : f32
    %131 = vector.broadcast %cst_51 : f32 to vector<16x1xf32>
    %132 = arith.addf %128, %131 : vector<16x1xf32>
    %133 = math.rsqrt %132 : vector<16x1xf32>
    %134 = vector.broadcast %133 : vector<16x1xf32> to vector<16x128xf32>
    %135 = arith.mulf %130, %134 : vector<16x128xf32>
    %136 = vector.broadcast %115 : vector<1x128xf32> to vector<16x128xf32>
    %137 = arith.mulf %135, %136 : vector<16x128xf32>
    %138 = vector.broadcast %117 : vector<1x128xf32> to vector<16x128xf32>
    %139 = arith.addf %137, %138 : vector<16x128xf32>
    %140 = arith.truncf %139 : vector<16x128xf32> to vector<16x128xbf16>
    %c0_52 = arith.constant 0 : index
    %c0_53 = arith.constant 0 : index
    %c0_54 = arith.constant 0 : index
    %141 = vector.load %arg11[%c0_52, %c0_53, %c0_54] : memref<1x128x512xbf16, #tpu.memory_space<vmem>>, vector<1x128x512xbf16>
    %142 = vector.shape_cast %141 : vector<1x128x512xbf16> to vector<128x512xbf16>
    %cst_55 = arith.constant dense<0.000000e+00> : vector<16x512xf32>
    %143 = tpu.matmul %140, %142, %cst_55 {dimension_numbers = #tpu.dot_dimension_numbers<[1], [0], [0], [1], [0, 0, 1, 1], [], []>} : vector<16x128xbf16>, vector<128x512xbf16>, vector<16x512xf32> -> vector<16x512xf32>
    %c0_56 = arith.constant 0 : index
    %c0_57 = arith.constant 0 : index
    %c0_58 = arith.constant 0 : index
    %144 = vector.load %arg12[%c0_56, %c0_57, %c0_58] : memref<1x1x512xf32, #tpu.memory_space<vmem>>, vector<1x1x512xf32>
    %145 = vector.shape_cast %144 : vector<1x1x512xf32> to vector<1x512xf32>
    %146 = vector.broadcast %145 : vector<1x512xf32> to vector<16x512xf32>
    %147 = arith.addf %143, %146 : vector<16x512xf32>
    %148 = arith.mulf %147, %147 : vector<16x512xf32>
    %149 = arith.mulf %147, %148 : vector<16x512xf32>
    %cst_59 = arith.constant 4.471500e-02 : f32
    %150 = vector.broadcast %cst_59 : f32 to vector<16x512xf32>
    %151 = arith.mulf %150, %149 : vector<16x512xf32>
    %152 = arith.addf %147, %151 : vector<16x512xf32>
    %cst_60 = arith.constant 0.797884583 : f32
    %153 = vector.broadcast %cst_60 : f32 to vector<16x512xf32>
    %154 = arith.mulf %153, %152 : vector<16x512xf32>
    %155 = math.tanh %154 : vector<16x512xf32>
    %cst_61 = arith.constant 1.000000e+00 : f32
    %156 = vector.broadcast %cst_61 : f32 to vector<16x512xf32>
    %157 = arith.addf %156, %155 : vector<16x512xf32>
    %cst_62 = arith.constant 5.000000e-01 : f32
    %158 = vector.broadcast %cst_62 : f32 to vector<16x512xf32>
    %159 = arith.mulf %158, %157 : vector<16x512xf32>
    %160 = arith.mulf %147, %159 : vector<16x512xf32>
    %161 = arith.truncf %160 : vector<16x512xf32> to vector<16x512xbf16>
    %c0_63 = arith.constant 0 : index
    %c0_64 = arith.constant 0 : index
    %c0_65 = arith.constant 0 : index
    %162 = vector.load %arg13[%c0_63, %c0_64, %c0_65] : memref<1x512x128xbf16, #tpu.memory_space<vmem>>, vector<1x512x128xbf16>
    %163 = vector.shape_cast %162 : vector<1x512x128xbf16> to vector<512x128xbf16>
    %cst_66 = arith.constant dense<0.000000e+00> : vector<16x128xf32>
    %164 = tpu.matmul %161, %163, %cst_66 {dimension_numbers = #tpu.dot_dimension_numbers<[1], [0], [0], [1], [0, 0, 1, 1], [], []>} : vector<16x512xbf16>, vector<512x128xbf16>, vector<16x128xf32> -> vector<16x128xf32>
    %c0_67 = arith.constant 0 : index
    %c0_68 = arith.constant 0 : index
    %c0_69 = arith.constant 0 : index
    %165 = vector.load %arg14[%c0_67, %c0_68, %c0_69] : memref<1x1x128xf32, #tpu.memory_space<vmem>>, vector<1x1x128xf32>
    %166 = vector.shape_cast %165 : vector<1x1x128xf32> to vector<1x128xf32>
    %167 = vector.broadcast %166 : vector<1x128xf32> to vector<16x128xf32>
    %168 = arith.addf %164, %167 : vector<16x128xf32>
    %169 = arith.addf %168, %139 : vector<16x128xf32>
    %c0_70 = arith.constant 0 : index
    %c0_71 = arith.constant 0 : index
    %c0_72 = arith.constant 0 : index
    %170 = vector.load %arg15[%c0_70, %c0_71, %c0_72] : memref<1x1x128xf32, #tpu.memory_space<vmem>>, vector<1x1x128xf32>
    %171 = vector.shape_cast %170 : vector<1x1x128xf32> to vector<1x128xf32>
    %c0_73 = arith.constant 0 : index
    %c0_74 = arith.constant 0 : index
    %c0_75 = arith.constant 0 : index
    %172 = vector.load %arg16[%c0_73, %c0_74, %c0_75] : memref<1x1x128xf32, #tpu.memory_space<vmem>>, vector<1x1x128xf32>
    %173 = vector.shape_cast %172 : vector<1x1x128xf32> to vector<1x128xf32>
    %cst_76 = arith.constant dense<0.000000e+00> : vector<16xf32>
    %174 = vector.multi_reduction <add>, %169, %cst_76 [1] : vector<16x128xf32> to vector<16xf32>
    %175 = vector.shape_cast %174 : vector<16xf32> to vector<16x1xf32>
    %cst_77 = arith.constant 1.280000e+02 : f32
    %176 = vector.broadcast %cst_77 : f32 to vector<16x1xf32>
    %177 = arith.divf %175, %176 : vector<16x1xf32>
    %178 = vector.broadcast %177 : vector<16x1xf32> to vector<16x128xf32>
    %179 = arith.subf %169, %178 : vector<16x128xf32>
    %180 = arith.mulf %179, %179 : vector<16x128xf32>
    %cst_78 = arith.constant dense<0.000000e+00> : vector<16xf32>
    %181 = vector.multi_reduction <add>, %180, %cst_78 [1] : vector<16x128xf32> to vector<16xf32>
    %182 = vector.shape_cast %181 : vector<16xf32> to vector<16x1xf32>
    %cst_79 = arith.constant 1.280000e+02 : f32
    %183 = vector.broadcast %cst_79 : f32 to vector<16x1xf32>
    %184 = arith.divf %182, %183 : vector<16x1xf32>
    %185 = vector.broadcast %177 : vector<16x1xf32> to vector<16x128xf32>
    %186 = arith.subf %169, %185 : vector<16x128xf32>
    %cst_80 = arith.constant 9.99999996E-13 : f32
    %187 = vector.broadcast %cst_80 : f32 to vector<16x1xf32>
    %188 = arith.addf %184, %187 : vector<16x1xf32>
    %189 = math.rsqrt %188 : vector<16x1xf32>
    %190 = vector.broadcast %189 : vector<16x1xf32> to vector<16x128xf32>
    %191 = arith.mulf %186, %190 : vector<16x128xf32>
    %192 = vector.broadcast %171 : vector<1x128xf32> to vector<16x128xf32>
    %193 = arith.mulf %191, %192 : vector<16x128xf32>
    %194 = vector.broadcast %173 : vector<1x128xf32> to vector<16x128xf32>
    %195 = arith.addf %193, %194 : vector<16x128xf32>
    %c0_81 = arith.constant 0 : index
    %c0_82 = arith.constant 0 : index
    %196 = vector.load %arg22[%c0_81, %c0_82] : memref<16x128xf32, #tpu.memory_space<vmem>>, vector<16x128xf32>
    tpu.vector_store %arg22[%c0_81, %c0_82], %195 {strides = array<i32>} : memref<16x128xf32, #tpu.memory_space<vmem>>, vector<16x128xf32>,
    %c1_i32 = arith.constant 1 : i32
    %197 = arith.cmpi eq, %arg0, %c1_i32 : i32
    %198 = arith.extui %197 : i1 to i32
    %c0_i32_83 = arith.constant 0 : i32
    %199 = arith.cmpi ne, %198, %c0_i32_83 : i32
    scf.if %199 {
      %200 = vector.extract_strided_slice %195 {offsets = [0, 0], sizes = [1, 128], strides = [1, 1]} : vector<16x128xf32> to vector<1x128xf32>
      %201 = vector.extract_strided_slice %195 {offsets = [8, 0], sizes = [1, 128], strides = [1, 1]} : vector<16x128xf32> to vector<1x128xf32>
      %202 = tpu.concatenate %200, %201 in 0 : vector<1x128xf32>, vector<1x128xf32> -> vector<2x128xf32>
      %203 = arith.truncf %202 : vector<2x128xf32> to vector<2x128xbf16>
      %c0_84 = arith.constant 0 : index
      %c0_85 = arith.constant 0 : index
      %204 = vector.load %arg17[%c0_84, %c0_85] : memref<128x128xbf16, #tpu.memory_space<vmem>>, vector<128x128xbf16>
      %cst_86 = arith.constant dense<0.000000e+00> : vector<2x128xf32>
      %205 = tpu.matmul %203, %204, %cst_86 {dimension_numbers = #tpu.dot_dimension_numbers<[1], [0], [0], [1], [0, 0, 1, 1], [], []>} : vector<2x128xbf16>, vector<128x128xbf16>, vector<2x128xf32> -> vector<2x128xf32>
      %c0_87 = arith.constant 0 : index
      %c0_88 = arith.constant 0 : index
      %206 = vector.load %arg18[%c0_87, %c0_88] : memref<1x128xf32, #tpu.memory_space<vmem>>, vector<1x128xf32>
      %207 = vector.broadcast %206 : vector<1x128xf32> to vector<2x128xf32>
      %208 = arith.addf %205, %207 : vector<2x128xf32>
      %209 = math.tanh %208 : vector<2x128xf32>
      %c0_89 = arith.constant 0 : index
      %c0_90 = arith.constant 0 : index
      %210 = vector.load %arg19[%c0_89, %c0_90] : memref<1x128xf32, #tpu.memory_space<vmem>>, vector<1x128xf32>
      %211 = vector.broadcast %210 : vector<1x128xf32> to vector<2x128xf32>
      %212 = arith.mulf %209, %211 : vector<2x128xf32>
      %cst_91 = arith.constant dense<0.000000e+00> : vector<2xf32>
      %213 = vector.multi_reduction <add>, %212, %cst_91 [1] : vector<2x128xf32> to vector<2xf32>
      %214 = vector.shape_cast %213 : vector<2xf32> to vector<2x1xf32>
      %c0_92 = arith.constant 0 : index
      %c0_93 = arith.constant 0 : index
      %215 = vector.load %arg20[%c0_92, %c0_93] : memref<1x1xf32, #tpu.memory_space<vmem>>, vector<1x1xf32>
      %216 = vector.broadcast %215 : vector<1x1xf32> to vector<2x1xf32>
      %217 = arith.addf %214, %216 : vector<2x1xf32>
      %218 = arith.negf %217 : vector<2x1xf32>
      %219 = math.exp %218 : vector<2x1xf32>
      %cst_94 = arith.constant 1.000000e+00 : f32
      %220 = vector.broadcast %cst_94 : f32 to vector<2x1xf32>
      %221 = arith.addf %220, %219 : vector<2x1xf32>
      %222 = arith.divf %220, %221 : vector<2x1xf32>
      %c0_95 = arith.constant 0 : index
      %c0_96 = arith.constant 0 : index
      %223 = vector.load %arg21[%c0_95, %c0_96] : memref<2x1xf32, #tpu.memory_space<vmem>>, vector<2x1xf32>
      tpu.vector_store %arg21[%c0_95, %c0_96], %222 {strides = array<i32>} : memref<2x1xf32, #tpu.memory_space<vmem>>, vector<2x1xf32>,
    } else {
    }
    return
  }
  func.func @transform_0(%arg0: i32) -> (i32, i32) {
    %c0_i32 = arith.constant 0 : i32
    %c0_i32_0 = arith.constant 0 : i32
    %c0_i32_1 = arith.constant 0 : i32
    return %c0_i32, %c0_i32_0 : i32, i32
  }
  func.func @transform_1(%arg0: i32) -> (i32, i32) {
    %c0_i32 = arith.constant 0 : i32
    %c0_i32_0 = arith.constant 0 : i32
    %c0_i32_1 = arith.constant 0 : i32
    return %c0_i32, %c0_i32_0 : i32, i32
  }
  func.func @transform_2(%arg0: i32) -> (i32, i32) {
    %c0_i32 = arith.constant 0 : i32
    %c0_i32_0 = arith.constant 0 : i32
    %c0_i32_1 = arith.constant 0 : i32
    return %c0_i32, %c0_i32_0 : i32, i32
  }
  func.func @transform_3(%arg0: i32) -> (i32, i32) {
    %c0_i32 = arith.constant 0 : i32
    %c0_i32_0 = arith.constant 0 : i32
    %c0_i32_1 = arith.constant 0 : i32
    return %c0_i32, %c0_i32_0 : i32, i32
  }
  func.func @transform_4(%arg0: i32) -> (i32, i32, i32) {
    %c0_i32 = arith.constant 0 : i32
    %c0_i32_0 = arith.constant 0 : i32
    %c0_i32_1 = arith.constant 0 : i32
    return %arg0, %c0_i32, %c0_i32_0 : i32, i32, i32
  }
  func.func @transform_5(%arg0: i32) -> (i32, i32, i32) {
    %c0_i32 = arith.constant 0 : i32
    %c0_i32_0 = arith.constant 0 : i32
    %c0_i32_1 = arith.constant 0 : i32
    return %arg0, %c0_i32, %c0_i32_0 : i32, i32, i32
  }
  func.func @transform_6(%arg0: i32) -> (i32, i32, i32) {
    %c0_i32 = arith.constant 0 : i32
    %c0_i32_0 = arith.constant 0 : i32
    %c0_i32_1 = arith.constant 0 : i32
    return %arg0, %c0_i32, %c0_i32_0 : i32, i32, i32
  }
  func.func @transform_7(%arg0: i32) -> (i32, i32, i32) {
    %c0_i32 = arith.constant 0 : i32
    %c0_i32_0 = arith.constant 0 : i32
    %c0_i32_1 = arith.constant 0 : i32
    return %arg0, %c0_i32, %c0_i32_0 : i32, i32, i32
  }
  func.func @transform_8(%arg0: i32) -> (i32, i32, i32) {
    %c0_i32 = arith.constant 0 : i32
    %c0_i32_0 = arith.constant 0 : i32
    %c0_i32_1 = arith.constant 0 : i32
    return %arg0, %c0_i32, %c0_i32_0 : i32, i32, i32
  }
  func.func @transform_9(%arg0: i32) -> (i32, i32, i32) {
    %c0_i32 = arith.constant 0 : i32
    %c0_i32_0 = arith.constant 0 : i32
    %c0_i32_1 = arith.constant 0 : i32
    return %arg0, %c0_i32, %c0_i32_0 : i32, i32, i32
  }
  func.func @transform_10(%arg0: i32) -> (i32, i32, i32) {
    %c0_i32 = arith.constant 0 : i32
    %c0_i32_0 = arith.constant 0 : i32
    %c0_i32_1 = arith.constant 0 : i32
    return %arg0, %c0_i32, %c0_i32_0 : i32, i32, i32
  }
  func.func @transform_11(%arg0: i32) -> (i32, i32, i32) {
    %c0_i32 = arith.constant 0 : i32
    %c0_i32_0 = arith.constant 0 : i32
    %c0_i32_1 = arith.constant 0 : i32
    return %arg0, %c0_i32, %c0_i32_0 : i32, i32, i32
  }
  func.func @transform_12(%arg0: i32) -> (i32, i32, i32) {
    %c0_i32 = arith.constant 0 : i32
    %c0_i32_0 = arith.constant 0 : i32
    %c0_i32_1 = arith.constant 0 : i32
    return %arg0, %c0_i32, %c0_i32_0 : i32, i32, i32
  }
  func.func @transform_13(%arg0: i32) -> (i32, i32, i32) {
    %c0_i32 = arith.constant 0 : i32
    %c0_i32_0 = arith.constant 0 : i32
    %c0_i32_1 = arith.constant 0 : i32
    return %arg0, %c0_i32, %c0_i32_0 : i32, i32, i32
  }
  func.func @transform_14(%arg0: i32) -> (i32, i32, i32) {
    %c0_i32 = arith.constant 0 : i32
    %c0_i32_0 = arith.constant 0 : i32
    %c0_i32_1 = arith.constant 0 : i32
    return %arg0, %c0_i32, %c0_i32_0 : i32, i32, i32
  }
  func.func @transform_15(%arg0: i32) -> (i32, i32, i32) {
    %c0_i32 = arith.constant 0 : i32
    %c0_i32_0 = arith.constant 0 : i32
    %c0_i32_1 = arith.constant 0 : i32
    return %arg0, %c0_i32, %c0_i32_0 : i32, i32, i32
  }
  func.func @transform_16(%arg0: i32) -> (i32, i32) {
    %c0_i32 = arith.constant 0 : i32
    %c0_i32_0 = arith.constant 0 : i32
    %c0_i32_1 = arith.constant 0 : i32
    return %c0_i32, %c0_i32_0 : i32, i32
  }
  func.func @transform_17(%arg0: i32) -> (i32, i32) {
    %c0_i32 = arith.constant 0 : i32
    %c0_i32_0 = arith.constant 0 : i32
    %c0_i32_1 = arith.constant 0 : i32
    return %c0_i32, %c0_i32_0 : i32, i32
  }
  func.func @transform_18(%arg0: i32) -> (i32, i32) {
    %c0_i32 = arith.constant 0 : i32
    %c0_i32_0 = arith.constant 0 : i32
    %c0_i32_1 = arith.constant 0 : i32
    return %c0_i32, %c0_i32_0 : i32, i32
  }
  func.func @transform_19(%arg0: i32) -> (i32, i32) {
    %c0_i32 = arith.constant 0 : i32
    %c0_i32_0 = arith.constant 0 : i32
    %c0_i32_1 = arith.constant 0 : i32
    return %c0_i32, %c0_i32_0 : i32, i32
  }
  func.func @transform_20(%arg0: i32) -> (i32, i32) {
    %c0_i32 = arith.constant 0 : i32
    %c0_i32_0 = arith.constant 0 : i32
    %c0_i32_1 = arith.constant 0 : i32
    return %c0_i32, %c0_i32_0 : i32, i32
  }
}

</mosaic_0001>

<bundles_post_ra>
// kernel: bert_binary_classifier_forward.1
= control target key start
LH: loop header
LB: loop body
LE: loop exit
PB: predicated region body
PF: predicated region fallthrough
CT: control target
= control target key end

     0   :  { %s5655_s0 = inlined_call_operand.vmem [shape: f32[16,128], index: 0, kind: input, shape index: {}]   ;;  %s5656_s1 = inlined_call_operand.vmem [shape: f32[16,16], index: 1, kind: input, shape index: {}]   ;;  %s5657_s2 = inlined_call_operand.vmem [shape: f32[1,128], index: 2, kind: input, shape index: {}]   ;;  %s5658_s3 = inlined_call_operand.vmem [shape: f32[1,128], index: 3, kind: input, shape index: {}]   ;;  %s5659_s4 = inlined_call_operand.hbm [shape: bf16[2,128,1536], index: 4, kind: input, shape index: {}]   ;;  %s5660_s5 = inlined_call_operand.vmem [shape: f32[2,1,1536], index: 5, kind: input, shape index: {}]   ;;  %s5661_s6 = inlined_call_operand.hbm [shape: bf16[2,512,128], index: 6, kind: input, shape index: {}]   ;;  %s5662_s7 = inlined_call_operand.vmem [shape: f32[2,1,128], index: 7, kind: input, shape index: {}]   ;;  %s5663_s8 = inlined_call_operand.vmem [shape: f32[2,1,128], index: 8, kind: input, shape index: {}]   ;;  %s5664_s9 = inlined_call_operand.vmem [shape: f32[2,1,128], index: 9, kind: input, shape index: {}]   ;;  %s5665_s10 = inlined_call_operand.hbm [shape: bf16[2,128,512], index: 10, kind: input, shape index: {}]   ;;  %s5666_s11 = inlined_call_operand.vmem [shape: f32[2,1,512], index: 11, kind: input, shape index: {}]   ;;  %s5667_s12 = inlined_call_operand.hbm [shape: bf16[2,512,128], index: 12, kind: input, shape index: {}]   ;;  %s5668_s13 = inlined_call_operand.vmem [shape: f32[2,1,128], index: 13, kind: input, shape index: {}]   ;;  %s5669_s14 = inlined_call_operand.vmem [shape: f32[2,1,128], index: 14, kind: input, shape index: {}]   ;;  %s5670_s15 = inlined_call_operand.vmem [shape: f32[2,1,128], index: 15, kind: input, shape index: {}]   ;;  %s5671_s16 = inlined_call_operand.vmem [shape: bf16[128,128], index: 16, kind: input, shape index: {}]   ;;  %s5672_s17 = inlined_call_operand.vmem [shape: f32[1,128], index: 17, kind: input, shape index: {}]   ;;  %s5673_s18 = inlined_call_operand.vmem [shape: f32[1,128], index: 18, kind: input, shape index: {}]   ;;  %s5674_s19 = inlined_call_operand.<no memory space> [shape: f32[1,1], index: 19, kind: input, shape index: {}]   ;;  %s5675_s20 = inlined_call_operand.vmem [shape: f32[2,1], index: 20, kind: output, shape index: {}]  }
   0x1   :  { %5686 = sst [smem:[#allocation17_spill]] %s5655_s0  ;;  %v25_v0 = vstv %s5674_s19 }
   0x2   :  { %5687 = sst [smem:[#allocation18_spill]] %s5656_s1  ;;  %26 = vst [vmem:[#allocation3] sm:$0x1] %v25_v0 }
   0x3   :  { %5688 = sst [smem:[#allocation19_spill]] %s5657_s2 }
   0x4   :  { %5689 = sst [smem:[#allocation20_spill]] %s5658_s3 }
   0x5   :  { %5690 = sst [smem:[#allocation21_spill]] %s5659_s4 }
   0x6   :  { %5691 = sst [smem:[#allocation22_spill]] %s5661_s6 }
   0x7   :  { %5692 = sst [smem:[#allocation23_spill]] %s5665_s10 }
   0x8   :  { %5693 = sst [smem:[#allocation24_spill]] %s5666_s11 }
   0x9   :  { %5694 = sst [smem:[#allocation25_spill]] %s5667_s12 }
   0xa   :  { %5695 = sst [smem:[#allocation26_spill]] %s5668_s13 }
   0xb   :  { %5696 = sst [smem:[#allocation27_spill]] %s5669_s14 }
   0xc   :  { %5697 = sst [smem:[#allocation28_spill]] %s5670_s15 }
   0xd   :  { %5698 = sst [smem:[#allocation29_spill]] %s5671_s16 }
   0xe   :  { %5699 = sst [smem:[#allocation30_spill]] %s5672_s17 }
   0xf   :  { %5700 = sst [smem:[#allocation31_spill]] %s5673_s18 }
  0x10   :  { %5701 = sst [smem:[#allocation32_spill]] %s5675_s20 }
  0x11   :  { %27 = vsyncpa [#allocation5], 0 }
  0x12   :  { %29 = vsyncpa [#allocation5 + $0x1], 0 }
  0x13   :  { %30 = vsyncpa [#allocation7], 0 }
  0x14   :  { %32 = vsyncpa [#allocation7 + $0x1], 0 }
  0x15   :  { %33 = vsyncpa [#allocation10], 0 }
  0x16   :  { %35 = vsyncpa [#allocation10 + $0x1], 0  ;;  %s4893_s23 = smov 0   ;;  %s4895_s24 = smov 0  }
  0x17   :  { %s4897_s2 = smov 0   ;;  %s4899_s25 = smov 0  }
  0x18 LB: > { %5702 = sst [smem:[#allocation14_spill]] %s4771_s2  ;;  %s4912_s19 = sadd.s32 4294967295, %s4775_s25   ;;  %s4775_s25 = sphi %s4899_s25, %s5732_s25   ;;  %s4771_s2 = sphi %s4897_s2, %s5734_s2   ;;  %s4767_s24 = sphi %s4895_s24, %s5736_s24   ;;  %s4763_s23 = sphi %s4893_s23, %s5735_s23  }
  0x19   : > { %s4915_s3 = sadd.s32 1, %s4775_s25   ;;  %s132_s27 = sadd.s32 1, %s4771_s2 }
  0x1a   : > { %5703 = sst [smem:[#allocation15_spill]] %s4915_s3  ;;  %s129_s26 = ssub.s32 %s4775_s25, %s4915_s3 }
  0x1b   : > { %p130_p0 = scmp.eq.s32.totalorder %s129_s26, 0  ;;  %p139_p1 = scmp.ne.s32.totalorder %s4771_s2, %s4767_s24 }
  0x1c   : > { %p140_p2 = scmp.eq.s32.totalorder %s4775_s25, 0  ;;  %p145_p3 = scmp.ne.s32.totalorder %s4767_s24, %s4763_s23 }
  0x1d   : > { %s4925_s28 = scalar_select %p130_p0, %s4771_s2, %s132_s27  }
  0x1e   : > { %p141_p4 = por %p140_p2, %p139_p1  ;;  %p146_p5 = scmp.eq.s32.totalorder %s4912_s19, 0 }
  0x1f   : > { %5704 = sst [smem:[#allocation16_spill]] %s4925_s28  ;;  %p4489_p6 = scmp.lt.s32.totalorder %s4775_s25, 2 }
  0x20   : > { %p4929_p7 = por %p146_p5, %p145_p3  ;;  %s4934_s29 = sand.u32 1, %s4771_s2  }
  0x21   : > { %p4936_p8 = pnand %p4489_p6, %p141_p4  ;;  %s613_s0 = sand.u32 1, %s4775_s25  }
  0x22   : > { %s4942_s21 = sshll.u32 %s4934_s29, 8  ;;  %s4945_s1 = sshll.u32 %s4775_s25, 8 }
  0x23   : > { %s617_s22 = scalar_lea.vmem [#allocation6], %s4942_s21  ;;  %s5707_s6 = sld [smem:[#allocation22_spill]] }
  0x24   : > { %s625_s23 = sshll.u32 %s617_s22, 4  ;;  %s4952_s3 = scalar_lea.sflag [#allocation7], %s613_s0  ;;  %s626_s23 = int_to_ptr.vmem [resolvable:$true] %s625_s23 }
  0x25   : > { %p4617_p10 = pneg %p4936_p8 }
  0x29   : > { %s622_s28 = scalar_lea.hbm %s5707_s6, %s4945_s1  ;;  %s4620_s26 = scalar_lea.hbm %s5707_s6, 512 }
  0x2a   : > { %s623_s2 = sshll.u32 %s622_s28, 4  ;;  %s624_s2 = int_to_ptr.hbm [resolvable:$true] %s623_s2 }
  0x2b   : > { %s4613_s20 = sshra.s32 %s624_s2, 4  ;;  %s4614_s20 = int_to_ptr.hbm [resolvable:$true] %s4613_s20 }
  0x2c   : > { %s4615_s18 = scalar_lea.hbm %s4614_s20, 256  ;;  %p4621_p13 = scmp.lt.s32.totalorder %s4614_s20, %s5707_s6 }
  0x2d   : > { %p4616_p9 = scmp.ne.s32.totalorder %s4614_s20, %s4615_s18  ;;  %p4622_p0 = scmp.lt.s32.totalorder %s4620_s26, %s4615_s18 }
  0x2f   : > { %p4618_p11 = pnand %p4617_p10, %p4616_p9  ;;  %p4623_p1 = por %p4622_p0, %p4621_p13 }
  0x31   : > { %p4619_p12 = pneg %p4618_p11 }
  0x33   : > { %p4624_p2 = pnand %p4623_p1, %p4619_p12 }
  0x35   : > { %4627 = shalt.err (!%p4624_p2)
}
  0x36   : > { %s5683_s28 = smov 64   ;;  %s5684_s0 = smov 4  }
  0x37   : > { %4482 = dma.hbm_to_vmem [thread:$0]  (!%p4936_p8), %s624_s2, 4096, %s626_s23, %s4952_s3, %s5683_s28, %s5683_s28, %s5684_s0  }
  0x38   : > { %p3447_p3 = scmp.ge.s32.totalorder %s4775_s25, 1  ;;  %p720_p4 = scmp.lt.s32.totalorder %s4775_s25, 3 }
  0x39   : > { %s4464_s16 = smul.u32 768, %s4934_s29  ;;  %s5709_s26 = sld [smem:[#allocation21_spill]] }
  0x3a   : > { %p4974_p5 = pnand %p3447_p3, %p720_p4  ;;  %s4465_s18 = smul.u32 768, %s4775_s25 }
  0x3b   : > { %s588_s6 = scalar_lea.vmem [#allocation4], %s4464_s16  ;;  %s585_s13 = scalar_lea.sflag [#allocation5], %s4934_s29 }
  0x3c   : > { %s596_s15 = sshll.u32 %s588_s6, 4  ;;  %s597_s15 = int_to_ptr.vmem [resolvable:$true] %s596_s15 }
  0x3f   : > { %s593_s27 = scalar_lea.hbm %s5709_s26, %s4465_s18  ;;  %s4650_s0 = scalar_lea.hbm %s5709_s26, 1536 }
  0x40   : > { %s594_s14 = sshll.u32 %s593_s27, 4  ;;  %s595_s14 = int_to_ptr.hbm [resolvable:$true] %s594_s14 }
  0x41   : > { %s4643_s2 = sshra.s32 %s595_s14, 4  ;;  %s4644_s2 = int_to_ptr.hbm [resolvable:$true] %s4643_s2 }
  0x42   : > { %s4645_s23 = scalar_lea.hbm %s4644_s2, 768  ;;  %p4651_p12 = scmp.lt.s32.totalorder %s4644_s2, %s5709_s26 }
  0x43   : > { %p4646_p6 = scmp.ne.s32.totalorder %s4644_s2, %s4645_s23  ;;  %p4652_p13 = scmp.lt.s32.totalorder %s4650_s0, %s4645_s23 }
  0x45   : > { %p4648_p9 = pnand %p4646_p6, %p4617_p10  ;;  %p4653_p0 = por %p4652_p13, %p4651_p12 }
  0x47   : > { %p4649_p11 = pneg %p4648_p9 }
  0x49   : > { %p4654_p1 = pnand %p4653_p0, %p4649_p11 }
  0x4b   : > { %4657 = shalt.err (!%p4654_p1)
}
  0x4c   : > { %s4779_s6 = smov 768   ;;  %s4780_s16 = smov 48  }
  0x4d   : > { %4479 = dma.hbm_to_vmem [thread:$0]  (!%p4936_p8), %s595_s14, 12288, %s597_s15, %s585_s13, %s4779_s6, %s4779_s6, %s4780_s16  }
  0x4e   : > { %s5710_s10 = sld [smem:[#allocation23_spill]]  ;;  %s657_s11 = scalar_lea.vmem [#allocation8], %s4942_s21 }
  0x4f   : > { %s665_s20 = sshll.u32 %s657_s11, 4  ;;  %s666_s20 = int_to_ptr.vmem [resolvable:$true] %s665_s20 }
  0x54   : > { %s662_s28 = scalar_lea.hbm %s5710_s10, %s4945_s1  ;;  %s4680_s13 = scalar_lea.hbm %s5710_s10, 512 }
  0x55   : > { %s663_s25 = sshll.u32 %s662_s28, 4  ;;  %s664_s25 = int_to_ptr.hbm [resolvable:$true] %s663_s25 }
  0x56   : > { %s4673_s0 = sshra.s32 %s664_s25, 4  ;;  %s4674_s0 = int_to_ptr.hbm [resolvable:$true] %s4673_s0 }
  0x57   : > { %s4675_s2 = scalar_lea.hbm %s4674_s0, 256  ;;  %p4681_p6 = scmp.lt.s32.totalorder %s4674_s0, %s5710_s10 }
  0x58   : > { %p4676_p2 = scmp.ne.s32.totalorder %s4674_s0, %s4675_s2  ;;  %p4682_p9 = scmp.lt.s32.totalorder %s4680_s13, %s4675_s2 }
  0x5a   : > { %p4678_p3 = pnand %p4676_p2, %p4617_p10  ;;  %p4683_p11 = por %p4682_p9, %p4681_p6 }
  0x5c   : > { %p4679_p4 = pneg %p4678_p3 }
  0x5e   : > { %p4684_p12 = pnand %p4683_p11, %p4679_p4 }
  0x60   : > { %4687 = shalt.err (!%p4684_p12)
}
  0x61   : > { %s4781_s11 = smov 256   ;;  %s4782_s6 = smov 16  }
  0x62   : > { %4485 = dma.hbm_to_vmem [thread:$0]  (!%p4936_p8), %s664_s25, 4096, %s666_s20, %s4952_s3, %s4781_s11, %s4781_s11, %s4782_s6  }
  0x63   : > { %s5711_s12 = sld [smem:[#allocation25_spill]]  ;;  %s686_s28 = scalar_lea.vmem [#allocation9], %s4942_s21 }
  0x64   : > { %s694_s0 = sshll.u32 %s686_s28, 4  ;;  %s683_s23 = scalar_lea.sflag [#allocation10], %s4934_s29  ;;  %s695_s0 = int_to_ptr.vmem [resolvable:$true] %s694_s0 }
  0x69   : > { %s691_s27 = scalar_lea.hbm %s5711_s12, %s4945_s1  ;;  %s4710_s25 = scalar_lea.hbm %s5711_s12, 512 }
  0x6a   : > { %s692_s2 = sshll.u32 %s691_s27, 4  ;;  %s693_s2 = int_to_ptr.hbm [resolvable:$true] %s692_s2 }
  0x6b   : > { %s4703_s18 = sshra.s32 %s693_s2, 4  ;;  %s4704_s18 = int_to_ptr.hbm [resolvable:$true] %s4703_s18 }
  0x6c   : > { %s4705_s13 = scalar_lea.hbm %s4704_s18, 256  ;;  %p4711_p2 = scmp.lt.s32.totalorder %s4704_s18, %s5711_s12 }
  0x6d   : > { %p4706_p13 = scmp.ne.s32.totalorder %s4704_s18, %s4705_s13  ;;  %p4712_p3 = scmp.lt.s32.totalorder %s4710_s25, %s4705_s13 }
  0x6f   : > { %p4708_p0 = pnand %p4706_p13, %p4617_p10  ;;  %p4713_p4 = por %p4712_p3, %p4711_p2 }
  0x71   : > { %p4709_p1 = pneg %p4708_p0 }
  0x73   : > { %p4714_p6 = pnand %p4713_p4, %p4709_p1 }
  0x75   : > { %4717 = shalt.err (!%p4714_p6)
}
  0x76   : > { %s5712_s29 = smov 4   ;;  %s5713_s21 = smov 64  }
  0x77   : > { %4488 = dma.hbm_to_vmem [thread:$0]  (!%p4936_p8), %s693_s2, 4096, %s695_s0, %s683_s23, %s5713_s21, %s5713_s21, %s5712_s29  }
  0x78   : > { %724 = sbr.rel (%p4974_p5) target bundleno = 2915 (0xb63), region = 100  ;;  %s726_s15 = sand.u32 (!%p4974_p5), 1, %s4767_s24  }
  0x79   : > { %s4466_s11 = smul.u32 (!%p4974_p5), 768, %s726_s15  ;;  %s727_s6 = scalar_lea.sflag (!%p4974_p5), [#allocation5], %s726_s15 }
  0x7b   : > { %s5034_s16 = scalar_lea.vmem (!%p4974_p5), [#allocation4], %s4466_s11 }
  0x7d   : > { %4750 = dma.done.wait (%p4929_p7), %s727_s6, 12288  }
  0x7e   : > { %4752 = vsyncadd (%p4929_p7), %s727_s6, 4294955008  ;;  %s736_s30 = sand.u32 1, %s4912_s19   ;;  %s3448_s22 = sshll.u32 %s726_s15, 8 }
  0x7f   : > { %s737_s27 = scalar_lea.sflag [#allocation7], %s736_s30  ;;  %s5041_s28 = scalar_lea.vmem [#allocation6], %s3448_s22 }
  0x80   : > { %4754 = dma.done.wait (%p4929_p7), %s737_s27, 8192  }
  0x81   : > { %4756 = vsyncadd (%p4929_p7), %s737_s27, 4294959104  ;;  %s5047_s17 = scalar_lea.vmem [#allocation8], %s3448_s22  ;;  %s757_s0 = scalar_lea.sflag [#allocation10], %s726_s15 }
  0x82   : > { %s5049_s2 = scalar_lea.vmem [#allocation9], %s3448_s22 }
  0x83   : > { %4758 = dma.done.wait (%p4929_p7), %s757_s0, 4096  }
  0x84   : > { %4760 = vsyncadd (%p4929_p7), %s757_s0, 4294963200  ;;  %p854_p8 = scmp.lt.s32.totalorder %s4912_s19, 1  ;;  %s5714_s0 = sld [smem:[#allocation24_spill]] }
  0x85   : > { %s5715_s3 = sld [smem:[#allocation26_spill]]  ;;  %p3452_p7 = scmp.ne.s32.totalorder %s4912_s19, 0 }
  0x86   : > { %s5057_s23 = scalar_select %p854_p8, %s4912_s19, 1 }
  0x87   : > { %s5716_s12 = sld [smem:[#allocation27_spill]] }
  0x88   : > { %s4467_s18 = smul.u32 12, %s5057_s23  ;;  %s3451_s30 = sshll.u32 %s5057_s23, 2 }
  0x89   : > { %s5717_s26 = sld [smem:[#allocation28_spill]] }
  0x8a   : > { %s5075_s6 = scalar_lea.vmem %s5660_s5, %s4467_s18  ;;  %s5081_s10 = scalar_lea.vmem %s5714_s0, %s3451_s30 }
  0x8b   : > { %s873_s4 = scalar_lea.vmem %s5715_s3, %s5057_s23  ;;  %884 = sbr.rel (%p3452_p7) target bundleno = 422 (0x1a6), region = 120 }
  0x8c   : > { %s5718_s22 = sld [smem:[#allocation17_spill]] (!%p3452_p7) }
  0x8d   : > { %s876_s1 = scalar_lea.vmem %s5716_s12, %s5057_s23  ;;  %s5719_s3 = sld [smem:[#allocation19_spill]] (!%p3452_p7) }
  0x8e   : > { %s5720_s0 = sld [smem:[#allocation20_spill]] (!%p3452_p7) }
  0x8f   : > { %s879_s15 = scalar_lea.vmem %s5717_s26, %s5057_s23 }
  0x90   : > { %v4783_v3 = vmov 128.0  }
  0x91   : > { %4532 = vrcp.f32 %v4783_v3 }
  0x92   : > { %v885_v1 = vld [vmem:[%s5718_s22] sm:$0xff]  ;;  %v886_v2 = vld [vmem:[%s5718_s22 + $0x8] sm:$0xff] }
  0x93   : > { %889 = vadd.xlane.f32.xlu0 %v885_v1  ;;  %v4530_v32 = vld [vmem:[%s5719_s3] ss:$0 sm:$0xff] }
  0x94   : > { %v4531_v35 = vld [vmem:[%s5720_s0] ss:$0 sm:$0xff] }
  0x97   : > { %v4533_v4 = vpop.eup %4532 }
  0x98   : > { %v894_v5 = vmul.f32 128.0, %v4533_v4  ;;  %vm898_vm0 = vweird.f32 %v4533_v4 }
  0x9a   : > { %v895_v6 = vsub.f32 1.0, %v894_v5 }
  0x9b   : > { %891 = vadd.xlane.f32.xlu0 %v886_v2 }
  0x9c   : > { %v896_v7 = vmul.f32 %v4533_v4, %v895_v6 }
  0x9e   : > { %v897_v8 = vadd.f32 %v4533_v4, %v896_v7 }
  0xa0   : > { %v899_v9 = vsel %vm898_vm0, %v4533_v4, %v897_v8 }
 0x106   : > { %v890_v10 = vpop.xlane.xlu0 %889 }
 0x107   : > { %v900_v11 = vmul.f32 %v899_v9, %v890_v10 }
 0x109   : > { %v902_v12 = vsub.f32 %v885_v1, %v900_v11 }
 0x10b   : > { %v904_v13 = vmul.f32 %v902_v12, %v902_v12 }
 0x10d   : > { %906 = vadd.xlane.f32.xlu1 %v904_v13 }
 0x10e   : > { %v892_v14 = vpop.xlane.xlu0 %891 }
 0x10f   : > { %v901_v15 = vmul.f32 %v899_v9, %v892_v14 }
 0x111   : > { %v903_v16 = vsub.f32 %v886_v2, %v901_v15 }
 0x113   : > { %v905_v17 = vmul.f32 %v903_v16, %v903_v16 }
 0x115   : > { %908 = vadd.xlane.f32.xlu1 %v905_v17 }
 0x180   : > { %v907_v18 = vpop.xlane.xlu1 %906 }
 0x181   : > { %v910_v19 = vmul.f32 %v907_v18, %v899_v9 }
 0x183   : > { %v912_v20 = vadd.f32 1e-12, %v910_v19 }
 0x185   : > { %4534 = vrsqrt.f32 %v912_v20  ;;  %vm920_vm2 = vweird.f32 %v912_v20 }
 0x188   : > { %v909_v21 = vpop.xlane.xlu1 %908 }
 0x189   : > { %v911_v22 = vmul.f32 %v909_v21, %v899_v9 }
 0x18b   : > { %v4535_v23 = vpop.eup %4534  ;;  %v913_v24 = vadd.f32 1e-12, %v911_v22 }
 0x18c   : > { %v915_v25 = vmul.f32 %v4535_v23, %v912_v20  ;;  %vm921_vm1 = vweird.f32 %v4535_v23 }
 0x18d   : > { %4536 = vrsqrt.f32 %v913_v24  ;;  %vm922_vm3 = vmor %vm920_vm2, %vm921_vm1  ;;  %vm930_vm5 = vweird.f32 %v913_v24 }
 0x18e   : > { %v916_v26 = vmul.f32 %v4535_v23, %v915_v25 }
 0x190   : > { %v917_v27 = vmul.f32 0.5, %v916_v26 }
 0x192   : > { %v918_v28 = vsub.f32 1.5, %v917_v27 }
 0x193   : > { %v4537_v29 = vpop.eup %4536 }
 0x194   : > { %v919_v30 = vmul.f32 %v4535_v23, %v918_v28  ;;  %v925_v31 = vmul.f32 %v4537_v29, %v913_v24  ;;  %vm931_vm4 = vweird.f32 %v4537_v29 }
 0x195   : > { %vm932_vm6 = vmor %vm930_vm5, %vm931_vm4 }
 0x196   : > { %v923_v33 = vsel %vm922_vm3, %v4535_v23, %v919_v30  ;;  %v926_v34 = vmul.f32 %v4537_v29, %v925_v31 }
 0x197   : > { %v934_v36 = vmul.f32 %v923_v33, %v902_v12 }
 0x198   : > { %v927_v37 = vmul.f32 0.5, %v926_v34 }
 0x199   : > { %v939_v38 = vmul.f32 %v4530_v32, %v934_v36 }
 0x19a   : > { %v928_v39 = vsub.f32 1.5, %v927_v37 }
 0x19b   : > { %v944_v40 = vadd.f32 %v4531_v35, %v939_v38 }
 0x19c   : > { %v929_v41 = vmul.f32 %v4537_v29, %v928_v39 }
 0x19d   : > { %946 = vst [vmem:[#allocation2] sm:$0xff] %v944_v40 }
 0x19e   : > { %v933_v42 = vsel %vm932_vm6, %v4537_v29, %v929_v41 }
 0x19f   : > { %v935_v43 = vmul.f32 %v933_v42, %v903_v16 }
 0x1a1   : > { %v940_v44 = vmul.f32 %v4530_v32, %v935_v43 }
 0x1a3   : > { %v945_v45 = vadd.f32 %v4531_v35, %v940_v44 }
 0x1a5   : > { %947 = vst [vmem:[#allocation2 + $0x8] sm:$0xff] %v945_v45 }
 0x1a6 PF: > { %v3791_v46 = vld [vmem:[%s5034_s16 + $0x2a0] sm:$0xf]  ;;  %v4354_v47 = vld [vmem:[%s5034_s16 + $0x2cc] sm:$0xf0]  ;;  %v4348_v48 = vld [vmem:[%s5034_s16 + $0x2a4] sm:$0xf]  ;;  %s5722_s11 = scalar_lea.vmem %s5662_s7, %s5057_s23  ;;  %s5723_s30 = scalar_lea.vmem %s5663_s8, %s5057_s23 }
 0x1a7   : > { %v3792_v49 = vor.u32 %v4354_v47, %v3791_v46  ;;  %v3793_v50 = vld [vmem:[%s5034_s16 + $0x2d0] sm:$0xf0]  ;;  %v3799_v51 = vld [vmem:[%s5034_s16 + $0x2a8] sm:$0xf]  ;;  %v4355_v52 = vld [vmem:[%s5034_s16 + $0x2d4] sm:$0xf0]  ;;  %s5724_s26 = scalar_lea.vmem %s5664_s9, %s5057_s23 }
 0x1a8   : > { %v3796_v53 = vor.u32 %v4348_v48, %v3793_v50  ;;  %v3800_v54 = vor.u32 %v4355_v52, %v3799_v51  ;;  %v4349_v55 = vld [vmem:[%s5034_s16 + $0x2ac] sm:$0xf]  ;;  %v3801_v56 = vld [vmem:[%s5034_s16 + $0x2d8] sm:$0xf0]  ;;  %v3743_v57 = vld [vmem:[%s5034_s16 + $0x240] sm:$0xf] }
 0x1a9   : > { %1555 = vmatpush.bf16.msra.mxu0 %v3792_v49  ;;  %v3804_v58 = vor.u32 %v4349_v55, %v3801_v56  ;;  %v4342_v59 = vld [vmem:[%s5034_s16 + $0x26c] sm:$0xf0]  ;;  %v4336_v60 = vld [vmem:[%s5034_s16 + $0x244] sm:$0xf]  ;;  %v3745_v61 = vld [vmem:[%s5034_s16 + $0x270] sm:$0xf0] }
 0x1aa   : > { %1569 = vmatpush.bf16.msra.mxu1 %v3796_v53  ;;  %1583 = vmatpush.bf16.msra.mxu2 %v3800_v54  ;;  %v3744_v62 = vor.u32 %v4342_v59, %v3743_v57  ;;  %v3748_v63 = vor.u32 %v4336_v60, %v3745_v61  ;;  %v3751_v0 = vld [vmem:[%s5034_s16 + $0x248] sm:$0xf]  ;;  %v4343_v1 = vld [vmem:[%s5034_s16 + $0x274] sm:$0xf0]  ;;  %v4337_v2 = vld [vmem:[%s5034_s16 + $0x24c] sm:$0xf] }
 0x1ab   : > { %1597 = vmatpush.bf16.msra.mxu3 %v3804_v58  ;;  %v3752_v3 = vor.u32 %v4343_v1, %v3751_v0  ;;  %v3753_v4 = vld [vmem:[%s5034_s16 + $0x278] sm:$0xf0]  ;;  %v3695_v5 = vld [vmem:[%s5034_s16 + $0x1e0] sm:$0xf]  ;;  %v4330_v6 = vld [vmem:[%s5034_s16 + $0x20c] sm:$0xf0] }
 0x1ac   : > { %v3756_v7 = vor.u32 %v4337_v2, %v3753_v4  ;;  %v4324_v8 = vld [vmem:[%s5034_s16 + $0x1e4] sm:$0xf]  ;;  %v3697_v9 = vld [vmem:[%s5034_s16 + $0x210] sm:$0xf0]  ;;  %v3703_v10 = vld [vmem:[%s5034_s16 + $0x1e8] sm:$0xf]  ;;  %v3696_v11 = vor.u32 %v4330_v6, %v3695_v5 }
 0x1ad   : > { %1556 = vmatpush.bf16.msra.mxu0 %v3744_v62  ;;  %v4331_v12 = vld [vmem:[%s5034_s16 + $0x214] sm:$0xf0]  ;;  %v4325_v13 = vld [vmem:[%s5034_s16 + $0x1ec] sm:$0xf]  ;;  %v3705_v14 = vld [vmem:[%s5034_s16 + $0x218] sm:$0xf0]  ;;  %v3700_v15 = vor.u32 %v4324_v8, %v3697_v9 }
 0x1ae   : > { %1570 = vmatpush.bf16.msra.mxu1 %v3748_v63  ;;  %1584 = vmatpush.bf16.msra.mxu2 %v3752_v3  ;;  %v3704_v16 = vor.u32 %v4331_v12, %v3703_v10  ;;  %v3647_v17 = vld [vmem:[%s5034_s16 + $0x180] sm:$0xf]  ;;  %v4318_v18 = vld [vmem:[%s5034_s16 + $0x1ac] sm:$0xf0]  ;;  %v4312_v19 = vld [vmem:[%s5034_s16 + $0x184] sm:$0xf]  ;;  %v3708_v20 = vor.u32 %v4325_v13, %v3705_v14 }
 0x1af   : > { %1598 = vmatpush.bf16.msra.mxu3 %v3756_v7  ;;  %v3649_v21 = vld [vmem:[%s5034_s16 + $0x1b0] sm:$0xf0]  ;;  %v3655_v22 = vld [vmem:[%s5034_s16 + $0x188] sm:$0xf]  ;;  %v4319_v23 = vld [vmem:[%s5034_s16 + $0x1b4] sm:$0xf0]  ;;  %v3648_v26 = vor.u32 %v4318_v18, %v3647_v17 }
 0x1b0   : > { %v4313_v24 = vld [vmem:[%s5034_s16 + $0x18c] sm:$0xf]  ;;  %v3657_v25 = vld [vmem:[%s5034_s16 + $0x1b8] sm:$0xf0]  ;;  %v3652_v27 = vor.u32 %v4312_v19, %v3649_v21  ;;  %v3656_v28 = vor.u32 %v4319_v23, %v3655_v22  ;;  %v3599_v29 = vld [vmem:[%s5034_s16 + $0x120] sm:$0xf] }
 0x1b1   : > { %1557 = vmatpush.bf16.msra.mxu0 %v3696_v11  ;;  %v4306_v30 = vld [vmem:[%s5034_s16 + $0x14c] sm:$0xf0]  ;;  %v4300_v31 = vld [vmem:[%s5034_s16 + $0x124] sm:$0xf]  ;;  %v3660_v32 = vor.u32 %v4313_v24, %v3657_v25  ;;  %v3601_v33 = vld [vmem:[%s5034_s16 + $0x150] sm:$0xf0] }
 0x1b2   : > { %1571 = vmatpush.bf16.msra.mxu1 %v3700_v15  ;;  %1585 = vmatpush.bf16.msra.mxu2 %v3704_v16  ;;  %v3607_v34 = vld [vmem:[%s5034_s16 + $0x128] sm:$0xf]  ;;  %v4307_v35 = vld [vmem:[%s5034_s16 + $0x154] sm:$0xf0]  ;;  %v4301_v36 = vld [vmem:[%s5034_s16 + $0x12c] sm:$0xf]  ;;  %v3600_v38 = vor.u32 %v4306_v30, %v3599_v29  ;;  %v3604_v39 = vor.u32 %v4300_v31, %v3601_v33 }
 0x1b3   : > { %1599 = vmatpush.bf16.msra.mxu3 %v3708_v20  ;;  %v3609_v37 = vld [vmem:[%s5034_s16 + $0x158] sm:$0xf0]  ;;  %v3608_v40 = vor.u32 %v4307_v35, %v3607_v34  ;;  %v3551_v41 = vld [vmem:[%s5034_s16 + $0xc0] sm:$0xf]  ;;  %v4294_v42 = vld [vmem:[%s5034_s16 + $0xec] sm:$0xf0] }
 0x1b4   : > { %v4288_v43 = vld [vmem:[%s5034_s16 + $0xc4] sm:$0xf]  ;;  %v3612_v44 = vor.u32 %v4301_v36, %v3609_v37  ;;  %v3553_v45 = vld [vmem:[%s5034_s16 + $0xf0] sm:$0xf0]  ;;  %v3559_v46 = vld [vmem:[%s5034_s16 + $0xc8] sm:$0xf]  ;;  %v3552_v50 = vor.u32 %v4294_v42, %v3551_v41 }
 0x1b5   : > { %1558 = vmatpush.bf16.msra.mxu0 %v3648_v26  ;;  %v4295_v47 = vld [vmem:[%s5034_s16 + $0xf4] sm:$0xf0]  ;;  %v4289_v48 = vld [vmem:[%s5034_s16 + $0xcc] sm:$0xf]  ;;  %v3561_v49 = vld [vmem:[%s5034_s16 + $0xf8] sm:$0xf0]  ;;  %v3556_v51 = vor.u32 %v4288_v43, %v3553_v45 }
 0x1b6   : > { %1572 = vmatpush.bf16.msra.mxu1 %v3652_v27  ;;  %1586 = vmatpush.bf16.msra.mxu2 %v3656_v28  ;;  %v3560_v52 = vor.u32 %v4295_v47, %v3559_v46  ;;  %v3503_v53 = vld [vmem:[%s5034_s16 + $0x60] sm:$0xf]  ;;  %v4282_v54 = vld [vmem:[%s5034_s16 + $0x8c] sm:$0xf0]  ;;  %v4276_v55 = vld [vmem:[%s5034_s16 + $0x64] sm:$0xf]  ;;  %v3564_v56 = vor.u32 %v4289_v48, %v3561_v49 }
 0x1b7   : > { %1600 = vmatpush.bf16.msra.mxu3 %v3660_v32  ;;  %v3505_v57 = vld [vmem:[%s5034_s16 + $0x90] sm:$0xf0]  ;;  %v3511_v58 = vld [vmem:[%s5034_s16 + $0x68] sm:$0xf]  ;;  %v4283_v59 = vld [vmem:[%s5034_s16 + $0x94] sm:$0xf0]  ;;  %v3504_v62 = vor.u32 %v4282_v54, %v3503_v53 }
 0x1b8   : > { %v4277_v60 = vld [vmem:[%s5034_s16 + $0x6c] sm:$0xf]  ;;  %v3513_v61 = vld [vmem:[%s5034_s16 + $0x98] sm:$0xf0]  ;;  %v3455_v63 = vld [vmem:[%s5034_s16] sm:$0xf]  ;;  %v3508_v1 = vor.u32 %v4276_v55, %v3505_v57  ;;  %v3512_v2 = vor.u32 %v4283_v59, %v3511_v58 }
 0x1b9   : > { %1559 = vmatpush.bf16.msra.mxu0 %v3600_v38  ;;  %v4270_v0 = vld [vmem:[%s5034_s16 + $0x2c] sm:$0xf0]  ;;  %v4264_v3 = vld [vmem:[%s5034_s16 + $0x4] sm:$0xf]  ;;  %v3457_v4 = vld [vmem:[%s5034_s16 + $0x30] sm:$0xf0]  ;;  %v3516_v6 = vor.u32 %v4277_v60, %v3513_v61 }
 0x1ba   : > { %1573 = vmatpush.bf16.msra.mxu1 %v3604_v39  ;;  %1587 = vmatpush.bf16.msra.mxu2 %v3608_v40  ;;  %v3807_v5 = vld [vmem:[%s5034_s16 + $0x2b0] sm:$0xf]  ;;  %v4356_v7 = vld [vmem:[%s5034_s16 + $0x2dc] sm:$0xf0]  ;;  %v4350_v8 = vld [vmem:[%s5034_s16 + $0x2b4] sm:$0xf]  ;;  %v3456_v13 = vor.u32 %v4270_v0, %v3455_v63  ;;  %v3460_v17 = vor.u32 %v4264_v3, %v3457_v4 }
 0x1bb   : > { %1601 = vmatpush.bf16.msra.mxu3 %v3612_v44  ;;  %v3809_v9 = vld [vmem:[%s5034_s16 + $0x2e0] sm:$0xf0]  ;;  %v3463_v10 = vld [vmem:[%s5034_s16 + $0x8] sm:$0xf]  ;;  %v4271_v11 = vld [vmem:[%s5034_s16 + $0x34] sm:$0xf0]  ;;  %v3808_v18 = vor.u32 %v4356_v7, %v3807_v5 }
 0x1bc   : > { %v4265_v12 = vld [vmem:[%s5034_s16 + $0xc] sm:$0xf]  ;;  %v3465_v14 = vld [vmem:[%s5034_s16 + $0x38] sm:$0xf0]  ;;  %v3815_v19 = vld [vmem:[%s5034_s16 + $0x2b8] sm:$0xf]  ;;  %v3812_v22 = vor.u32 %v4350_v8, %v3809_v9  ;;  %v3464_v23 = vor.u32 %v4271_v11, %v3463_v10 }
 0x1bd   : > { %1560 = vmatpush.bf16.msra.mxu0 %v3552_v50  ;;  %v948_v15 = vld [vmem:[#allocation2] sm:$0xff]  ;;  %v949_v16 = vld [vmem:[#allocation2 + $0x8] sm:$0xff]  ;;  %v4357_v20 = vld [vmem:[%s5034_s16 + $0x2e4] sm:$0xf0]  ;;  %v3468_v27 = vor.u32 %v4265_v12, %v3465_v14  ;;  %s5721_s13 = sld [smem:[#allocation18_spill]]  ;;  %vm1829_vm7 = vcmask 130048  }
 0x1be   : > { %1574 = vmatpush.bf16.msra.mxu1 %v3556_v51  ;;  %1588 = vmatpush.bf16.msra.mxu2 %v3560_v52  ;;  %v4351_v21 = vld [vmem:[%s5034_s16 + $0x2bc] sm:$0xf]  ;;  %v3817_v24 = vld [vmem:[%s5034_s16 + $0x2e8] sm:$0xf0]  ;;  %v3759_v25 = vld [vmem:[%s5034_s16 + $0x250] sm:$0xf]  ;;  %v5182_v28 = vpack.c.bf16 %v949_v16, %v948_v15  ;;  %v3816_v31 = vor.u32 %v4357_v20, %v3815_v19 }
 0x1bf   : > { %1602 = vmatpush.bf16.msra.mxu3 %v3564_v56  ;;  %v4344_v26 = vld [vmem:[%s5034_s16 + $0x27c] sm:$0xf0]  ;;  %v4338_v29 = vld [vmem:[%s5034_s16 + $0x254] sm:$0xf]  ;;  %v3761_v30 = vld [vmem:[%s5034_s16 + $0x280] sm:$0xf0]  ;;  %v3820_v32 = vor.u32 %v4351_v21, %v3817_v24 }
 0x1c0   : > { %v3760_v33 = vor.u32 %v4344_v26, %v3759_v25  ;;  %v3767_v34 = vld [vmem:[%s5034_s16 + $0x258] sm:$0xf]  ;;  %v4345_v35 = vld [vmem:[%s5034_s16 + $0x284] sm:$0xf0]  ;;  %v4339_v36 = vld [vmem:[%s5034_s16 + $0x25c] sm:$0xf]  ;;  %v3764_v37 = vor.u32 %v4338_v29, %v3761_v30 }
 0x1c1   : > { %1561 = vmatpush.bf16.msra.mxu0 %v3504_v62  ;;  %v3769_v38 = vld [vmem:[%s5034_s16 + $0x288] sm:$0xf0]  ;;  %v3711_v39 = vld [vmem:[%s5034_s16 + $0x1f0] sm:$0xf]  ;;  %v4332_v40 = vld [vmem:[%s5034_s16 + $0x21c] sm:$0xf0]  ;;  %v3768_v43 = vor.u32 %v4345_v35, %v3767_v34 }
 0x1c2   : > { %1575 = vmatpush.bf16.msra.mxu1 %v3508_v1  ;;  %1589 = vmatpush.bf16.msra.mxu2 %v3512_v2  ;;  %v4326_v41 = vld [vmem:[%s5034_s16 + $0x1f4] sm:$0xf]  ;;  %v3713_v42 = vld [vmem:[%s5034_s16 + $0x220] sm:$0xf0]  ;;  %v3772_v44 = vor.u32 %v4339_v36, %v3769_v38  ;;  %v3712_v45 = vor.u32 %v4332_v40, %v3711_v39  ;;  %v3719_v46 = vld [vmem:[%s5034_s16 + $0x1f8] sm:$0xf] }
 0x1c3   : > { %1603 = vmatpush.bf16.msra.mxu3 %v3516_v6  ;;  %v4333_v47 = vld [vmem:[%s5034_s16 + $0x224] sm:$0xf0]  ;;  %v4327_v48 = vld [vmem:[%s5034_s16 + $0x1fc] sm:$0xf]  ;;  %v3716_v49 = vor.u32 %v4326_v41, %v3713_v42  ;;  %v3721_v50 = vld [vmem:[%s5034_s16 + $0x228] sm:$0xf0] }
 0x1c4   : > { %v3663_v51 = vld [vmem:[%s5034_s16 + $0x190] sm:$0xf]  ;;  %v4320_v52 = vld [vmem:[%s5034_s16 + $0x1bc] sm:$0xf0]  ;;  %v4314_v53 = vld [vmem:[%s5034_s16 + $0x194] sm:$0xf]  ;;  %v3720_v55 = vor.u32 %v4333_v47, %v3719_v46  ;;  %v3724_v56 = vor.u32 %v4327_v48, %v3721_v50 }
 0x1c5   : > { %1562 = vmatpush.bf16.msra.mxu0 %v3456_v13  ;;  %v3665_v54 = vld [vmem:[%s5034_s16 + $0x1c0] sm:$0xf0]  ;;  %v3664_v57 = vor.u32 %v4320_v52, %v3663_v51  ;;  %v3671_v58 = vld [vmem:[%s5034_s16 + $0x198] sm:$0xf]  ;;  %v4321_v59 = vld [vmem:[%s5034_s16 + $0x1c4] sm:$0xf0] }
 0x1c6   : > { %1576 = vmatpush.bf16.msra.mxu1 %v3460_v17  ;;  %1590 = vmatpush.bf16.msra.mxu2 %v3464_v23  ;;  %v4315_v60 = vld [vmem:[%s5034_s16 + $0x19c] sm:$0xf]  ;;  %v3668_v61 = vor.u32 %v4314_v53, %v3665_v54  ;;  %v3673_v62 = vld [vmem:[%s5034_s16 + $0x1c8] sm:$0xf0]  ;;  %v3615_v63 = vld [vmem:[%s5034_s16 + $0x130] sm:$0xf]  ;;  %v3672_v3 = vor.u32 %v4321_v59, %v3671_v58 }
 0x1c7   : > { %1604 = vmatpush.bf16.msra.mxu3 %v3468_v27  ;;  %v4308_v0 = vld [vmem:[%s5034_s16 + $0x15c] sm:$0xf0]  ;;  %v4302_v1 = vld [vmem:[%s5034_s16 + $0x134] sm:$0xf]  ;;  %v3617_v2 = vld [vmem:[%s5034_s16 + $0x160] sm:$0xf0]  ;;  %v3676_v5 = vor.u32 %v4315_v60, %v3673_v62 }
 0x1c8   : > { %1563 = vmatmul.bf16.vlgmr.msra.gmra.mxu0 %v5182_v28  ;;  %v3623_v4 = vld [vmem:[%s5034_s16 + $0x138] sm:$0xf]  ;;  %v3616_v6 = vor.u32 %v4308_v0, %v3615_v63  ;;  %v4309_v7 = vld [vmem:[%s5034_s16 + $0x164] sm:$0xf0]  ;;  %v4303_v8 = vld [vmem:[%s5034_s16 + $0x13c] sm:$0xf]  ;;  %v3620_v10 = vor.u32 %v4302_v1, %v3617_v2 }
 0x1c9   : > { %1611 = vmatpush.bf16.msrb.mxu0 %v3808_v18  ;;  %1577 = vmatmul.bf16.vlgmr.msra.gmra.mxu1 %v5182_v28  ;;  %v3625_v9 = vld [vmem:[%s5034_s16 + $0x168] sm:$0xf0]  ;;  %v3567_v11 = vld [vmem:[%s5034_s16 + $0xd0] sm:$0xf]  ;;  %v4296_v12 = vld [vmem:[%s5034_s16 + $0xfc] sm:$0xf0]  ;;  %v3624_v17 = vor.u32 %v4309_v7, %v3623_v4 }
 0x1ca   : > { %1625 = vmatpush.bf16.msrb.mxu1 %v3812_v22  ;;  %1639 = vmatpush.bf16.msrb.mxu2 %v3816_v31  ;;  %v4290_v13 = vld [vmem:[%s5034_s16 + $0xd4] sm:$0xf]  ;;  %v3569_v14 = vld [vmem:[%s5034_s16 + $0x100] sm:$0xf0]  ;;  %v3575_v15 = vld [vmem:[%s5034_s16 + $0xd8] sm:$0xf]  ;;  %v3628_v19 = vor.u32 %v4303_v8, %v3625_v9  ;;  %v3568_v20 = vor.u32 %v4296_v12, %v3567_v11 }
 0x1cb   : > { %1653 = vmatpush.bf16.msrb.mxu3 %v3820_v32  ;;  %1591 = vmatmul.bf16.vlgmr.msra.gmra.mxu2 %v5182_v28  ;;  %v4297_v16 = vld [vmem:[%s5034_s16 + $0x104] sm:$0xf0]  ;;  %v4291_v18 = vld [vmem:[%s5034_s16 + $0xdc] sm:$0xf]  ;;  %v3572_v21 = vor.u32 %v4290_v13, %v3569_v14  ;;  %v3577_v22 = vld [vmem:[%s5034_s16 + $0x108] sm:$0xf0] }
 0x1cc   : > { %1605 = vmatmul.bf16.vlgmr.msra.gmra.mxu3 %v5182_v28  ;;  %v3519_v23 = vld [vmem:[%s5034_s16 + $0x70] sm:$0xf]  ;;  %v4284_v24 = vld [vmem:[%s5034_s16 + $0x9c] sm:$0xf0]  ;;  %v4278_v25 = vld [vmem:[%s5034_s16 + $0x74] sm:$0xf]  ;;  %v3576_v27 = vor.u32 %v4297_v16, %v3575_v15  ;;  %v3580_v30 = vor.u32 %v4291_v18, %v3577_v22 }
 0x1cd   : > { %1612 = vmatpush.bf16.msrb.mxu0 %v3760_v33  ;;  %v3521_v26 = vld [vmem:[%s5034_s16 + $0xa0] sm:$0xf0]  ;;  %v3527_v29 = vld [vmem:[%s5034_s16 + $0x78] sm:$0xf]  ;;  %v3520_v31 = vor.u32 %v4284_v24, %v3519_v23  ;;  %v4285_v32 = vld [vmem:[%s5034_s16 + $0xa4] sm:$0xf0] }
 0x1ce   : > { %1626 = vmatpush.bf16.msrb.mxu1 %v3764_v37  ;;  %1640 = vmatpush.bf16.msrb.mxu2 %v3768_v43  ;;  %v4279_v33 = vld [vmem:[%s5034_s16 + $0x7c] sm:$0xf]  ;;  %v3529_v34 = vld [vmem:[%s5034_s16 + $0xa8] sm:$0xf0]  ;;  %v3524_v35 = vor.u32 %v4278_v25, %v3521_v26  ;;  %v3471_v36 = vld [vmem:[%s5034_s16 + $0x10] sm:$0xf]  ;;  %v3528_v42 = vor.u32 %v4285_v32, %v3527_v29 }
 0x1cf   : > { %1654 = vmatpush.bf16.msrb.mxu3 %v3772_v44  ;;  %v4272_v37 = vld [vmem:[%s5034_s16 + $0x3c] sm:$0xf0]  ;;  %v4266_v38 = vld [vmem:[%s5034_s16 + $0x14] sm:$0xf]  ;;  %v3473_v39 = vld [vmem:[%s5034_s16 + $0x40] sm:$0xf0] }
 0x1d0   : > { %v3823_v40 = vld [vmem:[%s5034_s16 + $0x2c0] sm:$0xf]  ;;  %v4358_v41 = vld [vmem:[%s5034_s16 + $0x2ec] sm:$0xf0]  ;;  %v4352_v43 = vld [vmem:[%s5034_s16 + $0x2c4] sm:$0xf]  ;;  %v3472_v46 = vor.u32 %v4272_v37, %v3471_v36 }
 0x1d1   : > { %1613 = vmatpush.bf16.msrb.mxu0 %v3712_v45  ;;  %v3825_v44 = vld [vmem:[%s5034_s16 + $0x2f0] sm:$0xf0]  ;;  %v3532_v45 = vor.u32 %v4279_v33, %v3529_v34  ;;  %v3479_v47 = vld [vmem:[%s5034_s16 + $0x18] sm:$0xf]  ;;  %v4273_v48 = vld [vmem:[%s5034_s16 + $0x44] sm:$0xf0]  ;;  %v3824_v52 = vor.u32 %v4358_v41, %v3823_v40 }
 0x1d2   : > { %1627 = vmatpush.bf16.msrb.mxu1 %v3716_v49  ;;  %1641 = vmatpush.bf16.msrb.mxu2 %v3720_v55  ;;  %v3476_v49 = vor.u32 %v4266_v38, %v3473_v39  ;;  %v4267_v50 = vld [vmem:[%s5034_s16 + $0x1c] sm:$0xf]  ;;  %v3481_v51 = vld [vmem:[%s5034_s16 + $0x48] sm:$0xf0]  ;;  %v3775_v53 = vld [vmem:[%s5034_s16 + $0x260] sm:$0xf]  ;;  %v3828_v55 = vor.u32 %v4352_v43, %v3825_v44 }
 0x1d3   : > { %1655 = vmatpush.bf16.msrb.mxu3 %v3724_v56  ;;  %v4346_v54 = vld [vmem:[%s5034_s16 + $0x28c] sm:$0xf0]  ;;  %v3480_v56 = vor.u32 %v4273_v48, %v3479_v47  ;;  %v3727_v59 = vld [vmem:[%s5034_s16 + $0x200] sm:$0xf]  ;;  %v4340_v7 = vld [vmem:[%s5034_s16 + $0x264] sm:$0xf] }
 0x1d4   : > { %v3776_v58 = vor.u32 %v4346_v54, %v3775_v53  ;;  %v4334_v60 = vld [vmem:[%s5034_s16 + $0x22c] sm:$0xf0]  ;;  %v3679_v62 = vld [vmem:[%s5034_s16 + $0x1a0] sm:$0xf]  ;;  %v3777_v8 = vld [vmem:[%s5034_s16 + $0x290] sm:$0xf0] }
 0x1d5   : > { %1614 = vmatpush.bf16.msrb.mxu0 %v3664_v57  ;;  %v3484_v57 = vor.u32 %v4267_v50, %v3481_v51  ;;  %v4322_v63 = vld [vmem:[%s5034_s16 + $0x1cc] sm:$0xf0]  ;;  %v3631_v1 = vld [vmem:[%s5034_s16 + $0x140] sm:$0xf]  ;;  %v3780_v9 = vor.u32 %v4340_v7, %v3777_v8  ;;  %v3729_v11 = vld [vmem:[%s5034_s16 + $0x230] sm:$0xf0] }
 0x1d6   : > { %1628 = vmatpush.bf16.msrb.mxu1 %v3668_v61  ;;  %1642 = vmatpush.bf16.msrb.mxu2 %v3672_v3  ;;  %v3728_v61 = vor.u32 %v4334_v60, %v3727_v59  ;;  %v3680_v0 = vor.u32 %v4322_v63, %v3679_v62  ;;  %v4310_v2 = vld [vmem:[%s5034_s16 + $0x16c] sm:$0xf0]  ;;  %v3583_v4 = vld [vmem:[%s5034_s16 + $0xe0] sm:$0xf]  ;;  %v3831_v13 = vld [vmem:[%s5034_s16 + $0x2c8] sm:$0xf] }
 0x1d7   : > { %1656 = vmatpush.bf16.msrb.mxu3 %v3676_v5  ;;  %v3632_v3 = vor.u32 %v4310_v2, %v3631_v1  ;;  %v4298_v5 = vld [vmem:[%s5034_s16 + $0x10c] sm:$0xf0]  ;;  %v4359_v14 = vld [vmem:[%s5034_s16 + $0x2f4] sm:$0xf0]  ;;  %v4353_v15 = vld [vmem:[%s5034_s16 + $0x2cc] sm:$0xf] }
 0x1d8   : > { %v3832_v16 = vor.u32 %v4359_v14, %v3831_v13  ;;  %v4286_v22 = vld [vmem:[%s5034_s16 + $0xac] sm:$0xf0]  ;;  %v3783_v25 = vld [vmem:[%s5034_s16 + $0x268] sm:$0xf]  ;;  %v4347_v26 = vld [vmem:[%s5034_s16 + $0x294] sm:$0xf0] }
 0x1d9   : > { %1615 = vmatpush.bf16.msrb.mxu0 %v3616_v6  ;;  %v3584_v6 = vor.u32 %v4298_v5, %v3583_v4  ;;  %v4341_v29 = vld [vmem:[%s5034_s16 + $0x26c] sm:$0xf]  ;;  %v4304_v32 = vld [vmem:[%s5034_s16 + $0x144] sm:$0xf]  ;;  %v3633_v33 = vld [vmem:[%s5034_s16 + $0x170] sm:$0xf0] }
 0x1da   : > { %1629 = vmatpush.bf16.msrb.mxu1 %v3620_v10  ;;  %1643 = vmatpush.bf16.msrb.mxu2 %v3624_v17  ;;  %v4328_v10 = vld [vmem:[%s5034_s16 + $0x204] sm:$0xf]  ;;  %v3833_v17 = vld [vmem:[%s5034_s16 + $0x2f8] sm:$0xf0]  ;;  %v3487_v34 = vld [vmem:[%s5034_s16 + $0x20] sm:$0xf]  ;;  %v3636_v36 = vor.u32 %v4304_v32, %v3633_v33 }
 0x1db   : > { %1657 = vmatpush.bf16.msrb.mxu3 %v3628_v19  ;;  %v3732_v12 = vor.u32 %v4328_v10, %v3729_v11  ;;  %v3836_v18 = vor.u32 %v4353_v15, %v3833_v17  ;;  %v4316_v19 = vld [vmem:[%s5034_s16 + $0x1a4] sm:$0xf]  ;;  %v3735_v38 = vld [vmem:[%s5034_s16 + $0x208] sm:$0xf]  ;;  %v4335_v39 = vld [vmem:[%s5034_s16 + $0x234] sm:$0xf0] }
 0x1dc   : > { %v4329_v40 = vld [vmem:[%s5034_s16 + $0x20c] sm:$0xf]  ;;  %v3736_v41 = vor.u32 %v4335_v39, %v3735_v38  ;;  %v4292_v44 = vld [vmem:[%s5034_s16 + $0xe4] sm:$0xf]  ;;  %v3687_v47 = vld [vmem:[%s5034_s16 + $0x1a8] sm:$0xf] }
 0x1dd   : > { %1616 = vmatpush.bf16.msrb.mxu0 %v3568_v20  ;;  %v3681_v20 = vld [vmem:[%s5034_s16 + $0x1d0] sm:$0xf0]  ;;  %v4323_v48 = vld [vmem:[%s5034_s16 + $0x1d4] sm:$0xf0]  ;;  %v3689_v51 = vld [vmem:[%s5034_s16 + $0x1d8] sm:$0xf0] }
 0x1de   : > { %1630 = vmatpush.bf16.msrb.mxu1 %v3572_v21  ;;  %1644 = vmatpush.bf16.msrb.mxu2 %v3576_v27  ;;  %v3535_v21 = vld [vmem:[%s5034_s16 + $0x80] sm:$0xf]  ;;  %v3684_v23 = vor.u32 %v4316_v19, %v3681_v20  ;;  %v3784_v27 = vor.u32 %v4347_v26, %v3783_v25  ;;  %v3688_v50 = vor.u32 %v4323_v48, %v3687_v47  ;;  %v4280_v53 = vld [vmem:[%s5034_s16 + $0x84] sm:$0xf]  ;;  %v3537_v54 = vld [vmem:[%s5034_s16 + $0xb0] sm:$0xf0] }
 0x1df   : > { %1658 = vmatpush.bf16.msrb.mxu3 %v3580_v30  ;;  %v3536_v24 = vor.u32 %v4286_v22, %v3535_v21  ;;  %v3785_v30 = vld [vmem:[%s5034_s16 + $0x298] sm:$0xf0]  ;;  %v4268_v62 = vld [vmem:[%s5034_s16 + $0x24] sm:$0xf]  ;;  %v3489_v63 = vld [vmem:[%s5034_s16 + $0x50] sm:$0xf0] }
 0x1e0   : > { %v3641_v60 = vld [vmem:[%s5034_s16 + $0x178] sm:$0xf0]  ;;  %v3591_v1 = vld [vmem:[%s5034_s16 + $0xe8] sm:$0xf]  ;;  %v4299_v2 = vld [vmem:[%s5034_s16 + $0x114] sm:$0xf0] }
 0x1e1   : > { %1617 = vmatpush.bf16.msrb.mxu0 %v3520_v31  ;;  %v3788_v31 = vor.u32 %v4341_v29, %v3785_v30  ;;  %v3592_v4 = vor.u32 %v4299_v2, %v3591_v1  ;;  %v3593_v5 = vld [vmem:[%s5034_s16 + $0x118] sm:$0xf0]  ;;  %v3543_v7 = vld [vmem:[%s5034_s16 + $0x88] sm:$0xf]  ;;  %v4287_v8 = vld [vmem:[%s5034_s16 + $0xb4] sm:$0xf0] }
 0x1e2   : > { %1631 = vmatpush.bf16.msrb.mxu1 %v3524_v35  ;;  %1645 = vmatpush.bf16.msrb.mxu2 %v3528_v42  ;;  %v4274_v35 = vld [vmem:[%s5034_s16 + $0x4c] sm:$0xf0]  ;;  %v3737_v42 = vld [vmem:[%s5034_s16 + $0x238] sm:$0xf0]  ;;  %v3544_v10 = vor.u32 %v4287_v8, %v3543_v7  ;;  %v3495_v13 = vld [vmem:[%s5034_s16 + $0x28] sm:$0xf] }
 0x1e3   : > { %1659 = vmatpush.bf16.msrb.mxu3 %v3532_v45  ;;  %v3488_v37 = vor.u32 %v4274_v35, %v3487_v34  ;;  %v3740_v43 = vor.u32 %v4329_v40, %v3737_v42  ;;  %v3585_v45 = vld [vmem:[%s5034_s16 + $0x110] sm:$0xf0]  ;;  %v3545_v11 = vld [vmem:[%s5034_s16 + $0xb8] sm:$0xf0]  ;;  %v4275_v14 = vld [vmem:[%s5034_s16 + $0x54] sm:$0xf0] }
 0x1e4   : > { %v3496_v15 = vor.u32 %v4275_v14, %v3495_v13  ;;  %v3497_v17 = vld [vmem:[%s5034_s16 + $0x58] sm:$0xf0]  ;;  %v5313_v19 = vld [vmem:[%s5075_s6] sm:$0xff]  ;;  %p4225_p10 = scmp.ne.s32.totalorder %s4912_s19, 1 }
 0x1e5   : > { %1618 = vmatpush.bf16.msrb.mxu0 %v3472_v46  ;;  %v3588_v46 = vor.u32 %v4292_v44, %v3585_v45  ;;  %v1051_v20 = vperm.slane %v5313_v19, 0  ;;  %v1052_v22 = vperm.slane %v5313_v19, 1  ;;  %v1054_v33 = vperm.slane %v5313_v19, 3  ;;  %s5729_s20 = sld [smem:[#allocation30_spill]] (!%p4225_p10) }
 0x1e6   : > { %1632 = vmatpush.bf16.msrb.mxu1 %v3476_v49  ;;  %1646 = vmatpush.bf16.msrb.mxu2 %v3480_v56  ;;  %v4317_v49 = vld [vmem:[%s5034_s16 + $0x1ac] sm:$0xf]  ;;  %v3639_v56 = vld [vmem:[%s5034_s16 + $0x148] sm:$0xf] }
 0x1e7   : > { %1660 = vmatpush.bf16.msrb.mxu3 %v3484_v57  ;;  %v4311_v57 = vld [vmem:[%s5034_s16 + $0x174] sm:$0xf0] }
 0x1e8   : > { %1619 = vmatmul.bf16.vlgmr.msrb.gmra.mxu0 %v5182_v28  ;;  %v3640_v59 = vor.u32 %v4311_v57, %v3639_v56  ;;  %v1056_v56 = vperm.slane %v5313_v19, 5 }
 0x1e9   : > { %1667 = vmatpush.bf16.msra.mxu0 %v3824_v52  ;;  %1633 = vmatmul.bf16.vlgmr.msrb.gmra.mxu1 %v5182_v28  ;;  %v3692_v52 = vor.u32 %v4317_v49, %v3689_v51 }
 0x1ea   : > { %1681 = vmatpush.bf16.msra.mxu1 %v3828_v55  ;;  %1647 = vmatmul.bf16.vlgmr.msrb.gmra.mxu2 %v5182_v28  ;;  %v3540_v55 = vor.u32 %v4280_v53, %v3537_v54 }
 0x1eb   : > { %1661 = vmatmul.bf16.vlgmr.msrb.gmra.mxu3 %v5182_v28  ;;  %1695 = vmatpush.bf16.msra.mxu2 %v3832_v16  ;;  %v4269_v16 = vld [vmem:[%s5034_s16 + $0x2c] sm:$0xf] }
 0x1ec   : > { %1709 = vmatpush.bf16.msra.mxu3 %v3836_v18  ;;  %v3500_v18 = vor.u32 %v4269_v16, %v3497_v17 }
 0x1ed   : > { %1668 = vmatpush.bf16.msra.mxu0 %v3776_v58  ;;  %v4305_v58 = vld [vmem:[%s5034_s16 + $0x14c] sm:$0xf] }
 0x1ee   : > { %1682 = vmatpush.bf16.msra.mxu1 %v3780_v9  ;;  %v4281_v9 = vld [vmem:[%s5034_s16 + $0x8c] sm:$0xf] }
 0x1ef   : > { %1696 = vmatpush.bf16.msra.mxu2 %v3784_v27 }
 0x1f0   : > { %1710 = vmatpush.bf16.msra.mxu3 %v3788_v31  ;;  %v1053_v31 = vperm.slane %v5313_v19, 2 }
 0x1f1   : > { %1669 = vmatpush.bf16.msra.mxu0 %v3728_v61  ;;  %v3644_v61 = vor.u32 %v4305_v58, %v3641_v60 }
 0x1f2   : > { %1683 = vmatpush.bf16.msra.mxu1 %v3732_v12  ;;  %v3548_v12 = vor.u32 %v4281_v9, %v3545_v11 }
 0x1f3   : > { %1697 = vmatpush.bf16.msra.mxu2 %v3736_v41 }
 0x1f4   : > { %1711 = vmatpush.bf16.msra.mxu3 %v3740_v43 }
 0x1f5   : > { %1670 = vmatpush.bf16.msra.mxu0 %v3680_v0  ;;  %v3492_v0 = vor.u32 %v4268_v62, %v3489_v63  ;;  %v1057_v62 = vperm.slane %v5313_v19, 6 }
 0x1f6   : > { %1684 = vmatpush.bf16.msra.mxu1 %v3684_v23 }
 0x1f7   : > { %1698 = vmatpush.bf16.msra.mxu2 %v3688_v50 }
 0x1f8   : > { %1712 = vmatpush.bf16.msra.mxu3 %v3692_v52 }
 0x1f9   : > { %1671 = vmatpush.bf16.msra.mxu0 %v3632_v3  ;;  %v4293_v3 = vld [vmem:[%s5034_s16 + $0xec] sm:$0xf]  ;;  %s5730_s16 = sld [smem:[#allocation31_spill]] (!%p4225_p10) }
 0x1fa   : > { %1685 = vmatpush.bf16.msra.mxu1 %v3636_v36 }
 0x1fb   : > { %1699 = vmatpush.bf16.msra.mxu2 %v3640_v59 }
 0x1fc   : > { %1713 = vmatpush.bf16.msra.mxu3 %v3644_v61 }
 0x1fd   : > { %1672 = vmatpush.bf16.msra.mxu0 %v3584_v6  ;;  %v3596_v6 = vor.u32 %v4293_v3, %v3593_v5 }
 0x1fe   : > { %1686 = vmatpush.bf16.msra.mxu1 %v3588_v46 }
 0x1ff   : > { %1700 = vmatpush.bf16.msra.mxu2 %v3592_v4 }
 0x200   : > { %1714 = vmatpush.bf16.msra.mxu3 %v3596_v6 }
 0x201   : > { %1673 = vmatpush.bf16.msra.mxu0 %v3536_v24 }
 0x202   : > { %1687 = vmatpush.bf16.msra.mxu1 %v3540_v55  ;;  %v1055_v55 = vperm.slane %v5313_v19, 4 }
 0x203   : > { %1701 = vmatpush.bf16.msra.mxu2 %v3544_v10 }
 0x204   : > { %1715 = vmatpush.bf16.msra.mxu3 %v3548_v12 }
 0x205   : > { %1674 = vmatpush.bf16.msra.mxu0 %v3488_v37 }
 0x206   : > { %1688 = vmatpush.bf16.msra.mxu1 %v3492_v0  ;;  %v1058_v0 = vperm.slane %v5313_v19, 7 }
 0x207   : > { %1702 = vmatpush.bf16.msra.mxu2 %v3496_v15 }
 0x208   : > { %1675 = vmatmul.bf16.vlgmr.msra.gmra.mxu0 %v5182_v28  ;;  %1716 = vmatpush.bf16.msra.mxu3 %v3500_v18 }
 0x209   : > { %1689 = vmatmul.bf16.vlgmr.msra.gmra.mxu1 %v5182_v28 }
 0x20a   : > { %1703 = vmatmul.bf16.vlgmr.msra.gmra.mxu2 %v5182_v28 }
 0x20b   : > { %1717 = vmatmul.bf16.vlgmr.msra.gmra.mxu3 %v5182_v28 }
 0x245   : > { %v1564_v21 = vpop.f32.mrf.mxu0 }
 0x246   : > { %v1578_v23 = vpop.f32.mrf.mxu1  ;;  %v1565_v24 = vadd.f32 %v1564_v21, %v1051_v20 }
 0x247   : > { %v1579_v25 = vadd.f32 %v1578_v23, %v1052_v22 }
 0x249   : > { %v1723_v26 = vpack.c.bf16 %v1579_v25, %v1565_v24 }
 0x24b   : > { %v1807_v36 = vunpack.c.h.b16 %v1723_v26  ;;  %v1803_v45 = vunpack.c.l.b16 %v1723_v26 }
 0x24d   : > { %v1566_v27 = vpop.f32.mrf.mxu0 }
 0x24e   : > { %v1567_v29 = vadd.f32 %v1566_v27, %v1051_v20  ;;  %v1580_v30 = vpop.f32.mrf.mxu1  ;;  %v1592_v32 = vpop.f32.mrf.mxu2 }
 0x24f   : > { %v1581_v34 = vadd.f32 %v1580_v30, %v1052_v22  ;;  %v1606_v35 = vpop.f32.mrf.mxu3  ;;  %v1593_v38 = vadd.f32 %v1592_v32, %v1053_v31  ;;  %v1048_v30 = vld [vmem:[%s5075_s6 + $0x8] sm:$0xf] }
 0x250   : > { %v1607_v39 = vadd.f32 %v1606_v35, %v1054_v33  ;;  %v1059_v32 = vperm.slane %v1048_v30, 0  ;;  %v1060_v35 = vperm.slane %v1048_v30, 1 }
 0x251   : > { %v1729_v37 = vpack.c.bf16 %v1581_v34, %v1567_v29 }
 0x252   : > { %v1724_v41 = vpack.c.bf16 %v1607_v39, %v1593_v38 }
 0x253   : > { %v1808_v40 = vunpack.c.h.b16 %v1729_v37  ;;  %v1804_v46 = vunpack.c.l.b16 %v1729_v37  ;;  %v4374_v37 = vld [vmem:[%s5041_s28 + $0x70] sm:$0xff] }
 0x254   : > { %v1855_v48 = vunpack.c.l.b16 %v1724_v41  ;;  %v1877_v17 = vunpack.c.h.b16 %v1724_v41 }
 0x255   : > { %v1809_v28 = vpack.c.b16 %v1808_v40, %v1807_v36  ;;  %v1805_v50 = vpack.c.b16 %v1804_v46, %v1803_v45 }
 0x256   : > { %v1594_v42 = vpop.f32.mrf.mxu2 }
 0x257   : > { %1818 = vmatpush.bf16.xpose.msrb.mxu0 %v1809_v28  ;;  %v1595_v43 = vadd.f32 %v1594_v42, %v1053_v31  ;;  %v1608_v44 = vpop.f32.mrf.mxu3  ;;  %v4373_v42 = vld [vmem:[%s5041_s28 + $0x68] sm:$0xff] }
 0x258   : > { %v1609_v47 = vadd.f32 %v1608_v44, %v1054_v33  ;;  %v4375_v33 = vld [vmem:[%s5041_s28 + $0x78] sm:$0xff] }
 0x25a   : > { %v1730_v49 = vpack.c.bf16 %v1609_v47, %v1595_v43 }
 0x25c   : > { %v1856_v51 = vunpack.c.l.b16 %v1730_v49  ;;  %v1878_v18 = vunpack.c.h.b16 %v1730_v49 }
 0x25e   : > { %1819 = vmatmul.bf16.vlgmr.msrb.gmra.mxu0 %v1805_v50  ;;  %v1857_v52 = vpack.c.b16 %v1856_v51, %v1855_v48  ;;  %v1879_v22 = vpack.c.b16 %v1878_v18, %v1877_v17  ;;  %v4372_v48 = vld [vmem:[%s5041_s28 + $0x60] sm:$0xff] }
 0x25f   : > { %1998 = vmatpush.bf16.msra.mxu0 %v4375_v33 }
 0x260   : > { %1869 = vmatpush.bf16.msrb.mxu3 %v1857_v52 }
 0x263   : > { %1999 = vmatpush.bf16.msra.mxu0 %v4374_v37 }
 0x265   : > { %v1620_v53 = vpop.f32.mrf.mxu0 }
 0x266   : > { %v1634_v54 = vpop.f32.mrf.mxu1  ;;  %v1621_v57 = vadd.f32 %v1620_v53, %v1055_v55  ;;  %v1061_v53 = vperm.slane %v1048_v30, 2 }
 0x267   : > { %v1635_v58 = vadd.f32 %v1634_v54, %v1056_v56  ;;  %2000 = vmatpush.bf16.msra.mxu0 %v4373_v42  ;;  %v1062_v54 = vperm.slane %v1048_v30, 3 }
 0x269   : > { %v1725_v1 = vpack.c.bf16 %v1635_v58, %v1621_v57  ;;  %v4370_v58 = vld [vmem:[%s5041_s28 + $0x50] sm:$0xff] }
 0x26b   : > { %v1883_v7 = vunpack.c.l.b16 %v1725_v1  ;;  %v1928_v8 = vunpack.c.h.b16 %v1725_v1  ;;  %2001 = vmatpush.bf16.msra.mxu0 %v4372_v48 }
 0x26d   : > { %v1622_v59 = vpop.f32.mrf.mxu0  ;;  %v1648_v63 = vpop.f32.mrf.mxu2 }
 0x26e   : > { %v1623_v60 = vadd.f32 %v1622_v59, %v1055_v55  ;;  %v1636_v61 = vpop.f32.mrf.mxu1  ;;  %v1662_v3 = vpop.f32.mrf.mxu3  ;;  %v1649_v5 = vadd.f32 %v1648_v63, %v1057_v62  ;;  %v4371_v55 = vld [vmem:[%s5041_s28 + $0x58] sm:$0xff] }
 0x26f   : > { %v1637_v2 = vadd.f32 %v1636_v61, %v1056_v56  ;;  %v1663_v6 = vadd.f32 %v1662_v3, %v1058_v0  ;;  %2002 = vmatpush.bf16.msra.mxu0 %v4371_v55  ;;  %v4369_v61 = vld [vmem:[%s5041_s28 + $0x48] sm:$0xff] }
 0x271   : > { %v1731_v4 = vpack.c.bf16 %v1637_v2, %v1623_v60  ;;  %v1726_v13 = vpack.c.bf16 %v1663_v6, %v1649_v5  ;;  %v4368_v6 = vld [vmem:[%s5041_s28 + $0x40] sm:$0xff] }
 0x273   : > { %v1884_v9 = vunpack.c.l.b16 %v1731_v4  ;;  %v1929_v10 = vunpack.c.h.b16 %v1731_v4  ;;  %v2080_v20 = vunpack.c.h.b16 %v1726_v13  ;;  %v2076_v25 = vunpack.c.l.b16 %v1726_v13  ;;  %2003 = vmatpush.bf16.msra.mxu0 %v4370_v58 }
 0x275   : > { %v1885_v11 = vpack.c.b16 %v1884_v9, %v1883_v7  ;;  %v1930_v12 = vpack.c.b16 %v1929_v10, %v1928_v8  ;;  %v1650_v14 = vpop.f32.mrf.mxu2  ;;  %v5343_v10 = vld [vmem:[%s5721_s13] sm:$0xff] }
 0x276   : > { %v1651_v15 = vadd.f32 %v1650_v14, %v1057_v62  ;;  %v1664_v16 = vpop.f32.mrf.mxu3 }
 0x277   : > { %1894 = vmatpush.bf16.xpose.msrb.mxu2 %v1885_v11  ;;  %1942 = vmatpush.bf16.msra.mxu3 %v1930_v12  ;;  %v1665_v19 = vadd.f32 %v1664_v16, %v1058_v0 }
 0x278   : > { %2004 = vmatpush.bf16.msra.mxu0 %v4369_v61 }
 0x279   : > { %v1732_v21 = vpack.c.bf16 %v1665_v19, %v1651_v15  ;;  %v5350_v15 = vld [vmem:[%s5721_s13 + $0x8] sm:$0xff] }
 0x27b   : > { %v2081_v23 = vunpack.c.h.b16 %v1732_v21  ;;  %v2077_v26 = vunpack.c.l.b16 %v1732_v21 }
 0x27c   : > { %2005 = vmatpush.bf16.msra.mxu0 %v4368_v6 }
 0x27d   : > { %v2082_v24 = vpack.c.b16 %v2081_v23, %v2080_v20  ;;  %v2078_v27 = vpack.c.b16 %v2077_v26, %v2076_v25 }
 0x27e   : > { %1895 = vmatmul.bf16.vlgmr.msrb.gmra.mxu2 %v1879_v22 }
 0x27f   : > { %2091 = vmatpush.bf16.xpose.msra.mxu2 %v2082_v24 }
 0x285   : > { %v1676_v29 = vpop.f32.mrf.mxu0 }
 0x286   : > { %v1690_v31 = vpop.f32.mrf.mxu1  ;;  %v1677_v34 = vadd.f32 %v1676_v29, %v1059_v32 }
 0x287   : > { %v1691_v39 = vadd.f32 %v1690_v31, %v1060_v35 }
 0x289   : > { %v1727_v28 = vpack.c.bf16 %v1691_v39, %v1677_v34 }
 0x28b   : > { %v2127_v43 = vunpack.c.l.b16 %v1727_v28  ;;  %v2213_v44 = vunpack.c.h.b16 %v1727_v28 }
 0x28d   : > { %v1678_v36 = vpop.f32.mrf.mxu0  ;;  %v1704_v51 = vpop.f32.mrf.mxu2 }
 0x28e   : > { %2092 = vmatmul.bf16.vlgmr.msra.gmra.mxu2 %v2078_v27  ;;  %v1679_v38 = vadd.f32 %v1678_v36, %v1059_v32  ;;  %v1692_v40 = vpop.f32.mrf.mxu1  ;;  %v1718_v52 = vpop.f32.mrf.mxu3  ;;  %v1705_v56 = vadd.f32 %v1704_v51, %v1061_v53 }
 0x28f   : > { %v1693_v41 = vadd.f32 %v1692_v40, %v1060_v35  ;;  %v1719_v57 = vadd.f32 %v1718_v52, %v1062_v54 }
 0x291   : > { %v1733_v45 = vpack.c.bf16 %v1693_v41, %v1679_v38  ;;  %v1728_v59 = vpack.c.bf16 %v1719_v57, %v1705_v56 }
 0x293   : > { %v2128_v46 = vunpack.c.l.b16 %v1733_v45  ;;  %v2214_v47 = vunpack.c.h.b16 %v1733_v45  ;;  %v2219_v1 = vunpack.c.l.b16 %v1728_v59  ;;  %v2264_v2 = vunpack.c.h.b16 %v1728_v59 }
 0x295   : > { %v5330_v49 = vpack.c.b16 %v2128_v46, %v2127_v43  ;;  %v5332_v50 = vpack.c.b16 %v2214_v47, %v2213_v44  ;;  %v1706_v60 = vpop.f32.mrf.mxu2 }
 0x296   : > { %v1707_v62 = vadd.f32 %v1706_v60, %v1061_v53  ;;  %v1720_v63 = vpop.f32.mrf.mxu3 }
 0x297   : > { %v1721_v0 = vadd.f32 %v1720_v63, %v1062_v54 }
 0x299   : > { %v1734_v3 = vpack.c.bf16 %v1721_v0, %v1707_v62 }
 0x29b   : > { %v2220_v4 = vunpack.c.l.b16 %v1734_v3  ;;  %v2265_v5 = vunpack.c.h.b16 %v1734_v3 }
 0x29d   : > { %v5338_v7 = vpack.c.b16 %v2220_v4, %v2219_v1  ;;  %v2266_v8 = vpack.c.b16 %v2265_v5, %v2264_v2 }
 0x29f   : > { %2278 = vmatpush.bf16.msrb.mxu0 %v2266_v8 }
 0x2db   : > { %v1820_v9 = vpop.f32.mrf.mxu0 }
 0x2dc   : > { %v1825_v11 = vmul.f32 0.17677669, %v1820_v9 }
 0x2de   : > { %v1827_v12 = vadd.f32 %v1825_v11, %v5343_v10 }
 0x2e0   : > { %v1830_v13 = vsel %vm1829_vm7, %v1827_v12, -inf }
 0x2e1   : > { %1831 = vmax.xlane.f32.xlu0 %v1830_v13 }
 0x2e3   : > { %v1822_v14 = vpop.f32.mrf.mxu0 }
 0x2e4   : > { %v1826_v16 = vmul.f32 0.17677669, %v1822_v14 }
 0x2e6   : > { %v1828_v17 = vadd.f32 %v1826_v16, %v5350_v15 }
 0x2e8   : > { %v1833_v18 = vsel %vm1829_vm7, %v1828_v17, -inf }
 0x2e9   : > { %1834 = vmax.xlane.f32.xlu0 %v1833_v18 }
 0x301   : > { %v1896_v19 = vpop.f32.mrf.mxu2 }
 0x302   : > { %v1901_v20 = vmul.f32 0.17677669, %v1896_v19 }
 0x304   : > { %v1903_v21 = vadd.f32 %v1901_v20, %v5343_v10 }
 0x306   : > { %v1905_v22 = vsel %vm1829_vm7, %v1903_v21, -inf }
 0x307   : > { %1906 = vmax.xlane.f32.xlu1 %v1905_v22 }
 0x309   : > { %v1898_v23 = vpop.f32.mrf.mxu2 }
 0x30a   : > { %v1902_v24 = vmul.f32 0.17677669, %v1898_v23  ;;  %v4365_v23 = vld [vmem:[%s5041_s28 + $0x28] sm:$0xff] }
 0x30c   : > { %v1904_v25 = vadd.f32 %v1902_v24, %v5350_v15 }
 0x30e   : > { %v1908_v26 = vsel %vm1829_vm7, %v1904_v25, -inf }
 0x30f   : > { %1909 = vmax.xlane.f32.xlu1 %v1908_v26 }
 0x311   : > { %v2093_v27 = vpop.f32.mrf.mxu2 }
 0x312   : > { %v2098_v29 = vmul.f32 0.17677669, %v2093_v27 }
 0x314   : > { %v2100_v30 = vadd.f32 %v2098_v29, %v5343_v10 }
 0x316   : > { %v2102_v31 = vsel %vm1829_vm7, %v2100_v30, -inf }
 0x317   : > { %2103 = vmax.xlane.f32.xlu2 %v2102_v31  ;;  %v4362_v31 = vld [vmem:[%s5041_s28 + $0x10] sm:$0xff] }
 0x319   : > { %v2095_v32 = vpop.f32.mrf.mxu2 }
 0x31a   : > { %v2099_v33 = vmul.f32 0.17677669, %v2095_v32  ;;  %v4361_v32 = vld [vmem:[%s5041_s28 + $0x8] sm:$0xff] }
 0x31c   : > { %v2101_v34 = vadd.f32 %v2099_v33, %v5350_v15  ;;  %v4360_v33 = vld [vmem:[%s5041_s28] sm:$0xff] }
 0x31e   : > { %v2105_v35 = vsel %vm1829_vm7, %v2101_v34, -inf }
 0x31f   : > { %2106 = vmax.xlane.f32.xlu2 %v2105_v35 }
 0x354   : > { %v1832_v36 = vpop.xlane.xlu0 %1831 }
 0x355   : > { %v1836_v37 = vsub.f32 %v1827_v12, %v1832_v36  ;;  %v4382_v36 = vld [vmem:[%s5041_s28 + $0xb0] sm:$0xff] }
 0x357   : > { %v1838_v38 = vmul.f32 1.442695, %v1836_v37  ;;  %v4381_v37 = vld [vmem:[%s5041_s28 + $0xa8] sm:$0xff] }
 0x359   : > { %4544 = vpow2.f32 %v1838_v38 }
 0x35c   : > { %v1835_v39 = vpop.xlane.xlu0 %1834 }
 0x35d   : > { %v1837_v40 = vsub.f32 %v1828_v17, %v1835_v39  ;;  %v4380_v39 = vld [vmem:[%s5041_s28 + $0xa0] sm:$0xff] }
 0x35f   : > { %v4545_v28 = vpop.eup %4544  ;;  %v1840_v41 = vmul.f32 1.442695, %v1837_v40  ;;  %v4379_v40 = vld [vmem:[%s5041_s28 + $0x98] sm:$0xff] }
 0x360   : > { %v1842_v42 = vsel %vm1829_vm7, %v4545_v28, 0.0 }
 0x361   : > { %4546 = vpow2.f32 %v1840_v41  ;;  %1843 = vadd.xlane.f32.xlu0 %v1842_v42  ;;  %v4377_v41 = vld [vmem:[%s5041_s28 + $0x88] sm:$0xff]  ;;  %v4376_v42 = vld [vmem:[%s5041_s28 + $0x80] sm:$0xff] }
 0x367   : > { %v4547_v43 = vpop.eup %4546 }
 0x368   : > { %v1845_v44 = vsel %vm1829_vm7, %v4547_v43, 0.0 }
 0x369   : > { %1846 = vadd.xlane.f32.xlu1 %v1845_v44 }
 0x37a   : > { %v1907_v45 = vpop.xlane.xlu1 %1906 }
 0x37b   : > { %v1911_v46 = vsub.f32 %v1903_v21, %v1907_v45  ;;  %v4367_v21 = vld [vmem:[%s5041_s28 + $0x38] sm:$0xff] }
 0x37c   : > { %2060 = vmatpush.bf16.msrb.mxu1 %v4367_v21 }
 0x37d   : > { %v1913_v47 = vmul.f32 1.442695, %v1911_v46 }
 0x37f   : > { %4548 = vpow2.f32 %v1913_v47 }
 0x382   : > { %v1910_v48 = vpop.xlane.xlu1 %1909 }
 0x383   : > { %v1912_v51 = vsub.f32 %v1904_v25, %v1910_v48  ;;  %v4364_v25 = vld [vmem:[%s5041_s28 + $0x20] sm:$0xff] }
 0x385   : > { %v4549_v52 = vpop.eup %4548  ;;  %v1915_v53 = vmul.f32 1.442695, %v1912_v51 }
 0x386   : > { %v1917_v54 = vsel %vm1829_vm7, %v4549_v52, 0.0 }
 0x387   : > { %4550 = vpow2.f32 %v1915_v53  ;;  %1918 = vadd.xlane.f32.xlu2 %v1917_v54 }
 0x38a   : > { %v2104_v55 = vpop.xlane.xlu2 %2103 }
 0x38b   : > { %v2108_v56 = vsub.f32 %v2100_v30, %v2104_v55  ;;  %v4363_v30 = vld [vmem:[%s5041_s28 + $0x18] sm:$0xff] }
 0x38d   : > { %v4551_v57 = vpop.eup %4550  ;;  %v2110_v58 = vmul.f32 1.442695, %v2108_v56 }
 0x38e   : > { %v1920_v59 = vsel %vm1829_vm7, %v4551_v57, 0.0 }
 0x38f   : > { %4552 = vpow2.f32 %v2110_v58  ;;  %1921 = vadd.xlane.f32.xlu0 %v1920_v59 }
 0x392   : > { %v2107_v60 = vpop.xlane.xlu2 %2106 }
 0x393   : > { %v2109_v61 = vsub.f32 %v2101_v34, %v2107_v60  ;;  %v4383_v34 = vld [vmem:[%s5041_s28 + $0xb8] sm:$0xff] }
 0x394   : > { %2197 = vmatpush.bf16.msrb.mxu2 %v4383_v34 }
 0x395   : > { %v4553_v62 = vpop.eup %4552  ;;  %v2112_v63 = vmul.f32 1.442695, %v2109_v61 }
 0x396   : > { %v2114_v0 = vsel %vm1829_vm7, %v4553_v62, 0.0 }
 0x397   : > { %4554 = vpow2.f32 %v2112_v63  ;;  %2115 = vadd.xlane.f32.xlu1 %v2114_v0 }
 0x398   : > { %2198 = vmatpush.bf16.msrb.mxu2 %v4382_v36  ;;  %v4602_v36 = vld [vmem:[#allocation2] sm:$0xff] }
 0x39c   : > { %2199 = vmatpush.bf16.msrb.mxu2 %v4381_v37 }
 0x39d   : > { %v4555_v1 = vpop.eup %4554 }
 0x39e   : > { %v2117_v2 = vsel %vm1829_vm7, %v4555_v1, 0.0 }
 0x39f   : > { %2118 = vadd.xlane.f32.xlu2 %v2117_v2 }
 0x3a0   : > { %2200 = vmatpush.bf16.msrb.mxu2 %v4380_v39 }
 0x3a4   : > { %2201 = vmatpush.bf16.msrb.mxu2 %v4379_v40 }
 0x3d4   : > { %v1844_v3 = vpop.xlane.xlu0 %1843 }
 0x3d5   : > { %4556 = vrcp.f32 %v1844_v3  ;;  %v4391_v3 = vld [vmem:[%s5041_s28 + $0xf8] sm:$0xff] }
 0x3db   : > { %v4557_v5 = vpop.eup %4556 }
 0x3dc   : > { %v1847_v4 = vpop.xlane.xlu1 %1846  ;;  %v1850_v8 = vmul.f32 %v4557_v5, %v4545_v28  ;;  %v4378_v28 = vld [vmem:[%s5041_s28 + $0x90] sm:$0xff]  ;;  %v4389_v5 = vld [vmem:[%s5041_s28 + $0xe8] sm:$0xff] }
 0x3dd   : > { %4558 = vrcp.f32 %v1847_v4  ;;  %2202 = vmatpush.bf16.msrb.mxu2 %v4378_v28  ;;  %v4390_v4 = vld [vmem:[%s5041_s28 + $0xf0] sm:$0xff] }
 0x3de   : > { %v4603_v28 = vld [vmem:[#allocation2 + $0x8] sm:$0xff] }
 0x3e1   : > { %2203 = vmatpush.bf16.msrb.mxu2 %v4377_v41 }
 0x3e3   : > { %v4559_v6 = vpop.eup %4558 }
 0x3e4   : > { %v1851_v9 = vmul.f32 %v4559_v6, %v4547_v43  ;;  %v4388_v6 = vld [vmem:[%s5041_s28 + $0xe0] sm:$0xff] }
 0x3e5   : > { %2204 = vmatpush.bf16.msrb.mxu2 %v4376_v42  ;;  %v4784_v42 = vmov 128.0  }
 0x3e6   : > { %v1852_v11 = vpack.c.bf16 %v1851_v9, %v1850_v8  ;;  %v4387_v8 = vld [vmem:[%s5041_s28 + $0xd8] sm:$0xff] }
 0x3e8   : > { %3837 = vmatmul.msk.bf16.vlgmr.msrb.gmra.mxu3 %vm1829_vm7, %v1852_v11 }
 0x3e9   : > { %2141 = vmatpush.bf16.msrb.mxu3 %v5330_v49  ;;  %v4366_v49 = vld [vmem:[%s5041_s28 + $0x30] sm:$0xff] }
 0x3ea   : > { %2061 = vmatpush.bf16.msrb.mxu1 %v4366_v49 }
 0x3ee   : > { %2062 = vmatpush.bf16.msrb.mxu1 %v4365_v23 }
 0x3f2   : > { %2063 = vmatpush.bf16.msrb.mxu1 %v4364_v25 }
 0x3f6   : > { %2064 = vmatpush.bf16.msrb.mxu1 %v4363_v30  ;;  %v4538_v30 = vld [vmem:[%s5722_s11] ss:$0 sm:$0xff] }
 0x3fa   : > { %v1919_v12 = vpop.xlane.xlu2 %1918  ;;  %2065 = vmatpush.bf16.msrb.mxu1 %v4362_v31 }
 0x3fb   : > { %4560 = vrcp.f32 %v1919_v12 }
 0x3fe   : > { %2066 = vmatpush.bf16.msrb.mxu1 %v4361_v32 }
 0x401   : > { %v4561_v14 = vpop.eup %4560 }
 0x402   : > { %v1922_v13 = vpop.xlane.xlu0 %1921  ;;  %v1925_v17 = vmul.f32 %v4561_v14, %v4549_v52  ;;  %2067 = vmatpush.bf16.msrb.mxu1 %v4360_v33 }
 0x403   : > { %4562 = vrcp.f32 %v1922_v13 }
 0x406   : > { %2334 = vmatpush.bf16.msra.mxu1 %v4391_v3  ;;  %v4093_v3 = vld [vmem:[%s5047_s17 + $0xf8] sm:$0xf0] }
 0x409   : > { %v4563_v16 = vpop.eup %4562 }
 0x40a   : > { %v1926_v18 = vmul.f32 %v4563_v16, %v4551_v57  ;;  %v2116_v20 = vpop.xlane.xlu1 %2115  ;;  %2335 = vmatpush.bf16.msra.mxu1 %v4390_v4 }
 0x40b   : > { %4564 = vrcp.f32 %v2116_v20  ;;  %v4384_v20 = vld [vmem:[%s5041_s28 + $0xc0] sm:$0xff] }
 0x40c   : > { %v1927_v19 = vpack.c.bf16 %v1926_v18, %v1925_v17  ;;  %v4386_v18 = vld [vmem:[%s5041_s28 + $0xd0] sm:$0xff] }
 0x40e   : > { %3838 = vmatmul.msk.bf16.vlgmr.msra.gmra.mxu3 %vm1829_vm7, %v1927_v19  ;;  %2336 = vmatpush.bf16.msra.mxu1 %v4389_v5  ;;  %v4385_v19 = vld [vmem:[%s5041_s28 + $0xc8] sm:$0xff]  ;;  %v4067_v5 = vld [vmem:[%s5047_s17 + $0xc0] sm:$0xf] }
 0x40f   : > { %2230 = vmatpush.bf16.xpose.msra.mxu3 %v5338_v7 }
 0x411   : > { %v4565_v24 = vpop.eup %4564 }
 0x412   : > { %v2119_v22 = vpop.xlane.xlu2 %2118  ;;  %v2122_v27 = vmul.f32 %v4565_v24, %v4553_v62  ;;  %2337 = vmatpush.bf16.msra.mxu1 %v4388_v6  ;;  %v4418_v6 = vld [vmem:[%s5047_s17 + $0xcc] sm:$0xf0] }
 0x413   : > { %4566 = vrcp.f32 %v2119_v22 }
 0x416   : > { %2338 = vmatpush.bf16.msra.mxu1 %v4387_v8  ;;  %v4416_v8 = vld [vmem:[%s5047_s17 + $0xc4] sm:$0xf] }
 0x419   : > { %v4567_v26 = vpop.eup %4566 }
 0x41a   : > { %v2123_v29 = vmul.f32 %v4567_v26, %v4555_v1  ;;  %2339 = vmatpush.bf16.msra.mxu1 %v4386_v18  ;;  %v4077_v18 = vld [vmem:[%s5047_s17 + $0xd8] sm:$0xf0] }
 0x41c   : > { %v2124_v7 = vpack.c.bf16 %v2123_v29, %v2122_v27 }
 0x41e   : > { %3903 = vmatmul.msk.bf16.vlgmr.msrb.gmra.mxu3 %vm1829_vm7, %v2124_v7  ;;  %2340 = vmatpush.bf16.msra.mxu1 %v4385_v19 }
 0x422   : > { %2341 = vmatpush.bf16.msra.mxu1 %v4384_v20  ;;  %v4051_v20 = vld [vmem:[%s5047_s17 + $0xa0] sm:$0xf] }
 0x42e   : > { %2231 = vmatmul.bf16.vlgmr.msra.gmra.mxu3 %v5332_v50 }
 0x46b   : > { %v1871_v35 = vpop.f32.mrf.mxu3 }
 0x473   : > { %v1873_v38 = vpop.f32.mrf.mxu3 }
 0x474   : > { %v1876_v50 = vpack.c.bf16 %v1873_v38, %v1871_v35 }
 0x476   : > { %2068 = vmatmul.bf16.vlgmr.msrb.gmra.mxu1 %v1876_v50 }
 0x491   : > { %v1944_v43 = vpop.f32.mrf.mxu3 }
 0x499   : > { %v1946_v44 = vpop.f32.mrf.mxu3 }
 0x49a   : > { %v1949_v45 = vpack.c.bf16 %v1946_v44, %v1944_v43 }
 0x49c   : > { %2006 = vmatmul.bf16.vlgmr.msra.gmra.mxu0 %v1949_v45 }
 0x4a1   : > { %v2143_v46 = vpop.f32.mrf.mxu3 }
 0x4a9   : > { %v2145_v47 = vpop.f32.mrf.mxu3 }
 0x4aa   : > { %v2148_v48 = vpack.c.bf16 %v2145_v47, %v2143_v46 }
 0x4ac   : > { %2205 = vmatmul.bf16.vlgmr.msrb.gmra.mxu2 %v2148_v48 }
 0x4b1   : > { %v2232_v51 = vpop.f32.mrf.mxu3 }
 0x4b2   : > { %v2237_v52 = vmul.f32 0.17677669, %v2232_v51 }
 0x4b4   : > { %v2239_v53 = vadd.f32 %v2237_v52, %v5343_v10 }
 0x4b6   : > { %v2241_v54 = vsel %vm1829_vm7, %v2239_v53, -inf }
 0x4b7   : > { %2242 = vmax.xlane.f32.xlu0 %v2241_v54 }
 0x4b9   : > { %v2234_v55 = vpop.f32.mrf.mxu3 }
 0x4ba   : > { %v2238_v56 = vmul.f32 0.17677669, %v2234_v55 }
 0x4bc   : > { %v2240_v57 = vadd.f32 %v2238_v56, %v5350_v15 }
 0x4be   : > { %v2244_v58 = vsel %vm1829_vm7, %v2240_v57, -inf }
 0x4bf   : > { %2245 = vmax.xlane.f32.xlu1 %v2244_v58 }
 0x4f3   : > { %v2069_v25 = vpop.f32.mrf.mxu1 }
 0x4fb   : > { %v2071_v26 = vpop.f32.mrf.mxu1 }
 0x519   : > { %v2007_v21 = vpop.f32.mrf.mxu0 }
 0x51a   : > { %v2070_v29 = vadd.f32 %v2069_v25, %v2007_v21  ;;  %v4414_v21 = vld [vmem:[%s5047_s17 + $0xac] sm:$0xf0]  ;;  %v4415_v25 = vld [vmem:[%s5047_s17 + $0xb4] sm:$0xf0] }
 0x521   : > { %v2009_v49 = vpop.f32.mrf.mxu0 }
 0x522   : > { %v2072_v35 = vadd.f32 %v2071_v26, %v2009_v49  ;;  %v4412_v49 = vld [vmem:[%s5047_s17 + $0xa4] sm:$0xf] }
 0x52a   : > { %v2243_v59 = vpop.xlane.xlu0 %2242 }
 0x52b   : > { %v2247_v60 = vsub.f32 %v2239_v53, %v2243_v59  ;;  %v4083_v59 = vld [vmem:[%s5047_s17 + $0xe0] sm:$0xf] }
 0x52d   : > { %v2249_v61 = vmul.f32 1.442695, %v2247_v60  ;;  %v4422_v60 = vld [vmem:[%s5047_s17 + $0xec] sm:$0xf0] }
 0x52f   : > { %4568 = vpow2.f32 %v2249_v61  ;;  %v2206_v27 = vpop.f32.mrf.mxu2  ;;  %v4420_v61 = vld [vmem:[%s5047_s17 + $0xe4] sm:$0xf] }
 0x530   : > { %v2211_v7 = vadd.f32 %v2206_v27, %v2070_v29  ;;  %v4413_v29 = vld [vmem:[%s5047_s17 + $0xac] sm:$0xf] }
 0x532   : > { %v2246_v62 = vpop.xlane.xlu1 %2245 }
 0x533   : > { %v2248_v10 = vsub.f32 %v2240_v57, %v2246_v62  ;;  %v4084_v62 = vor.u32 %v4422_v60, %v4083_v59  ;;  %v4402_v59 = vld [vmem:[%s5047_s17 + $0x4c] sm:$0xf0]  ;;  %v4400_v60 = vld [vmem:[%s5047_s17 + $0x44] sm:$0xf] }
 0x535   : > { %v4569_v63 = vpop.eup %4568  ;;  %v2251_v0 = vmul.f32 1.442695, %v2248_v10  ;;  %v4085_v10 = vld [vmem:[%s5047_s17 + $0xf0] sm:$0xf0]  ;;  %2620 = vmatpush.bf16.msrb.mxu3 %v4084_v62 }
 0x536   : > { %v2253_v1 = vsel %vm1829_vm7, %v4569_v63, 0.0  ;;  %v4005_v62 = vld [vmem:[%s5047_s17 + $0x50] sm:$0xf0] }
 0x537   : > { %4570 = vpow2.f32 %v2251_v0  ;;  %2254 = vadd.xlane.f32.xlu2 %v2253_v1  ;;  %v2208_v34 = vpop.f32.mrf.mxu2  ;;  %v4423_v0 = vld [vmem:[%s5047_s17 + $0xf4] sm:$0xf0]  ;;  %v4088_v1 = vor.u32 %v4420_v61, %v4085_v10  ;;  %v4011_v10 = vld [vmem:[%s5047_s17 + $0x48] sm:$0xf] }
 0x538   : > { %v2212_v38 = vadd.f32 %v2208_v34, %v2072_v35  ;;  %v4037_v35 = vld [vmem:[%s5047_s17 + $0x90] sm:$0xf0] }
 0x539   : > { %2634 = vmatpush.bf16.msra.mxu0 %v4088_v1 }
 0x53d   : > { %v4571_v15 = vpop.eup %4570 }
 0x53e   : > { %v2256_v2 = vsel %vm1829_vm7, %v4571_v15, 0.0 }
 0x53f   : > { %2257 = vadd.xlane.f32.xlu0 %v2256_v2  ;;  %v4421_v2 = vld [vmem:[%s5047_s17 + $0xec] sm:$0xf] }
 0x540   : > { %v4096_v4 = vor.u32 %v4421_v2, %v4093_v3  ;;  %v4013_v2 = vld [vmem:[%s5047_s17 + $0x58] sm:$0xf0] }
 0x542   : > { %2662 = vmatpush.bf16.msrb.mxu1 %v4096_v4  ;;  %v3987_v4 = vld [vmem:[%s5047_s17 + $0x20] sm:$0xf] }
 0x5aa   : > { %v2255_v9 = vpop.xlane.xlu2 %2254 }
 0x5ab   : > { %4572 = vrcp.f32 %v2255_v9  ;;  %v4068_v9 = vor.u32 %v4418_v6, %v4067_v5  ;;  %v4398_v5 = vld [vmem:[%s5047_s17 + $0x2c] sm:$0xf0]  ;;  %v4396_v6 = vld [vmem:[%s5047_s17 + $0x24] sm:$0xf] }
 0x5ad   : > { %2621 = vmatpush.bf16.msrb.mxu3 %v4068_v9  ;;  %v3989_v9 = vld [vmem:[%s5047_s17 + $0x30] sm:$0xf0] }
 0x5b1   : > { %v4573_v12 = vpop.eup %4572 }
 0x5b2   : > { %v2258_v11 = vpop.xlane.xlu0 %2257  ;;  %v2261_v14 = vmul.f32 %v4573_v12, %v4569_v63  ;;  %v4091_v63 = vld [vmem:[%s5047_s17 + $0xe8] sm:$0xf] }
 0x5b3   : > { %4574 = vrcp.f32 %v2258_v11  ;;  %v4069_v11 = vld [vmem:[%s5047_s17 + $0xd0] sm:$0xf0]  ;;  %v4075_v12 = vld [vmem:[%s5047_s17 + $0xc8] sm:$0xf] }
 0x5b4   : > { %4576 = vrcp.f32 %v4784_v42  ;;  %v4406_v42 = vld [vmem:[%s5047_s17 + $0x6c] sm:$0xf0] }
 0x5b9   : > { %v4575_v13 = vpop.eup %4574 }
 0x5ba   : > { %v2262_v16 = vmul.f32 %v4575_v13, %v4571_v15  ;;  %v4577_v43 = vpop.eup %4576  ;;  %v4092_v15 = vor.u32 %v4423_v0, %v4091_v63  ;;  %v4419_v13 = vld [vmem:[%s5047_s17 + $0xd4] sm:$0xf0]  ;;  %v4008_v0 = vor.u32 %v4400_v60, %v4005_v62  ;;  %v4438_v62 = vld [vmem:[%s5049_s2 + $0x70] sm:$0xff] }
 0x5bb   : > { %v2365_v44 = vmul.f32 128.0, %v4577_v43  ;;  %vm2369_vm8 = vweird.f32 %v4577_v43  ;;  %v4403_v63 = vld [vmem:[%s5047_s17 + $0x54] sm:$0xf0] }
 0x5bc   : > { %v2263_v17 = vpack.c.bf16 %v2262_v16, %v2261_v14  ;;  %2648 = vmatpush.bf16.msra.mxu2 %v4092_v15  ;;  %v4072_v14 = vor.u32 %v4416_v8, %v4069_v11  ;;  %v4076_v16 = vor.u32 %v4419_v13, %v4075_v12  ;;  %v4012_v1 = vor.u32 %v4403_v63, %v4011_v10  ;;  %v4401_v15 = vld [vmem:[%s5047_s17 + $0x4c] sm:$0xf]  ;;  %v3995_v11 = vld [vmem:[%s5047_s17 + $0x28] sm:$0xf]  ;;  %v4399_v12 = vld [vmem:[%s5047_s17 + $0x34] sm:$0xf0] }
 0x5bd   : > { %v2366_v45 = vsub.f32 1.0, %v2365_v44  ;;  %v4016_v3 = vor.u32 %v4401_v15, %v4013_v2  ;;  %v3988_v8 = vor.u32 %v4398_v5, %v3987_v4  ;;  %v4454_v10 = vld [vmem:[%s5049_s2 + $0xf0] sm:$0xff]  ;;  %v4431_v63 = vld [vmem:[%s5049_s2 + $0x38] sm:$0xff]  ;;  %v4453_v15 = vld [vmem:[%s5049_s2 + $0xe8] sm:$0xff] }
 0x5be   : > { %3936 = vmatmul.msk.bf16.vlgmr.msrb.gmra.mxu0 %vm1829_vm7, %v2263_v17  ;;  %v4417_v17 = vld [vmem:[%s5047_s17 + $0xcc] sm:$0xf]  ;;  %v4430_v2 = vld [vmem:[%s5049_s2 + $0x30] sm:$0xff]  ;;  %v4436_v4 = vld [vmem:[%s5049_s2 + $0x60] sm:$0xff] }
 0x5bf   : > { %v2367_v46 = vmul.f32 %v4577_v43, %v2366_v45  ;;  %v4080_v19 = vor.u32 %v4417_v17, %v4077_v18  ;;  %2635 = vmatpush.bf16.msra.mxu0 %v4072_v14  ;;  %v4021_v45 = vld [vmem:[%s5047_s17 + $0x70] sm:$0xf0]  ;;  %v3992_v14 = vor.u32 %v4396_v6, %v3989_v9  ;;  %v4397_v17 = vld [vmem:[%s5047_s17 + $0x2c] sm:$0xf]  ;;  %v3997_v18 = vld [vmem:[%s5047_s17 + $0x38] sm:$0xf0] }
 0x5c0   : > { %2649 = vmatpush.bf16.msra.mxu2 %v4076_v16  ;;  %v3996_v16 = vor.u32 %v4399_v12, %v3995_v11  ;;  %v4452_v5 = vld [vmem:[%s5049_s2 + $0xe0] sm:$0xff]  ;;  %v4429_v6 = vld [vmem:[%s5049_s2 + $0x28] sm:$0xff]  ;;  %v4435_v9 = vld [vmem:[%s5049_s2 + $0x58] sm:$0xff] }
 0x5c1   : > { %v2368_v47 = vadd.f32 %v4577_v43, %v2367_v46  ;;  %2663 = vmatpush.bf16.msrb.mxu1 %v4080_v19  ;;  %v4027_v46 = vld [vmem:[%s5047_s17 + $0x68] sm:$0xf]  ;;  %v3971_v19 = vld [vmem:[%s5047_s17] sm:$0xf]  ;;  %v4451_v11 = vld [vmem:[%s5049_s2 + $0xd8] sm:$0xff] }
 0x5c2   : > { %v4428_v12 = vld [vmem:[%s5049_s2 + $0x20] sm:$0xff] }
 0x5c3   : > { %v5410_v48 = vsel %vm2369_vm8, %v4577_v43, %v2368_v47  ;;  %v4404_v43 = vld [vmem:[%s5047_s17 + $0x64] sm:$0xf]  ;;  %v4407_v47 = vld [vmem:[%s5047_s17 + $0x74] sm:$0xf0] }
 0x63b   : > { %v2280_v22 = vpop.f32.mrf.mxu0 }
 0x643   : > { %v2282_v23 = vpop.f32.mrf.mxu0 }
 0x644   : > { %v2285_v24 = vpack.c.bf16 %v2282_v23, %v2280_v22  ;;  %v4052_v22 = vor.u32 %v4414_v21, %v4051_v20  ;;  %v4053_v23 = vld [vmem:[%s5047_s17 + $0xb0] sm:$0xf0]  ;;  %v4000_v21 = vor.u32 %v4397_v17, %v3997_v18  ;;  %v5527_v17 = vld [vmem:[%s5081_s10] sm:$0xf]  ;;  %v4427_v18 = vld [vmem:[%s5049_s2 + $0x18] sm:$0xff] }
 0x645   : > { %v4056_v26 = vor.u32 %v4412_v49, %v4053_v23  ;;  %v4394_v49 = vld [vmem:[%s5047_s17 + $0xc] sm:$0xf0]  ;;  %v3973_v23 = vld [vmem:[%s5047_s17 + $0x10] sm:$0xf0] }
 0x646   : > { %2342 = vmatmul.bf16.vlgmr.msra.gmra.mxu1 %v2285_v24  ;;  %v4059_v24 = vld [vmem:[%s5047_s17 + $0xa8] sm:$0xf]  ;;  %2622 = vmatpush.bf16.msrb.mxu3 %v4052_v22  ;;  %v4392_v22 = vld [vmem:[%s5047_s17 + $0x4] sm:$0xf] }
 0x647   : > { %v4060_v27 = vor.u32 %v4415_v25, %v4059_v24  ;;  %2636 = vmatpush.bf16.msra.mxu0 %v4056_v26  ;;  %v3972_v24 = vor.u32 %v4394_v49, %v3971_v19  ;;  %v3976_v25 = vor.u32 %v4392_v22, %v3973_v23  ;;  %v3979_v26 = vld [vmem:[%s5047_s17 + $0x8] sm:$0xf]  ;;  %v4443_v19 = vld [vmem:[%s5049_s2 + $0x98] sm:$0xff]  ;;  %v2453_v49 = vperm.slane %v5527_v17, 1  ;;  %v4426_v23 = vld [vmem:[%s5049_s2 + $0x10] sm:$0xff] }
 0x648   : > { %v2455_v22 = vperm.slane %v5527_v17, 3 }
 0x649   : > { %2650 = vmatpush.bf16.msra.mxu2 %v4060_v27  ;;  %v4395_v27 = vld [vmem:[%s5047_s17 + $0x14] sm:$0xf0] }
 0x6c3   : > { %v2343_v31 = vpop.f32.mrf.mxu1 }
 0x6c4   : > { %v2348_v32 = vadd.f32 %v2343_v31, %v2211_v7  ;;  %v4061_v7 = vld [vmem:[%s5047_s17 + $0xb8] sm:$0xf0]  ;;  %v4035_v31 = vld [vmem:[%s5047_s17 + $0x80] sm:$0xf] }
 0x6c6   : > { %v2354_v33 = vadd.f32 %v4538_v30, %v2348_v32  ;;  %v4410_v32 = vld [vmem:[%s5047_s17 + $0x8c] sm:$0xf0] }
 0x6c7   : > { %v4036_v34 = vor.u32 %v4410_v32, %v4035_v31  ;;  %v3981_v31 = vld [vmem:[%s5047_s17 + $0x18] sm:$0xf0] }
 0x6c8   : > { %v2356_v37 = vadd.f32 %v4602_v36, %v2354_v33  ;;  %v4408_v33 = vld [vmem:[%s5047_s17 + $0x84] sm:$0xf]  ;;  %v4043_v36 = vld [vmem:[%s5047_s17 + $0x88] sm:$0xf] }
 0x6c9   : > { %2623 = vmatpush.bf16.msrb.mxu3 %v4036_v34 }
 0x6ca   : > { %2360 = vadd.xlane.f32.xlu1 %v2356_v37 }
 0x6cb   : > { %v2345_v50 = vpop.f32.mrf.mxu1 }
 0x6cc   : > { %v2349_v39 = vadd.f32 %v2345_v50, %v2212_v38  ;;  %v4040_v38 = vor.u32 %v4408_v33, %v4037_v35 }
 0x6ce   : > { %v2355_v40 = vadd.f32 %v4538_v30, %v2349_v39  ;;  %v4064_v30 = vor.u32 %v4413_v29, %v4061_v7  ;;  %v4409_v39 = vld [vmem:[%s5047_s17 + $0x8c] sm:$0xf]  ;;  %2637 = vmatpush.bf16.msra.mxu0 %v4040_v38 }
 0x6cf   : > { %v4393_v29 = vld [vmem:[%s5047_s17 + $0xc] sm:$0xf] }
 0x6d0   : > { %v2357_v41 = vadd.f32 %v4603_v28, %v2355_v40  ;;  %2664 = vmatpush.bf16.msrb.mxu1 %v4064_v30  ;;  %v4045_v40 = vld [vmem:[%s5047_s17 + $0x98] sm:$0xf0]  ;;  %v3980_v30 = vor.u32 %v4395_v27, %v3979_v26  ;;  %v3984_v32 = vor.u32 %v4393_v29, %v3981_v31  ;;  %v4432_v26 = vld [vmem:[%s5049_s2 + $0x40] sm:$0xff]  ;;  %v4425_v31 = vld [vmem:[%s5049_s2 + $0x8] sm:$0xff] }
 0x6d1   : > { %v4048_v28 = vor.u32 %v4409_v39, %v4045_v40  ;;  %v4448_v27 = vld [vmem:[%s5049_s2 + $0xc0] sm:$0xff] }
 0x6d2   : > { %2362 = vadd.xlane.f32.xlu2 %v2357_v41 }
 0x6d4   : > { %2665 = vmatpush.bf16.msrb.mxu1 %v4048_v28 }
 0x73d   : > { %v2361_v51 = vpop.xlane.xlu1 %2360 }
 0x73e   : > { %v2371_v52 = vmul.f32 %v5410_v48, %v2361_v51  ;;  %v4024_v51 = vor.u32 %v4404_v43, %v4021_v45 }
 0x740   : > { %v5413_v53 = vsub.f32 %v2356_v37, %v2371_v52  ;;  %v4411_v37 = vld [vmem:[%s5047_s17 + $0x94] sm:$0xf0]  ;;  %v4028_v52 = vor.u32 %v4407_v47, %v4027_v46  ;;  %2638 = vmatpush.bf16.msra.mxu0 %v4024_v51  ;;  %v4539_v47 = vld [vmem:[%s5723_s30] ss:$0 sm:$0xff] }
 0x741   : > { %v4044_v50 = vor.u32 %v4411_v37, %v4043_v36 }
 0x742   : > { %v2375_v54 = vmul.f32 %v5413_v53, %v5413_v53 }
 0x743   : > { %2651 = vmatpush.bf16.msra.mxu2 %v4044_v50 }
 0x744   : > { %2377 = vadd.xlane.f32.xlu0 %v2375_v54  ;;  %v4405_v54 = vld [vmem:[%s5047_s17 + $0x6c] sm:$0xf]  ;;  %2639 = vmatpush.bf16.msra.mxu0 %v4008_v0  ;;  %v4447_v0 = vld [vmem:[%s5049_s2 + $0xb8] sm:$0xff] }
 0x745   : > { %v2363_v55 = vpop.xlane.xlu2 %2362 }
 0x746   : > { %v2372_v56 = vmul.f32 %v5410_v48, %v2363_v55  ;;  %v4029_v55 = vld [vmem:[%s5047_s17 + $0x78] sm:$0xf0] }
 0x747   : > { %2652 = vmatpush.bf16.msra.mxu2 %v4028_v52 }
 0x748   : > { %v5418_v57 = vsub.f32 %v2357_v41, %v2372_v56  ;;  %v4019_v41 = vld [vmem:[%s5047_s17 + $0x60] sm:$0xf]  ;;  %v4032_v56 = vor.u32 %v4405_v54, %v4029_v55  ;;  %2640 = vmatpush.bf16.msra.mxu0 %v3992_v14  ;;  %v4434_v14 = vld [vmem:[%s5049_s2 + $0x50] sm:$0xff] }
 0x749   : > { %v4020_v44 = vor.u32 %v4406_v42, %v4019_v41 }
 0x74a   : > { %v2376_v58 = vmul.f32 %v5418_v57, %v5418_v57  ;;  %2666 = vmatpush.bf16.msrb.mxu1 %v4032_v56 }
 0x74b   : > { %2624 = vmatpush.bf16.msrb.mxu3 %v4020_v44  ;;  %2653 = vmatpush.bf16.msra.mxu2 %v4012_v1  ;;  %v4437_v1 = vld [vmem:[%s5049_s2 + $0x68] sm:$0xff] }
 0x74c   : > { %2379 = vadd.xlane.f32.xlu1 %v2376_v58  ;;  %v4003_v58 = vld [vmem:[%s5047_s17 + $0x40] sm:$0xf]  ;;  %2641 = vmatpush.bf16.msra.mxu0 %v3976_v25 }
 0x74d   : > { %v4004_v61 = vor.u32 %v4402_v59, %v4003_v58 }
 0x74e   : > { %2667 = vmatpush.bf16.msrb.mxu1 %v4016_v3  ;;  %v4446_v3 = vld [vmem:[%s5049_s2 + $0xb0] sm:$0xff] }
 0x74f   : > { %2625 = vmatpush.bf16.msrb.mxu3 %v4004_v61  ;;  %2654 = vmatpush.bf16.msra.mxu2 %v3996_v16  ;;  %v4455_v61 = vld [vmem:[%s5049_s2 + $0xf8] sm:$0xff]  ;;  %v4450_v16 = vld [vmem:[%s5049_s2 + $0xd0] sm:$0xff] }
 0x752   : > { %2668 = vmatpush.bf16.msrb.mxu1 %v4000_v21  ;;  %v4449_v21 = vld [vmem:[%s5049_s2 + $0xc8] sm:$0xff] }
 0x753   : > { %2626 = vmatpush.bf16.msrb.mxu3 %v3988_v8  ;;  %2655 = vmatpush.bf16.msra.mxu2 %v3980_v30  ;;  %v4445_v8 = vld [vmem:[%s5049_s2 + $0xa8] sm:$0xff] }
 0x756   : > { %2669 = vmatpush.bf16.msrb.mxu1 %v3984_v32  ;;  %v4441_v32 = vld [vmem:[%s5049_s2 + $0x88] sm:$0xff] }
 0x757   : > { %2627 = vmatpush.bf16.msrb.mxu3 %v3972_v24  ;;  %3040 = vmatpush.bf16.msrb.mxu2 %v4447_v0  ;;  %v4442_v24 = vld [vmem:[%s5049_s2 + $0x90] sm:$0xff] }
 0x75a   : > { %3054 = vmatpush.bf16.msra.mxu1 %v4455_v61 }
 0x75b   : > { %3012 = vmatpush.bf16.msra.mxu3 %v4431_v63  ;;  %3041 = vmatpush.bf16.msrb.mxu2 %v4446_v3 }
 0x75e   : > { %3055 = vmatpush.bf16.msra.mxu1 %v4454_v10 }
 0x75f   : > { %3013 = vmatpush.bf16.msra.mxu3 %v4430_v2  ;;  %3042 = vmatpush.bf16.msrb.mxu2 %v4445_v8 }
 0x762   : > { %3056 = vmatpush.bf16.msra.mxu1 %v4453_v15 }
 0x763   : > { %3014 = vmatpush.bf16.msra.mxu3 %v4429_v6 }
 0x766   : > { %3057 = vmatpush.bf16.msra.mxu1 %v4452_v5 }
 0x767   : > { %3015 = vmatpush.bf16.msra.mxu3 %v4428_v12 }
 0x76a   : > { %3058 = vmatpush.bf16.msra.mxu1 %v4451_v11 }
 0x76b   : > { %3016 = vmatpush.bf16.msra.mxu3 %v4427_v18 }
 0x76e   : > { %3059 = vmatpush.bf16.msra.mxu1 %v4450_v16 }
 0x76f   : > { %3017 = vmatpush.bf16.msra.mxu3 %v4426_v23 }
 0x772   : > { %3060 = vmatpush.bf16.msra.mxu1 %v4449_v21 }
 0x773   : > { %3018 = vmatpush.bf16.msra.mxu3 %v4425_v31 }
 0x776   : > { %3061 = vmatpush.bf16.msra.mxu1 %v4448_v27 }
 0x7b7   : > { %v2378_v13 = vpop.xlane.xlu0 %2377 }
 0x7b8   : > { %v2381_v20 = vmul.f32 %v2378_v13, %v5410_v48  ;;  %v4444_v13 = vld [vmem:[%s5049_s2 + $0xa0] sm:$0xff] }
 0x7b9   : > { %3043 = vmatpush.bf16.msrb.mxu2 %v4444_v13 }
 0x7ba   : > { %v2383_v7 = vadd.f32 1e-12, %v2381_v20  ;;  %v4433_v20 = vld [vmem:[%s5049_s2 + $0x48] sm:$0xff] }
 0x7bc   : > { %4578 = vrsqrt.f32 %v2383_v7  ;;  %vm2391_vm10 = vweird.f32 %v2383_v7 }
 0x7bd   : > { %3044 = vmatpush.bf16.msrb.mxu2 %v4443_v19 }
 0x7bf   : > { %v2380_v33 = vpop.xlane.xlu1 %2379 }
 0x7c0   : > { %v2382_v34 = vmul.f32 %v2380_v33, %v5410_v48 }
 0x7c1   : > { %3045 = vmatpush.bf16.msrb.mxu2 %v4442_v24 }
 0x7c2   : > { %v4579_v35 = vpop.eup %4578  ;;  %v2384_v36 = vadd.f32 1e-12, %v2382_v34  ;;  %v2452_v34 = vperm.slane %v5527_v17, 0 }
 0x7c3   : > { %v2386_v37 = vmul.f32 %v4579_v35, %v2383_v7  ;;  %vm2392_vm9 = vweird.f32 %v4579_v35 }
 0x7c4   : > { %4580 = vrsqrt.f32 %v2384_v36  ;;  %vm2393_vm11 = vmor %vm2391_vm10, %vm2392_vm9  ;;  %vm2401_vm13 = vweird.f32 %v2384_v36 }
 0x7c5   : > { %v2387_v38 = vmul.f32 %v4579_v35, %v2386_v37  ;;  %3046 = vmatpush.bf16.msrb.mxu2 %v4441_v32 }
 0x7c7   : > { %v2388_v50 = vmul.f32 0.5, %v2387_v38 }
 0x7c9   : > { %v2389_v39 = vsub.f32 1.5, %v2388_v50 }
 0x7ca   : > { %v4581_v40 = vpop.eup %4580 }
 0x7cb   : > { %v2390_v28 = vmul.f32 %v4579_v35, %v2389_v39  ;;  %v2396_v41 = vmul.f32 %v4581_v40, %v2384_v36  ;;  %vm2402_vm12 = vweird.f32 %v4581_v40  ;;  %v2454_v36 = vperm.slane %v5527_v17, 2  ;;  %v4424_v39 = vld [vmem:[%s5049_s2] sm:$0xff] }
 0x7cc   : > { %vm2403_vm14 = vmor %vm2401_vm13, %vm2402_vm12  ;;  %3019 = vmatpush.bf16.msra.mxu3 %v4424_v39 }
 0x7cd   : > { %v2397_v42 = vmul.f32 %v4581_v40, %v2396_v41  ;;  %v2394_v43 = vsel %vm2393_vm11, %v4579_v35, %v2390_v28 }
 0x7ce   : > { %v2405_v46 = vmul.f32 %v2394_v43, %v5413_v53  ;;  %v4540_v53 = vld [vmem:[%s5724_s26] ss:$0 sm:$0xff] }
 0x7cf   : > { %v2398_v44 = vmul.f32 0.5, %v2397_v42 }
 0x7d0   : > { %v2410_v55 = vmul.f32 %v4539_v47, %v2405_v46 }
 0x7d1   : > { %v2399_v45 = vsub.f32 1.5, %v2398_v44 }
 0x7d2   : > { %v5500_v58 = vadd.f32 %v4540_v53, %v2410_v55 }
 0x7d3   : > { %v2400_v51 = vmul.f32 %v4581_v40, %v2399_v45 }
 0x7d5   : > { %v2404_v52 = vsel %vm2403_vm14, %v4581_v40, %v2400_v51  ;;  %v4440_v40 = vld [vmem:[%s5049_s2 + $0x80] sm:$0xff] }
 0x7d6   : > { %v2406_v54 = vmul.f32 %v2404_v52, %v5418_v57  ;;  %v4439_v57 = vld [vmem:[%s5049_s2 + $0x78] sm:$0xff]  ;;  %3047 = vmatpush.bf16.msrb.mxu2 %v4440_v40 }
 0x7d7   : > { %3026 = vmatpush.bf16.msrb.mxu0 %v4439_v57 }
 0x7d8   : > { %v2411_v56 = vmul.f32 %v4539_v47, %v2406_v54 }
 0x7da   : > { %v5502_v59 = vadd.f32 %v4540_v53, %v2411_v56 }
 0x7db   : > { %3027 = vmatpush.bf16.msrb.mxu0 %v4438_v62 }
 0x7dc   : > { %v2417_v60 = vpack.c.bf16 %v5502_v59, %v5500_v58 }
 0x7de   : > { %2628 = vmatmul.bf16.vlgmr.msrb.gmra.mxu3 %v2417_v60  ;;  %2642 = vmatmul.bf16.vlgmr.msra.gmra.mxu0 %v2417_v60 }
 0x7df   : > { %2656 = vmatmul.bf16.vlgmr.msra.gmra.mxu2 %v2417_v60  ;;  %2670 = vmatmul.bf16.vlgmr.msrb.gmra.mxu1 %v2417_v60 }
 0x7e0   : > { %3028 = vmatpush.bf16.msrb.mxu0 %v4437_v1 }
 0x7e4   : > { %3029 = vmatpush.bf16.msrb.mxu0 %v4436_v4 }
 0x7e8   : > { %3030 = vmatpush.bf16.msrb.mxu0 %v4435_v9 }
 0x7ec   : > { %3031 = vmatpush.bf16.msrb.mxu0 %v4434_v14 }
 0x7f0   : > { %3032 = vmatpush.bf16.msrb.mxu0 %v4433_v20 }
 0x7f4   : > { %3033 = vmatpush.bf16.msrb.mxu0 %v4432_v26 }
 0x85b   : > { %v2643_v25 = vpop.f32.mrf.mxu0 }
 0x85c   : > { %v5539_v29 = vadd.f32 %v2643_v25, %v2453_v49  ;;  %v2671_v7 = vpop.f32.mrf.mxu1 }
 0x85d   : > { %v5541_v30 = vadd.f32 %v2671_v7, %v2455_v22 }
 0x85e   : > { %v2677_v33 = vmul.f32 %v5539_v29, %v5539_v29 }
 0x85f   : > { %v2679_v35 = vmul.f32 %v5541_v30, %v5541_v30 }
 0x860   : > { %v2685_v37 = vmul.f32 %v2677_v33, %v5539_v29 }
 0x861   : > { %v2687_v38 = vmul.f32 %v2679_v35, %v5541_v30  ;;  %v2629_v50 = vpop.f32.mrf.mxu3 }
 0x862   : > { %v2693_v28 = vmul.f32 0.044715, %v2685_v37  ;;  %v5555_v41 = vadd.f32 %v2629_v50, %v2452_v34  ;;  %v2657_v42 = vpop.f32.mrf.mxu2 }
 0x863   : > { %v2695_v43 = vmul.f32 0.044715, %v2687_v38  ;;  %v5557_v44 = vadd.f32 %v2657_v42, %v2454_v36  ;;  %v2645_v45 = vpop.f32.mrf.mxu0 }
 0x864   : > { %v2701_v46 = vadd.f32 %v2693_v28, %v5539_v29  ;;  %v2676_v47 = vmul.f32 %v5555_v41, %v5555_v41  ;;  %v5562_v51 = vadd.f32 %v2645_v45, %v2453_v49  ;;  %v2673_v52 = vpop.f32.mrf.mxu1 }
 0x865   : > { %v2703_v54 = vadd.f32 %v2695_v43, %v5541_v30  ;;  %v2678_v55 = vmul.f32 %v5557_v44, %v5557_v44  ;;  %v5567_v53 = vadd.f32 %v2673_v52, %v2455_v22 }
 0x866   : > { %v2709_v56 = vmul.f32 0.7978846, %v2701_v46  ;;  %v2684_v60 = vmul.f32 %v2676_v47, %v5555_v41  ;;  %v2681_v57 = vmul.f32 %v5562_v51, %v5562_v51 }
 0x867   : > { %v2711_v61 = vmul.f32 0.7978846, %v2703_v54  ;;  %v2686_v62 = vmul.f32 %v2678_v55, %v5557_v44  ;;  %v2683_v10 = vmul.f32 %v5567_v53, %v5567_v53 }
 0x868   : > { %v2692_v63 = vmul.f32 0.044715, %v2684_v60  ;;  %v2689_v0 = vmul.f32 %v2681_v57, %v5562_v51  ;;  %4582 = vtanh.f32 %v2709_v56 }
 0x869   : > { %v2694_v1 = vmul.f32 0.044715, %v2686_v62  ;;  %v2691_v15 = vmul.f32 %v2683_v10, %v5567_v53  ;;  %v2631_v2 = vpop.f32.mrf.mxu3  ;;  %4584 = vtanh.f32 %v2711_v61 }
 0x86a   : > { %v2700_v3 = vadd.f32 %v2692_v63, %v5555_v41  ;;  %v2697_v4 = vmul.f32 0.044715, %v2689_v0  ;;  %v2632_v5 = vadd.f32 %v2631_v2, %v2452_v34  ;;  %v2659_v6 = vpop.f32.mrf.mxu2 }
 0x86b   : > { %v2702_v8 = vadd.f32 %v2694_v1, %v5557_v44  ;;  %v2699_v9 = vmul.f32 0.044715, %v2691_v15  ;;  %v2660_v11 = vadd.f32 %v2659_v6, %v2454_v36 }
 0x86c   : > { %v2708_v12 = vmul.f32 0.7978846, %v2700_v3  ;;  %v2705_v13 = vadd.f32 %v2697_v4, %v5562_v51  ;;  %v2680_v14 = vmul.f32 %v2632_v5, %v2632_v5  ;;  %v4541_v3 = vld [vmem:[%s873_s4] ss:$0 sm:$0xff] }
 0x86d   : > { %v2710_v16 = vmul.f32 0.7978846, %v2702_v8  ;;  %v2707_v17 = vadd.f32 %v2699_v9, %v5567_v53  ;;  %v2682_v18 = vmul.f32 %v2660_v11, %v2660_v11 }
 0x86e   : > { %4586 = vtanh.f32 %v2708_v12  ;;  %v2713_v19 = vmul.f32 0.7978846, %v2705_v13  ;;  %v2688_v20 = vmul.f32 %v2680_v14, %v2632_v5  ;;  %v4583_v22 = vpop.eup %4582 }
 0x86f   : > { %4588 = vtanh.f32 %v2710_v16  ;;  %v2715_v21 = vmul.f32 0.7978846, %v2707_v17  ;;  %v2690_v49 = vmul.f32 %v2682_v18, %v2660_v11  ;;  %v4585_v24 = vpop.eup %4584  ;;  %v2725_v27 = vadd.f32 1.0, %v4583_v22 }
 0x870   : > { %4590 = vtanh.f32 %v2713_v19  ;;  %v2696_v23 = vmul.f32 0.044715, %v2688_v20  ;;  %v2727_v32 = vadd.f32 1.0, %v4585_v24 }
 0x871   : > { %4592 = vtanh.f32 %v2715_v21  ;;  %v2698_v25 = vmul.f32 0.044715, %v2690_v49  ;;  %v2733_v38 = vmul.f32 0.5, %v2725_v27 }
 0x872   : > { %v2704_v26 = vadd.f32 %v2696_v23, %v2632_v5  ;;  %v2735_v39 = vmul.f32 0.5, %v2727_v32 }
 0x873   : > { %v2706_v7 = vadd.f32 %v2698_v25, %v2660_v11  ;;  %v2741_v46 = vmul.f32 %v2733_v38, %v5539_v29 }
 0x874   : > { %v4587_v31 = vpop.eup %4586  ;;  %v2712_v33 = vmul.f32 0.7978846, %v2704_v26  ;;  %v2743_v54 = vmul.f32 %v2735_v39, %v5541_v30 }
 0x875   : > { %v4589_v34 = vpop.eup %4588  ;;  %v2714_v35 = vmul.f32 0.7978846, %v2706_v7  ;;  %v2724_v28 = vadd.f32 1.0, %v4587_v31 }
 0x876   : > { %v4591_v36 = vpop.eup %4590  ;;  %4594 = vtanh.f32 %v2712_v33  ;;  %v2726_v43 = vadd.f32 1.0, %v4589_v34 }
 0x877   : > { %v4593_v37 = vpop.eup %4592  ;;  %v2729_v50 = vadd.f32 1.0, %v4591_v36  ;;  %4596 = vtanh.f32 %v2714_v35  ;;  %v2732_v60 = vmul.f32 0.5, %v2724_v28 }
 0x878   : > { %v2731_v40 = vadd.f32 1.0, %v4593_v37  ;;  %v2734_v62 = vmul.f32 0.5, %v2726_v43  ;;  %v4542_v43 = vld [vmem:[%s876_s1] ss:$0 sm:$0xff]  ;;  %s5731_s1 = sld [smem:[#allocation32_spill]] (!%p4225_p10) }
 0x879   : > { %v2737_v42 = vmul.f32 0.5, %v2729_v50  ;;  %v2740_v29 = vmul.f32 %v2732_v60, %v5555_v41 }
 0x87a   : > { %v2739_v45 = vmul.f32 0.5, %v2731_v40  ;;  %v2742_v15 = vmul.f32 %v2734_v62, %v5557_v44 }
 0x87b   : > { %v2745_v47 = vmul.f32 %v2737_v42, %v5562_v51 }
 0x87c   : > { %v4595_v52 = vpop.eup %4594  ;;  %v2747_v55 = vmul.f32 %v2739_v45, %v5567_v53 }
 0x87d   : > { %v4597_v56 = vpop.eup %4596  ;;  %v2728_v57 = vadd.f32 1.0, %v4595_v52  ;;  %v2749_v61 = vpack.c.bf16 %v2745_v47, %v2741_v46  ;;  %v4543_v46 = vld [vmem:[%s879_s15] ss:$0 sm:$0xff]  ;;  %s5728_s15 = sld [smem:[#allocation29_spill]] (!%p4225_p10) }
 0x87e   : > { %v2730_v10 = vadd.f32 1.0, %v4597_v56  ;;  %v2751_v63 = vpack.c.bf16 %v2747_v55, %v2743_v54 }
 0x87f   : > { %v2736_v0 = vmul.f32 0.5, %v2728_v57  ;;  %3034 = vmatmul.bf16.vlgmr.msrb.gmra.mxu0 %v2749_v61 }
 0x880   : > { %v2738_v1 = vmul.f32 0.5, %v2730_v10  ;;  %3062 = vmatmul.bf16.vlgmr.msra.gmra.mxu1 %v2751_v63 }
 0x881   : > { %v2744_v51 = vmul.f32 %v2736_v0, %v2632_v5 }
 0x882   : > { %v2746_v30 = vmul.f32 %v2738_v1, %v2660_v11 }
 0x883   : > { %v2748_v2 = vpack.c.bf16 %v2744_v51, %v2740_v29 }
 0x884   : > { %v2750_v53 = vpack.c.bf16 %v2746_v30, %v2742_v15 }
 0x885   : > { %3020 = vmatmul.bf16.vlgmr.msra.gmra.mxu3 %v2748_v2 }
 0x886   : > { %3048 = vmatmul.bf16.vlgmr.msrb.gmra.mxu2 %v2750_v53 }
 0x8fc   : > { %v3035_v4 = vpop.f32.mrf.mxu0 }
 0x8fd   : > { %v3063_v13 = vpop.f32.mrf.mxu1 }
 0x904   : > { %v3037_v16 = vpop.f32.mrf.mxu0 }
 0x905   : > { %v3065_v20 = vpop.f32.mrf.mxu1 }
 0x908   : > { %v3021_v6 = vpop.f32.mrf.mxu3 }
 0x909   : > { %v3022_v8 = vadd.f32 %v4541_v3, %v3021_v6  ;;  %v3049_v9 = vpop.f32.mrf.mxu2 }
 0x90b   : > { %v3036_v12 = vadd.f32 %v3035_v4, %v3022_v8 }
 0x90d   : > { %v3050_v41 = vadd.f32 %v3049_v9, %v3036_v12 }
 0x90f   : > { %v3064_v5 = vadd.f32 %v3063_v13, %v3050_v41 }
 0x910   : > { %v3023_v14 = vpop.f32.mrf.mxu3 }
 0x911   : > { %v3024_v44 = vadd.f32 %v4541_v3, %v3023_v14  ;;  %v3068_v11 = vadd.f32 %v3064_v5, %v5500_v58  ;;  %v3051_v18 = vpop.f32.mrf.mxu2 }
 0x913   : > { %v3038_v17 = vadd.f32 %v3037_v16, %v3024_v44  ;;  %3072 = vadd.xlane.f32.xlu2 %v3068_v11 }
 0x915   : > { %v3052_v19 = vadd.f32 %v3051_v18, %v3038_v17 }
 0x917   : > { %v3066_v21 = vadd.f32 %v3065_v20, %v3052_v19 }
 0x919   : > { %v3069_v49 = vadd.f32 %v3066_v21, %v5502_v59 }
 0x91b   : > { %3074 = vadd.xlane.f32.xlu0 %v3069_v49 }
 0x986   : > { %v3073_v22 = vpop.xlane.xlu2 %3072 }
 0x987   : > { %v3076_v23 = vmul.f32 %v3073_v22, %v5410_v48 }
 0x989   : > { %v3078_v24 = vsub.f32 %v3068_v11, %v3076_v23 }
 0x98b   : > { %v3080_v25 = vmul.f32 %v3078_v24, %v3078_v24 }
 0x98d   : > { %3082 = vadd.xlane.f32.xlu1 %v3080_v25 }
 0x98e   : > { %v3075_v26 = vpop.xlane.xlu0 %3074 }
 0x98f   : > { %v3077_v27 = vmul.f32 %v3075_v26, %v5410_v48 }
 0x991   : > { %v3079_v58 = vsub.f32 %v3069_v49, %v3077_v27 }
 0x993   : > { %v3081_v7 = vmul.f32 %v3079_v58, %v3079_v58 }
 0x995   : > { %3084 = vadd.xlane.f32.xlu2 %v3081_v7 }
 0xa00   : > { %v3083_v31 = vpop.xlane.xlu1 %3082 }
 0xa01   : > { %v3086_v32 = vmul.f32 %v3083_v31, %v5410_v48 }
 0xa03   : > { %v3088_v33 = vadd.f32 1e-12, %v3086_v32 }
 0xa05   : > { %4598 = vrsqrt.f32 %v3088_v33  ;;  %vm3096_vm0 = vweird.f32 %v3088_v33 }
 0xa08   : > { %v3085_v59 = vpop.xlane.xlu2 %3084 }
 0xa09   : > { %v3087_v34 = vmul.f32 %v3085_v59, %v5410_v48 }
 0xa0b   : > { %v4599_v35 = vpop.eup %4598  ;;  %v3089_v36 = vadd.f32 1e-12, %v3087_v34 }
 0xa0c   : > { %v3091_v37 = vmul.f32 %v4599_v35, %v3088_v33  ;;  %vm3097_vm15 = vweird.f32 %v4599_v35 }
 0xa0d   : > { %4600 = vrsqrt.f32 %v3089_v36  ;;  %vm3098_vm1 = vmor %vm3096_vm0, %vm3097_vm15  ;;  %vm3106_vm3 = vweird.f32 %v3089_v36 }
 0xa0e   : > { %v3092_v38 = vmul.f32 %v4599_v35, %v3091_v37 }
 0xa10   : > { %v3093_v50 = vmul.f32 0.5, %v3092_v38 }
 0xa12   : > { %v3094_v39 = vsub.f32 1.5, %v3093_v50 }
 0xa13   : > { %v4601_v40 = vpop.eup %4600 }
 0xa14   : > { %v3095_v28 = vmul.f32 %v4599_v35, %v3094_v39  ;;  %v3101_v42 = vmul.f32 %v4601_v40, %v3089_v36  ;;  %vm3107_vm2 = vweird.f32 %v4601_v40 }
 0xa15   : > { %vm3108_vm4 = vmor %vm3106_vm3, %vm3107_vm2 }
 0xa16   : > { %v3099_v48 = vsel %vm3098_vm1, %v4599_v35, %v3095_v28  ;;  %v3102_v45 = vmul.f32 %v4601_v40, %v3101_v42 }
 0xa17   : > { %v3110_v47 = vmul.f32 %v3099_v48, %v3078_v24 }
 0xa18   : > { %v3103_v52 = vmul.f32 0.5, %v3102_v45 }
 0xa19   : > { %v3115_v54 = vmul.f32 %v4542_v43, %v3110_v47 }
 0xa1a   : > { %v3104_v55 = vsub.f32 1.5, %v3103_v52 }
 0xa1b   : > { %v3120_v56 = vadd.f32 %v4543_v46, %v3115_v54 }
 0xa1c   : > { %v3105_v60 = vmul.f32 %v4601_v40, %v3104_v55 }
 0xa1d   : > { %3122 = vst [vmem:[#allocation2] sm:$0xff] %v3120_v56 }
 0xa1e   : > { %v3109_v57 = vsel %vm3108_vm4, %v4601_v40, %v3105_v60 }
 0xa1f   : > { %v3111_v61 = vmul.f32 %v3109_v57, %v3079_v58 }
 0xa21   : > { %v3116_v62 = vmul.f32 %v4542_v43, %v3111_v61  ;;  %3127 = sbr.rel (%p4225_p10) target bundleno = 2915 (0xb63), region = 124 }
 0xa23   : > { %v3121_v10 = vadd.f32 %v4543_v46, %v3116_v62 }
 0xa25   : > { %3123 = vst [vmem:[#allocation2 + $0x8] sm:$0xff] %v3121_v10 }
 0xa26   : > { %v4463_v63 = vld [vmem:[%s5728_s15 + $0x38] sm:$0xff]  ;;  %v4462_v0 = vld [vmem:[%s5728_s15 + $0x30] sm:$0xff]  ;;  %v4461_v1 = vld [vmem:[%s5728_s15 + $0x28] sm:$0xff]  ;;  %v3129_v2 = vrot.slane %v3121_v10, 7  ;;  %vm3131_vm5 = vcmask 1040384   ;;  %vm3221_vm6 = vcmask 1041408  }
 0xa27   : > { %3202 = vmatpush.bf16.msra.mxu0 %v4463_v63  ;;  %v4460_v29 = vld [vmem:[%s5728_s15 + $0x20] sm:$0xff]  ;;  %v4459_v51 = vld [vmem:[%s5728_s15 + $0x18] sm:$0xff]  ;;  %v4458_v15 = vld [vmem:[%s5728_s15 + $0x10] sm:$0xff]  ;;  %vm3249_vm10 = vcmask 1024  }
 0xa28   : > { %v4457_v30 = vld [vmem:[%s5728_s15 + $0x8] sm:$0xff]  ;;  %v4456_v53 = vld [vmem:[%s5728_s15] sm:$0xff]  ;;  %v3132_v3 = vsel %vm3131_vm5, %v3120_v56, %v3129_v2  ;;  %v4606_v44 = vld [vmem:[#allocation3] ss:$0 sm:$0xff] }
 0xa29   : > { %v3133_v4 = vpack.c.bf16 %v3132_v3, %v3132_v3  ;;  %v4604_v6 = vld [vmem:[%s5729_s20] ss:$0 sm:$0xff] }
 0xa2a   : > { %v4605_v12 = vld [vmem:[%s5730_s16] ss:$0 sm:$0xff] }
 0xa2b   : > { %3203 = vmatpush.bf16.msra.mxu0 %v4462_v0 }
 0xa2f   : > { %3204 = vmatpush.bf16.msra.mxu0 %v4461_v1 }
 0xa33   : > { %3205 = vmatpush.bf16.msra.mxu0 %v4460_v29 }
 0xa37   : > { %3206 = vmatpush.bf16.msra.mxu0 %v4459_v51 }
 0xa3b   : > { %3207 = vmatpush.bf16.msra.mxu0 %v4458_v15 }
 0xa3f   : > { %3208 = vmatpush.bf16.msra.mxu0 %v4457_v30 }
 0xa43   : > { %3209 = vmatpush.bf16.msra.mxu0 %v4456_v53 }
 0xa46   : > { %3210 = vmatmul.bf16.vlgmr.msra.gmra.mxu0 %v3133_v4 }
 0xac3   : > { %v3211_v8 = vpop.f32.mrf.mxu0 }
 0xac4   : > { %v3212_v9 = vadd.f32 %v4604_v6, %v3211_v8 }
 0xac6   : > { %4607 = vtanh.f32 %v3212_v9 }
 0xacb   : > { %v3213_v13 = vpop.f32.mrf.mxu0 }
 0xacc   : > { %v4608_v41 = vpop.eup %4607 }
 0xacd   : > { %v3220_v5 = vmul.f32 %v4608_v41, %v4605_v12 }
 0xacf   : > { %v3222_v14 = vsel %vm3221_vm6, %v3220_v5, 0.0 }
 0xad0   : > { %3223 = vadd.xlane.f32.xlu0 %v3222_v14 }
 0xb43   : > { %v3224_v11 = vpop.xlane.xlu0 %3223 }
 0xb44   : > { %v3229_v16 = vadd.f32 %v4606_v44, %v3224_v11 }
 0xb46   : > { %v4258_v17 = vmul.f32 -1.442695, %v3229_v16 }
 0xb48   : > { %4609 = vpow2.f32 %v4258_v17 }
 0xb4e   : > { %v4610_v18 = vpop.eup %4609 }
 0xb4f   : > { %v3233_v19 = vadd.f32 1.0, %v4610_v18 }
 0xb51   : > { %4611 = vrcp.f32 %v3233_v19  ;;  %v3245_v22 = vand.u32 2147483648, %v3233_v19  ;;  %v3243_v24 = vand.u32 2147483647, %v3233_v19  ;;  %vm3239_vm8 = vweird.f32 %v3233_v19 }
 0xb53   : > { %v3246_v26 = vor.u32 1.1754944e-38, %v3245_v22  ;;  %vm3244_vm11 = vcmp.eq.f32.partialorder %v3243_v24, 8.507059e+37 }
 0xb57   : > { %v4612_v20 = vpop.eup %4611 }
 0xb58   : > { %v3235_v21 = vmul.f32 %v4612_v20, %v3233_v19  ;;  %vm3240_vm7 = vweird.f32 %v4612_v20 }
 0xb59   : > { %vm3241_vm9 = vmor %vm3239_vm8, %vm3240_vm7 }
 0xb5a   : > { %v3236_v49 = vsub.f32 1.0, %v3235_v21 }
 0xb5c   : > { %v3237_v23 = vmul.f32 %v4612_v20, %v3236_v49 }
 0xb5e   : > { %v3238_v25 = vadd.f32 %v4612_v20, %v3237_v23 }
 0xb60   : > { %v3242_v27 = vsel %vm3241_vm9, %v4612_v20, %v3238_v25 }
 0xb61   : > { %v3247_v58 = vsel %vm3244_vm11, %v3246_v26, %v3242_v27 }
 0xb62   : > { %3250 = vst.msk [vmem:[%s5731_s1] sm:$0x3] %vm3249_vm10, %v3247_v58 }
 0xb63 PF: > { %s5732_s25 = sld [smem:[#allocation15_spill]]  ;;  %s5735_s23 = smov %s4767_s24 }
 0xb64   : > { %s5733_s14 = sld [smem:[#allocation14_spill]] }
 0xb65   : > { %s5734_s2 = sld [smem:[#allocation16_spill]] }
 0xb69   : > { %p38_p5 = scmp.ge.s32.totalorder %s5732_s25, 4  }
 0xb6a   : > { %s5736_s24 = smov %s5733_s14 }
 0xb6b   :  { %40 = sbr.rel (!%p38_p5) target bundleno = 24 (0x18), region = 205 }
 0xb70   :  { %3262 = vsyncpa [#allocation5], 1 }
 0xb71   :  { %3264 = vsyncpa [#allocation5 + $0x1], 1 }
 0xb72   :  { %3265 = vsyncpa [#allocation7], 1 }
 0xb73   :  { %3267 = vsyncpa [#allocation7 + $0x1], 1 }
 0xb74   :  { %3268 = vsyncpa [#allocation10], 1 }
 0xb75   :  { %3270 = vsyncpa [#allocation10 + $0x1], 1 }

</bundles_post_ra>
